<compile_context>
chip_gen: v6e
topology: v6e:2x2x1
jax: 0.10.0
libtpu: 0.0.40
codegen_flags: <defaults>
</compile_context>

<pallas_src>
import functools

import jax
import jax.numpy as jnp
from jax.experimental import pallas as pl
from jax.experimental.pallas import tpu as pltpu

_GATE_PAD = 128  # gate projection padded to one full 128-lane block


def _round_up(v, m):
    return ((v + m - 1) // m) * m


def _choose_tiling(N, F, B, cdt_size, requested_tile_n):
    """Pick tile_n and vmem_limit_bytes from actual buffer sizes / chip VMEM."""
    try:
        vmem_cap = int(pltpu.get_tpu_info().vmem_capacity_bytes)
    except Exception:
        vmem_cap = 64 * 1024 * 1024  # v7x floor (smallest of v5e/v6e/v7x)
    budget = int(vmem_cap * 0.70)

    f_pad = _round_up(F, 128)
    g_pad = _round_up(F + _GATE_PAD, 128)

    def usage(tn):
        u = 0
        u += 2 * tn * f_pad * cdt_size      # x tiles (double-buffered)
        u += 2 * tn * 128 * 4               # seg column tiles (lane-padded)
        u += 2 * 8 * tn * 4                 # seg row tiles
        u += 2 * tn * 128 * 4               # logits output tiles (lane-padded)
        u += 1 * F * g_pad * cdt_size       # fused weights (Buffered(1))
        u += 1 * 8 * g_pad * 4              # fused bias   (Buffered(1))
        u += _round_up(B, 8) * f_pad * 4    # resident pooled accumulator
        u += 2 * 8 * 128 * 4                # resident segmax / segsum
        u += tn * g_pad * 4                 # z = x @ Wc working set (f32)
        u += 2 * tn * f_pad * 4             # h*e / cast temporaries
        return u

    tn = 512 if requested_tile_n is None else int(requested_tile_n)
    tn = max(128, min(_round_up(tn, 128), _round_up(max(N, 1), 128)))
    while tn > 128 and usage(tn) > budget:
        tn = max(128, _round_up(tn // 2, 128))

    vmem_limit = min(int(vmem_cap * 0.9), max(2 * usage(tn), 32 * 1024 * 1024))
    return tn, vmem_limit


def _global_attention_kernel(num_feat, num_graphs,
                             x_ref, segc_ref, segr_ref, wc_ref, bc_ref,
                             out_ref, logit_ref, segmax_ref, segsum_ref):
    F = num_feat
    B = num_graphs
    i = pl.program_id(0)
    n_tiles = pl.num_programs(0)
    neg_inf = jnp.float32(-jnp.inf)
    cdt = x_ref.dtype  # MXU compute dtype (bf16 by default)

    @pl.when(i == 0)
    def _init():
        out_ref[...] = jnp.zeros(out_ref.shape, out_ref.dtype)
        segmax_ref[...] = jnp.full(segmax_ref.shape, neg_inf, segmax_ref.dtype)
        segsum_ref[...] = jnp.zeros(segsum_ref.shape, segsum_ref.dtype)

    x = x_ref[...]                               # [TN, F]   compute dtype
    seg_col = segc_ref[...]                      # [TN, 1]   int32
    seg_row = segr_ref[...]                      # [1, TN]   int32
    tn = x.shape[0]

    # Segment-membership masks in both orientations, built in-register.
    mask_nb = seg_col == jax.lax.broadcasted_iota(jnp.int32, (tn, B), 1)   # [TN, B]
    mask_bn = seg_row == jax.lax.broadcasted_iota(jnp.int32, (B, tn), 0)   # [B, TN]

    # Fused (nn | gate) projection: one MXU pass gives h and the gate logit.
    z = jnp.dot(x, wc_ref[...], preferred_element_type=jnp.float32) + bc_ref[...]
    h = z[:, :F]                                                            # [TN, F]
    logits = z[:, F:F + 1]                                                  # [TN, 1]
    # Raw logits out (column block; the (N,1) HBM array is contiguous anyway).
    logit_ref[...] = logits

    # ---- online per-segment running max / sum-exp --------------------------
    old_max = segmax_ref[...]                                               # [1, B]
    tile_max = jnp.max(jnp.where(mask_nb, logits, neg_inf),
                       axis=0, keepdims=True)                               # [1, B]
    new_max = jnp.maximum(old_max, tile_max)
    # alpha rescales the running sums when the max grows (guard empty segs).
    alpha = jnp.exp(jnp.where(new_max == neg_inf, 0.0, old_max - new_max))  # [1, B]

    node_max = jnp.max(jnp.where(mask_nb, new_max, neg_inf),
                       axis=1, keepdims=True)                               # [TN, 1]
    e = jnp.where(node_max == neg_inf, 0.0,
                  jnp.exp(logits - node_max))                               # [TN, 1]
    tile_sum = jnp.sum(jnp.where(mask_nb, e, 0.0),
                       axis=0, keepdims=True)                               # [1, B]

    segsum_ref[...] = alpha * segsum_ref[...] + tile_sum
    segmax_ref[...] = new_max

    # [1, B] -> [B, 1] without an explicit transpose (iota-mask + reduce).
    eye = (jax.lax.broadcasted_iota(jnp.int32, (B, B), 0)
           == jax.lax.broadcasted_iota(jnp.int32, (B, B), 1))

    def row_to_col(row):
        return jnp.sum(jnp.where(eye, row, 0.0), axis=1, keepdims=True)

    # ---- pooled accumulator: out[b] = alpha_b * out[b] + sum_n m e_n h_n ----
    ehc = (h * e).astype(cdt)                                               # [TN, F]
    partial = jnp.dot(mask_bn.astype(cdt), ehc,
                      preferred_element_type=jnp.float32)                   # [B, F]
    out_ref[...] = out_ref[...] * row_to_col(alpha) + partial

    @pl.when(i == n_tiles - 1)
    def _finalize():
        ssum = segsum_ref[...]                                              # [1, B]
        inv = 1.0 / jnp.where(ssum > 0.0, ssum, 1.0)
        out_ref[...] = out_ref[...] * row_to_col(inv)


def custom_global_attention(x, batch, num_graphs, w_gate, b_gate, w_nn, b_nn,
                            *, tile_n=None, compute_dtype=jnp.bfloat16):
    """x: [N, F] float, batch: [N] int32 segment ids in [0, num_graphs).

    Returns (out [B, F] f32, gate [N, 1] f32).  MXU matmuls run in
    `compute_dtype` (bf16 by default) with f32 accumulation; pass
    compute_dtype=None to keep x.dtype.
    """
    N, F = x.shape
    B = int(num_graphs)
    cdt = jnp.dtype(compute_dtype) if compute_dtype is not None else jnp.dtype(x.dtype)

    # Fused weight/bias: [ w_nn | w_gate padded to a full 128-lane block ].
    w_gate = jnp.reshape(w_gate, (F, 1))
    w_comb = jnp.concatenate(
        [w_nn, jnp.pad(w_gate, ((0, 0), (0, _GATE_PAD - 1)))], axis=1
    ).astype(cdt)                                            # [F, F + 128]
    b_comb = jnp.concatenate(
        [jnp.reshape(b_nn, (1, F)).astype(jnp.float32),
         jnp.pad(jnp.reshape(b_gate, (1, 1)).astype(jnp.float32),
                 ((0, 0), (0, _GATE_PAD - 1)))], axis=1)     # [1, F + 128] f32

    tile_n, vmem_limit = _choose_tiling(N, F, B, cdt.itemsize, tile_n)
    n_tiles = pl.cdiv(N, tile_n)
    n_pad = n_tiles * tile_n

    xp = x.astype(cdt)
    batch_i32 = batch.astype(jnp.int32)
    if n_pad != N:
        xp = jnp.pad(xp, ((0, n_pad - N), (0, 0)))
        batch_p = jnp.pad(batch_i32, (0, n_pad - N), constant_values=B)  # OOR seg id
    else:
        batch_p = batch_i32
    seg_col = batch_p.reshape(n_pad, 1)
    seg_row = batch_p.reshape(1, n_pad)

    kernel = functools.partial(_global_attention_kernel, F, B)

    out, logits, segmax, segsum = pl.pallas_call(
        kernel,
        grid=(n_tiles,),
        in_specs=[
            pl.BlockSpec((tile_n, F), lambda i: (i, 0)),                 # x tiles
            pl.BlockSpec((tile_n, 1), lambda i: (i, 0)),                 # seg ids (col)
            pl.BlockSpec((1, tile_n), lambda i: (0, i)),                 # seg ids (row)
            pl.BlockSpec((F, F + _GATE_PAD), lambda i: (0, 0),
                         pipeline_mode=pl.Buffered(1)),                  # fused W (resident)
            pl.BlockSpec((1, F + _GATE_PAD), lambda i: (0, 0),
                         pipeline_mode=pl.Buffered(1)),                  # fused bias
        ],
        out_specs=(
            pl.BlockSpec((B, F), lambda i: (0, 0)),                      # pooled acc (resident)
            pl.BlockSpec((tile_n, 1), lambda i: (i, 0)),                 # raw gate logits
            pl.BlockSpec((1, B), lambda i: (0, 0)),                      # per-seg max (resident)
            pl.BlockSpec((1, B), lambda i: (0, 0)),                      # per-seg sum-exp
        ),
        out_shape=(
            jax.ShapeDtypeStruct((B, F), jnp.float32),
            jax.ShapeDtypeStruct((n_pad, 1), jnp.float32),
            jax.ShapeDtypeStruct((1, B), jnp.float32),
            jax.ShapeDtypeStruct((1, B), jnp.float32),
        ),
        compiler_params=pltpu.CompilerParams(
            dimension_semantics=("arbitrary",),   # single axis carries accumulators
            vmem_limit_bytes=int(vmem_limit),
        ),
    )(xp, seg_col, seg_row, w_comb, b_comb)

    # Gate softmax finalized outside the kernel: a trivial elementwise op on
    # [N] values using the per-segment (max, sum-exp) produced by the kernel.
    logit_n = logits[:N, 0]
    gate = jnp.exp(logit_n - segmax[0, batch_i32]) / segsum[0, batch_i32]
    return out, gate[:, None]


def _reference(x, batch, num_graphs, w_gate, b_gate, w_nn, b_nn,
               compute_dtype=None):
    """Pure-JAX reference; optionally casts MXU operands to compute_dtype to
    match the kernel's bf16 matmul inputs (accumulation in f32 either way)."""
    if compute_dtype is not None:
        xc = x.astype(compute_dtype)
        wg = w_gate.astype(compute_dtype)
        wn = w_nn.astype(compute_dtype)
    else:
        xc, wg, wn = x, w_gate, w_nn
    logits = jnp.dot(xc, wg, preferred_element_type=jnp.float32) + b_gate   # [N, 1]
    seg_max = jax.ops.segment_max(logits[:, 0], batch, num_graphs)
    e = jnp.exp(logits[:, 0] - seg_max[batch])
    denom = jax.ops.segment_sum(e, batch, num_graphs)
    gate = (e / denom[batch])[:, None]
    h = jnp.dot(xc, wn, preferred_element_type=jnp.float32) + b_nn
    out = jax.ops.segment_sum(h * gate, batch, num_graphs)
    return out, gate


if __name__ == "__main__":
    key = jax.random.PRNGKey(0)
    # 1100 nodes, 128 features, 5 graphs -> 3 tiles of 512 rows (with padding).
    N, F, B = 1100, 128, 5

    k1, k2, k3, k4, k5 = jax.random.split(key, 5)
    x = jax.random.normal(k1, (N, F), dtype=jnp.float32)
    batch = jnp.arange(N, dtype=jnp.int32) % B           # interleaved segment ids

    # gate_nn = Linear(F, 1); nn_module = Linear(F, F)
    w_gate = jax.random.normal(k2, (F, 1), dtype=jnp.float32) * 0.1
    b_gate = jax.random.normal(k3, (1, 1), dtype=jnp.float32) * 0.1
    w_nn = jax.random.normal(k4, (F, F), dtype=jnp.float32) * 0.1
    b_nn = jax.random.normal(k5, (1, F), dtype=jnp.float32) * 0.1

    out, gate = custom_global_attention(x, batch, B, w_gate, b_gate, w_nn, b_nn)
    out = jax.block_until_ready(out)
    gate = jax.block_until_ready(gate)

    # Reference uses the same bf16-cast matmul operands as the kernel's MXU
    # path (f32 accumulation), validating the kernel logic itself.
    ref_out, ref_gate = _reference(x, batch, B, w_gate, b_gate, w_nn, b_nn,
                                   compute_dtype=jnp.bfloat16)
    assert jnp.allclose(gate, ref_gate, atol=1e-4, rtol=1e-3), \
        float(jnp.max(jnp.abs(gate - ref_gate)))
    assert jnp.allclose(out, ref_out, atol=2e-2, rtol=2e-2), \
        float(jnp.max(jnp.abs(out - ref_out)))

    print("KERNEL_OK")
</pallas_src>

<mosaic_0001>
module attributes {stable_mosaic.version = 11 : i64} {
  func.func @_global_attention_kernel(%arg0: i32, %arg1: memref<512x128xbf16, #tpu.memory_space<vmem>>, %arg2: memref<512x1xi32, #tpu.memory_space<vmem>>, %arg3: memref<1x512xi32, #tpu.memory_space<vmem>>, %arg4: memref<128x256xbf16, #tpu.memory_space<vmem>>, %arg5: memref<1x256xf32, #tpu.memory_space<vmem>>, %arg6: memref<5x128xf32, #tpu.memory_space<vmem>>, %arg7: memref<512x1xf32, #tpu.memory_space<vmem>>, %arg8: memref<1x5xf32, #tpu.memory_space<vmem>>, %arg9: memref<1x5xf32, #tpu.memory_space<vmem>>) attributes {dimension_semantics = [#tpu.dimension_semantics<arbitrary>], iteration_bounds = array<i64: 3>, scalar_prefetch = 0 : i64, scratch_operands = 0 : i64, tpu.core_type = #tpu.core_type<tc>, window_params = [{transform_indices = @transform_0, window_bounds = array<i64: 512, 128>}, {transform_indices = @transform_1, window_bounds = array<i64: 512, 1>}, {transform_indices = @transform_2, window_bounds = array<i64: 1, 512>}, {pipeline_mode = #tpu.pipeline_mode<synchronous>, transform_indices = @transform_3, window_bounds = array<i64: 128, 256>}, {pipeline_mode = #tpu.pipeline_mode<synchronous>, transform_indices = @transform_4, window_bounds = array<i64: 1, 256>}, {pipeline_mode = #tpu.pipeline_mode<synchronous>, transform_indices = @transform_5, window_bounds = array<i64: 5, 128>}, {transform_indices = @transform_6, window_bounds = array<i64: 512, 1>}, {pipeline_mode = #tpu.pipeline_mode<synchronous>, transform_indices = @transform_7, window_bounds = array<i64: 1, 5>}, {pipeline_mode = #tpu.pipeline_mode<synchronous>, transform_indices = @transform_8, window_bounds = array<i64: 1, 5>}]} {
    %c0_i32 = arith.constant 0 : i32
    %0 = arith.cmpi eq, %arg0, %c0_i32 : i32
    %1 = arith.extui %0 : i1 to i32
    %cst = arith.constant 0xFF800000 : f32
    %c0_i32_0 = arith.constant 0 : i32
    %2 = arith.cmpi ne, %1, %c0_i32_0 : i32
    scf.if %2 {
      %cst_39 = arith.constant 0.000000e+00 : f32
      %81 = vector.broadcast %cst_39 : f32 to vector<5x128xf32>
      %c0_40 = arith.constant 0 : index
      %c0_41 = arith.constant 0 : index
      %82 = vector.load %arg6[%c0_40, %c0_41] : memref<5x128xf32, #tpu.memory_space<vmem>>, vector<5x128xf32>
      tpu.vector_store %arg6[%c0_40, %c0_41], %81 {strides = array<i32>} : memref<5x128xf32, #tpu.memory_space<vmem>>, vector<5x128xf32>,
      %83 = vector.broadcast %cst : f32 to vector<1x5xf32>
      %c0_42 = arith.constant 0 : index
      %c0_43 = arith.constant 0 : index
      %84 = vector.load %arg8[%c0_42, %c0_43] : memref<1x5xf32, #tpu.memory_space<vmem>>, vector<1x5xf32>
      tpu.vector_store %arg8[%c0_42, %c0_43], %83 {strides = array<i32>} : memref<1x5xf32, #tpu.memory_space<vmem>>, vector<1x5xf32>,
      %cst_44 = arith.constant 0.000000e+00 : f32
      %85 = vector.broadcast %cst_44 : f32 to vector<1x5xf32>
      %c0_45 = arith.constant 0 : index
      %c0_46 = arith.constant 0 : index
      %86 = vector.load %arg9[%c0_45, %c0_46] : memref<1x5xf32, #tpu.memory_space<vmem>>, vector<1x5xf32>
      tpu.vector_store %arg9[%c0_45, %c0_46], %85 {strides = array<i32>} : memref<1x5xf32, #tpu.memory_space<vmem>>, vector<1x5xf32>,
    } else {
    }
    %c0 = arith.constant 0 : index
    %c0_1 = arith.constant 0 : index
    %3 = vector.load %arg1[%c0, %c0_1] : memref<512x128xbf16, #tpu.memory_space<vmem>>, vector<512x128xbf16>
    %c0_2 = arith.constant 0 : index
    %c0_3 = arith.constant 0 : index
    %4 = vector.load %arg2[%c0_2, %c0_3] : memref<512x1xi32, #tpu.memory_space<vmem>>, vector<512x1xi32>
    %c0_4 = arith.constant 0 : index
    %c0_5 = arith.constant 0 : index
    %5 = vector.load %arg3[%c0_4, %c0_5] : memref<1x512xi32, #tpu.memory_space<vmem>>, vector<1x512xi32>
    %6 = tpu.iota {dimensions = array<i32: 1>} : vector<512x5xi32>
    %7 = vector.broadcast %4 : vector<512x1xi32> to vector<512x5xi32>
    %8 = arith.cmpi eq, %7, %6 : vector<512x5xi32>
    %9 = tpu.iota {dimensions = array<i32: 0>} : vector<5x512xi32>
    %10 = vector.broadcast %5 : vector<1x512xi32> to vector<5x512xi32>
    %11 = arith.cmpi eq, %10, %9 : vector<5x512xi32>
    %c0_6 = arith.constant 0 : index
    %c0_7 = arith.constant 0 : index
    %12 = vector.load %arg4[%c0_6, %c0_7] : memref<128x256xbf16, #tpu.memory_space<vmem>>, vector<128x256xbf16>
    %cst_8 = arith.constant dense<0.000000e+00> : vector<512x256xf32>
    %13 = tpu.matmul %3, %12, %cst_8 {dimension_numbers = #tpu.dot_dimension_numbers<[1], [0], [0], [1], [0, 0, 1, 1], [], []>} : vector<512x128xbf16>, vector<128x256xbf16>, vector<512x256xf32> -> vector<512x256xf32>
    %c0_9 = arith.constant 0 : index
    %c0_10 = arith.constant 0 : index
    %14 = vector.load %arg5[%c0_9, %c0_10] : memref<1x256xf32, #tpu.memory_space<vmem>>, vector<1x256xf32>
    %15 = vector.broadcast %14 : vector<1x256xf32> to vector<512x256xf32>
    %16 = arith.addf %13, %15 : vector<512x256xf32>
    %17 = vector.extract_strided_slice %16 {offsets = [0, 0], sizes = [512, 128], strides = [1, 1]} : vector<512x256xf32> to vector<512x128xf32>
    %18 = vector.extract_strided_slice %16 {offsets = [0, 128], sizes = [512, 1], strides = [1, 1]} : vector<512x256xf32> to vector<512x1xf32>
    %c0_11 = arith.constant 0 : index
    %c0_12 = arith.constant 0 : index
    %19 = vector.load %arg7[%c0_11, %c0_12] : memref<512x1xf32, #tpu.memory_space<vmem>>, vector<512x1xf32>
    tpu.vector_store %arg7[%c0_11, %c0_12], %18 {strides = array<i32>} : memref<512x1xf32, #tpu.memory_space<vmem>>, vector<512x1xf32>,
    %c0_13 = arith.constant 0 : index
    %c0_14 = arith.constant 0 : index
    %20 = vector.load %arg8[%c0_13, %c0_14] : memref<1x5xf32, #tpu.memory_space<vmem>>, vector<1x5xf32>
    %cst_15 = arith.constant 0xFF800000 : f32
    %21 = vector.shape_cast %18 : vector<512x1xf32> to vector<512x1xf32>
    %22 = vector.broadcast %21 : vector<512x1xf32> to vector<512x5xf32>
    %23 = vector.broadcast %cst_15 : f32 to vector<512x5xf32>
    %24 = arith.select %8, %22, %23 : vector<512x5xi1>, vector<512x5xf32>
    %cst_16 = arith.constant dense<0xFF800000> : vector<5xf32>
    %25 = vector.multi_reduction <maximumf>, %24, %cst_16 [0] : vector<512x5xf32> to vector<5xf32>
    %26 = vector.shape_cast %25 : vector<5xf32> to vector<1x5xf32>
    %27 = arith.maximumf %20, %26 : vector<1x5xf32>
    %cst_17 = arith.constant 0xFF800000 : f32
    %28 = vector.broadcast %cst_17 : f32 to vector<1x5xf32>
    %29 = arith.cmpf oeq, %27, %28 : vector<1x5xf32>
    %30 = arith.subf %20, %27 : vector<1x5xf32>
    %cst_18 = arith.constant 0.000000e+00 : f32
    %31 = vector.broadcast %cst_18 : f32 to vector<1x5xf32>
    %32 = arith.select %29, %31, %30 : vector<1x5xi1>, vector<1x5xf32>
    %33 = math.exp %32 : vector<1x5xf32>
    %cst_19 = arith.constant 0xFF800000 : f32
    %34 = vector.shape_cast %27 : vector<1x5xf32> to vector<1x5xf32>
    %35 = vector.broadcast %34 : vector<1x5xf32> to vector<512x5xf32>
    %36 = vector.broadcast %cst_19 : f32 to vector<512x5xf32>
    %37 = arith.select %8, %35, %36 : vector<512x5xi1>, vector<512x5xf32>
    %cst_20 = arith.constant dense<0xFF800000> : vector<512xf32>
    %38 = vector.multi_reduction <maximumf>, %37, %cst_20 [1] : vector<512x5xf32> to vector<512xf32>
    %39 = vector.shape_cast %38 : vector<512xf32> to vector<512x1xf32>
    %cst_21 = arith.constant 0xFF800000 : f32
    %40 = vector.broadcast %cst_21 : f32 to vector<512x1xf32>
    %41 = arith.cmpf oeq, %39, %40 : vector<512x1xf32>
    %42 = arith.subf %18, %39 : vector<512x1xf32>
    %43 = math.exp %42 : vector<512x1xf32>
    %cst_22 = arith.constant 0.000000e+00 : f32
    %44 = vector.broadcast %cst_22 : f32 to vector<512x1xf32>
    %45 = arith.select %41, %44, %43 : vector<512x1xi1>, vector<512x1xf32>
    %cst_23 = arith.constant 0.000000e+00 : f32
    %46 = vector.shape_cast %45 : vector<512x1xf32> to vector<512x1xf32>
    %47 = vector.broadcast %46 : vector<512x1xf32> to vector<512x5xf32>
    %48 = vector.broadcast %cst_23 : f32 to vector<512x5xf32>
    %49 = arith.select %8, %47, %48 : vector<512x5xi1>, vector<512x5xf32>
    %cst_24 = arith.constant dense<0.000000e+00> : vector<5xf32>
    %50 = vector.multi_reduction <add>, %49, %cst_24 [0] : vector<512x5xf32> to vector<5xf32>
    %51 = vector.shape_cast %50 : vector<5xf32> to vector<1x5xf32>
    %c0_25 = arith.constant 0 : index
    %c0_26 = arith.constant 0 : index
    %52 = vector.load %arg9[%c0_25, %c0_26] : memref<1x5xf32, #tpu.memory_space<vmem>>, vector<1x5xf32>
    %53 = arith.mulf %33, %52 : vector<1x5xf32>
    %54 = arith.addf %53, %51 : vector<1x5xf32>
    %c0_27 = arith.constant 0 : index
    %c0_28 = arith.constant 0 : index
    %55 = vector.load %arg9[%c0_27, %c0_28] : memref<1x5xf32, #tpu.memory_space<vmem>>, vector<1x5xf32>
    tpu.vector_store %arg9[%c0_27, %c0_28], %54 {strides = array<i32>} : memref<1x5xf32, #tpu.memory_space<vmem>>, vector<1x5xf32>,
    %c0_29 = arith.constant 0 : index
    %c0_30 = arith.constant 0 : index
    %56 = vector.load %arg8[%c0_29, %c0_30] : memref<1x5xf32, #tpu.memory_space<vmem>>, vector<1x5xf32>
    tpu.vector_store %arg8[%c0_29, %c0_30], %27 {strides = array<i32>} : memref<1x5xf32, #tpu.memory_space<vmem>>, vector<1x5xf32>,
    %57 = tpu.iota {dimensions = array<i32: 0>} : vector<5x5xi32>
    %58 = tpu.iota {dimensions = array<i32: 1>} : vector<5x5xi32>
    %59 = arith.cmpi eq, %57, %58 : vector<5x5xi32>
    %60 = vector.broadcast %45 : vector<512x1xf32> to vector<512x128xf32>
    %61 = arith.mulf %17, %60 : vector<512x128xf32>
    %62 = arith.truncf %61 : vector<512x128xf32> to vector<512x128xbf16>
    %63 = arith.extui %11 : vector<5x512xi1> to vector<5x512xi32>
    %64 = arith.sitofp %63 : vector<5x512xi32> to vector<5x512xf32>
    %65 = arith.truncf %64 : vector<5x512xf32> to vector<5x512xbf16>
    %cst_31 = arith.constant dense<0.000000e+00> : vector<5x128xf32>
    %66 = tpu.matmul %65, %62, %cst_31 {dimension_numbers = #tpu.dot_dimension_numbers<[1], [0], [0], [1], [0, 0, 1, 1], [], []>} : vector<5x512xbf16>, vector<512x128xbf16>, vector<5x128xf32> -> vector<5x128xf32>
    %c0_32 = arith.constant 0 : index
    %c0_33 = arith.constant 0 : index
    %67 = vector.load %arg6[%c0_32, %c0_33] : memref<5x128xf32, #tpu.memory_space<vmem>>, vector<5x128xf32>
    %cst_34 = arith.constant 0.000000e+00 : f32
    %68 = vector.shape_cast %33 : vector<1x5xf32> to vector<1x5xf32>
    %69 = vector.broadcast %68 : vector<1x5xf32> to vector<5x5xf32>
    %70 = vector.broadcast %cst_34 : f32 to vector<5x5xf32>
    %71 = arith.select %59, %69, %70 : vector<5x5xi1>, vector<5x5xf32>
    %cst_35 = arith.constant dense<0.000000e+00> : vector<5xf32>
    %72 = vector.multi_reduction <add>, %71, %cst_35 [1] : vector<5x5xf32> to vector<5xf32>
    %73 = vector.shape_cast %72 : vector<5xf32> to vector<5x1xf32>
    %74 = vector.broadcast %73 : vector<5x1xf32> to vector<5x128xf32>
    %75 = arith.mulf %67, %74 : vector<5x128xf32>
    %76 = arith.addf %75, %66 : vector<5x128xf32>
    %c0_36 = arith.constant 0 : index
    %c0_37 = arith.constant 0 : index
    %77 = vector.load %arg6[%c0_36, %c0_37] : memref<5x128xf32, #tpu.memory_space<vmem>>, vector<5x128xf32>
    tpu.vector_store %arg6[%c0_36, %c0_37], %76 {strides = array<i32>} : memref<5x128xf32, #tpu.memory_space<vmem>>, vector<5x128xf32>,
    %c2_i32 = arith.constant 2 : i32
    %78 = arith.cmpi eq, %arg0, %c2_i32 : i32
    %79 = arith.extui %78 : i1 to i32
    %c0_i32_38 = arith.constant 0 : i32
    %80 = arith.cmpi ne, %79, %c0_i32_38 : i32
    scf.if %80 {
      %c0_39 = arith.constant 0 : index
      %c0_40 = arith.constant 0 : index
      %81 = vector.load %arg9[%c0_39, %c0_40] : memref<1x5xf32, #tpu.memory_space<vmem>>, vector<1x5xf32>
      %cst_41 = arith.constant 0.000000e+00 : f32
      %82 = vector.broadcast %cst_41 : f32 to vector<1x5xf32>
      %83 = arith.cmpf ogt, %81, %82 : vector<1x5xf32>
      %cst_42 = arith.constant 1.000000e+00 : f32
      %84 = vector.broadcast %cst_42 : f32 to vector<1x5xf32>
      %85 = arith.select %83, %81, %84 : vector<1x5xi1>, vector<1x5xf32>
      %cst_43 = arith.constant 1.000000e+00 : f32
      %86 = vector.broadcast %cst_43 : f32 to vector<1x5xf32>
      %87 = arith.divf %86, %85 : vector<1x5xf32>
      %c0_44 = arith.constant 0 : index
      %c0_45 = arith.constant 0 : index
      %88 = vector.load %arg6[%c0_44, %c0_45] : memref<5x128xf32, #tpu.memory_space<vmem>>, vector<5x128xf32>
      %cst_46 = arith.constant 0.000000e+00 : f32
      %89 = vector.shape_cast %87 : vector<1x5xf32> to vector<1x5xf32>
      %90 = vector.broadcast %89 : vector<1x5xf32> to vector<5x5xf32>
      %91 = vector.broadcast %cst_46 : f32 to vector<5x5xf32>
      %92 = arith.select %59, %90, %91 : vector<5x5xi1>, vector<5x5xf32>
      %cst_47 = arith.constant dense<0.000000e+00> : vector<5xf32>
      %93 = vector.multi_reduction <add>, %92, %cst_47 [1] : vector<5x5xf32> to vector<5xf32>
      %94 = vector.shape_cast %93 : vector<5xf32> to vector<5x1xf32>
      %95 = vector.broadcast %94 : vector<5x1xf32> to vector<5x128xf32>
      %96 = arith.mulf %88, %95 : vector<5x128xf32>
      %c0_48 = arith.constant 0 : index
      %c0_49 = arith.constant 0 : index
      %97 = vector.load %arg6[%c0_48, %c0_49] : memref<5x128xf32, #tpu.memory_space<vmem>>, vector<5x128xf32>
      tpu.vector_store %arg6[%c0_48, %c0_49], %96 {strides = array<i32>} : memref<5x128xf32, #tpu.memory_space<vmem>>, vector<5x128xf32>,
    } else {
    }
    return
  }
  func.func @transform_0(%arg0: i32) -> (i32, i32) {
    %c0_i32 = arith.constant 0 : i32
    %c0_i32_0 = arith.constant 0 : i32
    return %arg0, %c0_i32 : i32, i32
  }
  func.func @transform_1(%arg0: i32) -> (i32, i32) {
    %c0_i32 = arith.constant 0 : i32
    %c0_i32_0 = arith.constant 0 : i32
    return %arg0, %c0_i32 : i32, i32
  }
  func.func @transform_2(%arg0: i32) -> (i32, i32) {
    %c0_i32 = arith.constant 0 : i32
    %c0_i32_0 = arith.constant 0 : i32
    return %c0_i32, %arg0 : i32, i32
  }
  func.func @transform_3(%arg0: i32) -> (i32, i32) {
    %c0_i32 = arith.constant 0 : i32
    %c0_i32_0 = arith.constant 0 : i32
    %c0_i32_1 = arith.constant 0 : i32
    return %c0_i32, %c0_i32_0 : i32, i32
  }
  func.func @transform_4(%arg0: i32) -> (i32, i32) {
    %c0_i32 = arith.constant 0 : i32
    %c0_i32_0 = arith.constant 0 : i32
    %c0_i32_1 = arith.constant 0 : i32
    return %c0_i32, %c0_i32_0 : i32, i32
  }
  func.func @transform_5(%arg0: i32) -> (i32, i32) {
    %c0_i32 = arith.constant 0 : i32
    %c0_i32_0 = arith.constant 0 : i32
    %c0_i32_1 = arith.constant 0 : i32
    return %c0_i32, %c0_i32_0 : i32, i32
  }
  func.func @transform_6(%arg0: i32) -> (i32, i32) {
    %c0_i32 = arith.constant 0 : i32
    %c0_i32_0 = arith.constant 0 : i32
    return %arg0, %c0_i32 : i32, i32
  }
  func.func @transform_7(%arg0: i32) -> (i32, i32) {
    %c0_i32 = arith.constant 0 : i32
    %c0_i32_0 = arith.constant 0 : i32
    %c0_i32_1 = arith.constant 0 : i32
    return %c0_i32, %c0_i32_0 : i32, i32
  }
  func.func @transform_8(%arg0: i32) -> (i32, i32) {
    %c0_i32 = arith.constant 0 : i32
    %c0_i32_0 = arith.constant 0 : i32
    %c0_i32_1 = arith.constant 0 : i32
    return %c0_i32, %c0_i32_0 : i32, i32
  }
}

</mosaic_0001>

<bundles_post_ra>
// kernel: tpu_custom_call.1
= control target key start
LH: loop header
LB: loop body
LE: loop exit
PB: predicated region body
PF: predicated region fallthrough
CT: control target
= control target key end

     0   :  { %14 = vsyncpa [#allocation3], 0  ;;  %s6763_s0 = inlined_call_operand.vmem [shape: bf16[1536,128], index: 0, kind: input, shape index: {}]   ;;  %s6764_s1 = inlined_call_operand.vmem [shape: s32[1536,1], index: 1, kind: input, shape index: {}]   ;;  %s6765_s2 = inlined_call_operand.vmem [shape: s32[1,1536], index: 2, kind: input, shape index: {}]   ;;  %s6766_s3 = inlined_call_operand.vmem [shape: bf16[128,256], index: 3, kind: input, shape index: {}]   ;;  %s6767_s4 = inlined_call_operand.vmem [shape: f32[1,256], index: 4, kind: input, shape index: {}]   ;;  %s6768_s5 = inlined_call_operand.hbm [shape: f32[5,128], index: 5, kind: output, shape index: {0}]   ;;  %s6769_s6 = inlined_call_operand.vmem [shape: f32[1536,1], index: 6, kind: output, shape index: {1}]   ;;  %s6770_s7 = inlined_call_operand.hbm [shape: f32[1,5], index: 7, kind: output, shape index: {2}]   ;;  %s6771_s8 = inlined_call_operand.hbm [shape: f32[1,5], index: 8, kind: output, shape index: {3}]  }
   0x1   :  { %15 = vsyncpa [#allocation5], 0  ;;  %s3986_s27 = smov 0  }
   0x2 LB: > { %s3992_s28 = sadd.s32 4294967295, %s3932_s27   ;;  %p3484_p0 = scmp.ge.s32.totalorder %s3932_s27, 1  ;;  %s3932_s27 = sphi %s3986_s27, %s21_s27  }
   0x3   : > { %p278_p1 = scmp.lt.s32.totalorder %s3932_s27, 4 }
   0x5   : > { %p279_p2 = pnand %p3484_p0, %p278_p1 }
   0x7   : > { %282 = sbr.rel (%p279_p2) target bundleno = 1379 (0x563), region = 40 }
   0xc   : > { %s3485_s29 = sshll.u32 %s3992_s28, 6  ;;  %s3489_s30 = sshll.u32 %s3992_s28, 2 }
   0xd   : > { %p322_p3 = scmp.lt.s32.totalorder %s3485_s29, 191  ;;  %p334_p4 = scmp.lt.s32.totalorder %s3489_s30, 11 }
   0xe   : > { %p3492_p5 = scmp.ne.s32.totalorder %s3992_s28, 0 }
   0xf   : > { %s7604_s29 = smov (!%p322_p3, %s3485_s29), 191  ;;  %s7606_s30 = smov (!%p334_p4, %s3489_s30), 11 }
  0x10   : > { %s3486_s9 = sshll.u32 %s7604_s29, 2  ;;  %s3488_s10 = sshll.u32 %s7604_s29, 3 }
  0x11   : > { %s4003_s13 = scalar_lea.vmem %s6763_s0, %s3486_s9  ;;  %s4008_s16 = scalar_lea.vmem %s6764_s1, %s3488_s10 }
  0x12   : > { %s336_s19 = scalar_lea.vmem %s6765_s2, %s7606_s30  ;;  %s4017_s22 = scalar_lea.vmem %s6769_s6, %s3488_s10 }
  0x13   : > { %348 = sbr.rel (%p3492_p5) target bundleno = 27 (0x1b), region = 44 }
  0x18   : > { %vm350_vm0 = vcmask 32768   ;;  %v3934_v0 = vmov 0.0   ;;  %v3935_v1 = vmov -inf  }
  0x19   : > { %349 = vst [vmem:[#allocation2] sm:$0x1f] %v3934_v0  ;;  %351 = vst.msk [vmem:[#allocation4] sm:$0x1] %vm350_vm0, %v3935_v1 }
  0x1a   : > { %352 = vst.msk [vmem:[#allocation6] sm:$0x1] %vm350_vm0, %v3934_v0 }
  0x1b PF: > { %v3657_v2 = vld [vmem:[%s6766_s3 + $0x74] ss:$8 sps:$4 sm:$0xff]   ;;  %v3936_v3 = vmov 0   ;;  %v3659_v4 = vld [vmem:[%s6766_s3 + $0x70] ss:$8 sps:$4 sm:$0xff]   ;;  %v417_v6 = vld [vmem:[%s4008_s16] sm:$0xff] }
  0x1c   : > { %3656 = vset.pattern.permute.xlu1 %v3936_v3  ;;  %3655 = vset.pattern.permute.xlu0 %v3936_v3  ;;  %v419_v5 = vld [vmem:[%s4008_s16 + $0x10] sm:$0xff]  ;;  %v3660_v7 = vld [vmem:[%s6766_s3 + $0x64] ss:$8 sps:$4 sm:$0xff]   ;;  %v3662_v8 = vld [vmem:[%s6766_s3 + $0x60] ss:$8 sps:$4 sm:$0xff]   ;;  %vm1415_vm1 = vcmask 7168  }
  0x1d   : > { %1062 = vmatprep.subr.bf16.mxu0 %v3657_v2  ;;  %491 = vperm.xlu1 %3656, %v419_v5   ;;  %v420_v9 = vld [vmem:[%s4008_s16 + $0x18] sm:$0xff]  ;;  %v418_v10 = vld [vmem:[%s4008_s16 + $0x8] sm:$0xff]  ;;  %v421_v14 = vld [vmem:[%s4008_s16 + $0x20] sm:$0xff]  ;;  %vm1865_vm5 = vcmask 39936   ;;  %p3553_p6 = scmp.ne.s32.totalorder %s3992_s28, 2 }
  0x1e   : > { %1063 = vmatpush1.bf16.msra.mxu0 %v3659_v4  ;;  %485 = vperm.xlu0 %3655, %v417_v6   ;;  %v3663_v11 = vld [vmem:[%s6766_s3 + $0x54] ss:$8 sps:$4 sm:$0xff]   ;;  %v3665_v12 = vld [vmem:[%s6766_s3 + $0x50] ss:$8 sps:$4 sm:$0xff]   ;;  %v422_v13 = vld [vmem:[%s4008_s16 + $0x28] sm:$0xff] }
  0x1f   : > { %3606 = vmatprep.subr.bf16.mxu1 %v3657_v2  ;;  %1064 = vmatprep.subr.bf16.mxu0 %v3660_v7  ;;  %v3666_v15 = vld [vmem:[%s6766_s3 + $0x44] ss:$8 sps:$4 sm:$0xff]   ;;  %v3668_v16 = vld [vmem:[%s6766_s3 + $0x40] ss:$8 sps:$4 sm:$0xff]   ;;  %v424_v17 = vld [vmem:[%s4008_s16 + $0x38] sm:$0xff] }
  0x20   : > { %3614 = vmatpush1.bf16.msra.mxu1 %v3659_v4  ;;  %1094 = vmatprep.mubr.bf16.mxu0 %v3936_v3  ;;  %v423_v18 = vld [vmem:[%s4008_s16 + $0x30] sm:$0xff]  ;;  %v426_v21 = vld [vmem:[%s4008_s16 + $0x48] sm:$0xff]  ;;  %v425_v22 = vld [vmem:[%s4008_s16 + $0x40] sm:$0xff] }
  0x21   : > { %494 = vperm.xlu1 %3656, %v420_v9   ;;  %3607 = vmatprep.subr.bf16.mxu1 %v3660_v7  ;;  %v3669_v19 = vld [vmem:[%s6766_s3 + $0x34] ss:$8 sps:$4 sm:$0xff]   ;;  %v3671_v20 = vld [vmem:[%s6766_s3 + $0x30] ss:$8 sps:$4 sm:$0xff]   ;;  %v3672_v23 = vld [vmem:[%s6766_s3 + $0x24] ss:$8 sps:$4 sm:$0xff]  }
  0x22   : > { %1065 = vmatpush1.bf16.msra.mxu0 %v3662_v8  ;;  %488 = vperm.xlu0 %3655, %v418_v10   ;;  %v3674_v24 = vld [vmem:[%s6766_s3 + $0x20] ss:$8 sps:$4 sm:$0xff]   ;;  %v428_v25 = vld [vmem:[%s4008_s16 + $0x58] sm:$0xff]  ;;  %v427_v26 = vld [vmem:[%s4008_s16 + $0x50] sm:$0xff] }
  0x23   : > { %1066 = vmatprep.subr.bf16.mxu0 %v3663_v11  ;;  %1284 = vmatprep.mubr.bf16.mxu1 %v3936_v3  ;;  %v3675_v27 = vld [vmem:[%s6766_s3 + $0x14] ss:$8 sps:$4 sm:$0xff]   ;;  %v3677_v28 = vld [vmem:[%s6766_s3 + $0x10] ss:$8 sps:$4 sm:$0xff]   ;;  %v430_v29 = vld [vmem:[%s4008_s16 + $0x68] sm:$0xff] }
  0x24   : > { %3615 = vmatpush1.bf16.msra.mxu1 %v3662_v8  ;;  %v429_v30 = vld [vmem:[%s4008_s16 + $0x60] sm:$0xff]  ;;  %v432_v33 = vld [vmem:[%s4008_s16 + $0x78] sm:$0xff]  ;;  %v431_v34 = vld [vmem:[%s4008_s16 + $0x70] sm:$0xff] }
  0x25   : > { %500 = vperm.xlu1 %3656, %v422_v13   ;;  %3608 = vmatprep.subr.bf16.mxu1 %v3663_v11  ;;  %v3678_v31 = vld [vmem:[%s6766_s3 + $0x4] ss:$8 sps:$4 sm:$0xff]   ;;  %v3680_v32 = vld [vmem:[%s6766_s3] ss:$8 sps:$4 sm:$0xff]   ;;  %v3682_v38 = vld [vmem:[%s4003_s13 + $0x98] sm:$0xff]  }
  0x26   : > { %1067 = vmatpush1.bf16.msra.mxu0 %v3665_v12  ;;  %497 = vperm.xlu0 %3655, %v421_v14   ;;  %v3681_v35 = vld [vmem:[%s4003_s13] sm:$0xff]   ;;  %v434_v36 = vld [vmem:[%s4008_s16 + $0x88] sm:$0xff]  ;;  %v436_v39 = vld [vmem:[%s4008_s16 + $0x98] sm:$0xff] }
  0x27   : > { %1068 = vmatprep.subr.bf16.mxu0 %v3666_v15  ;;  %v433_v37 = vld [vmem:[%s4008_s16 + $0x80] sm:$0xff]  ;;  %v435_v40 = vld [vmem:[%s4008_s16 + $0x90] sm:$0xff]  ;;  %v3683_v41 = vld [vmem:[%s4003_s13 + $0x8] sm:$0xff]  }
  0x28   : > { %3616 = vmatpush1.bf16.msra.mxu1 %v3665_v12  ;;  %v438_v42 = vld [vmem:[%s4008_s16 + $0xa8] sm:$0xff]  ;;  %v437_v43 = vld [vmem:[%s4008_s16 + $0xa0] sm:$0xff]  ;;  %v440_v45 = vld [vmem:[%s4008_s16 + $0xb8] sm:$0xff] }
  0x29   : > { %506 = vperm.xlu1 %3656, %v424_v17   ;;  %3609 = vmatprep.subr.bf16.mxu1 %v3666_v15  ;;  %v3684_v44 = vld [vmem:[%s4003_s13 + $0xa0] sm:$0xff]   ;;  %v439_v46 = vld [vmem:[%s4008_s16 + $0xb0] sm:$0xff]  ;;  %v442_v48 = vld [vmem:[%s4008_s16 + $0xc8] sm:$0xff] }
  0x2a   : > { %1069 = vmatpush1.bf16.msra.mxu0 %v3668_v16  ;;  %503 = vperm.xlu0 %3655, %v423_v18   ;;  %v3685_v47 = vld [vmem:[%s4003_s13 + $0x10] sm:$0xff]   ;;  %v441_v49 = vld [vmem:[%s4008_s16 + $0xc0] sm:$0xff]  ;;  %v3686_v50 = vld [vmem:[%s4003_s13 + $0xa8] sm:$0xff]  }
  0x2b   : > { %1070 = vmatprep.subr.bf16.mxu0 %v3669_v19  ;;  %v444_v51 = vld [vmem:[%s4008_s16 + $0xd8] sm:$0xff]  ;;  %v443_v52 = vld [vmem:[%s4008_s16 + $0xd0] sm:$0xff]  ;;  %v446_v54 = vld [vmem:[%s4008_s16 + $0xe8] sm:$0xff] }
  0x2c   : > { %3617 = vmatpush1.bf16.msra.mxu1 %v3668_v16  ;;  %v3687_v53 = vld [vmem:[%s4003_s13 + $0x18] sm:$0xff]   ;;  %v445_v55 = vld [vmem:[%s4008_s16 + $0xe0] sm:$0xff]  ;;  %v3688_v56 = vld [vmem:[%s4003_s13 + $0xb0] sm:$0xff]  }
  0x2d   : > { %512 = vperm.xlu1 %3656, %v426_v21   ;;  %3610 = vmatprep.subr.bf16.mxu1 %v3669_v19  ;;  %v448_v57 = vld [vmem:[%s4008_s16 + $0xf8] sm:$0xff]  ;;  %v447_v58 = vld [vmem:[%s4008_s16 + $0xf0] sm:$0xff]  ;;  %v3689_v59 = vld [vmem:[%s4003_s13 + $0x20] sm:$0xff]  }
  0x2e   : > { %1071 = vmatpush1.bf16.msra.mxu0 %v3671_v20  ;;  %509 = vperm.xlu0 %3655, %v425_v22   ;;  %v450_v60 = vld [vmem:[%s4008_s16 + $0x108] sm:$0xff]  ;;  %v449_v61 = vld [vmem:[%s4008_s16 + $0x100] sm:$0xff]  ;;  %v3690_v62 = vld [vmem:[%s4003_s13 + $0xb8] sm:$0xff]  }
  0x2f   : > { %1072 = vmatprep.subr.bf16.mxu0 %v3672_v23  ;;  %v452_v63 = vld [vmem:[%s4008_s16 + $0x118] sm:$0xff]  ;;  %v451_v0 = vld [vmem:[%s4008_s16 + $0x110] sm:$0xff]  ;;  %v3691_v1 = vld [vmem:[%s4003_s13 + $0x28] sm:$0xff]  }
  0x30   : > { %3618 = vmatpush1.bf16.msra.mxu1 %v3671_v20  ;;  %v454_v2 = vld [vmem:[%s4008_s16 + $0x128] sm:$0xff]  ;;  %v453_v4 = vld [vmem:[%s4008_s16 + $0x120] sm:$0xff]  ;;  %v456_v6 = vld [vmem:[%s4008_s16 + $0x138] sm:$0xff] }
  0x31   : > { %518 = vperm.xlu1 %3656, %v428_v25   ;;  %3611 = vmatprep.subr.bf16.mxu1 %v3672_v23  ;;  %v3692_v5 = vld [vmem:[%s4003_s13 + $0xc0] sm:$0xff]   ;;  %v455_v7 = vld [vmem:[%s4008_s16 + $0x130] sm:$0xff]  ;;  %v458_v9 = vld [vmem:[%s4008_s16 + $0x148] sm:$0xff] }
  0x32   : > { %1073 = vmatpush1.bf16.msra.mxu0 %v3674_v24  ;;  %515 = vperm.xlu0 %3655, %v427_v26   ;;  %v3693_v8 = vld [vmem:[%s4003_s13 + $0x30] sm:$0xff]   ;;  %v457_v10 = vld [vmem:[%s4008_s16 + $0x140] sm:$0xff]  ;;  %v3694_v11 = vld [vmem:[%s4003_s13 + $0xc8] sm:$0xff]  }
  0x33   : > { %1074 = vmatprep.subr.bf16.mxu0 %v3675_v27  ;;  %v460_v12 = vld [vmem:[%s4008_s16 + $0x158] sm:$0xff]  ;;  %v459_v13 = vld [vmem:[%s4008_s16 + $0x150] sm:$0xff]  ;;  %v462_v15 = vld [vmem:[%s4008_s16 + $0x168] sm:$0xff] }
  0x34   : > { %3619 = vmatpush1.bf16.msra.mxu1 %v3674_v24  ;;  %v3695_v14 = vld [vmem:[%s4003_s13 + $0x38] sm:$0xff]   ;;  %v461_v16 = vld [vmem:[%s4008_s16 + $0x160] sm:$0xff]  ;;  %v3696_v17 = vld [vmem:[%s4003_s13 + $0xd0] sm:$0xff]  }
  0x35   : > { %524 = vperm.xlu1 %3656, %v430_v29   ;;  %3612 = vmatprep.subr.bf16.mxu1 %v3675_v27  ;;  %v464_v18 = vld [vmem:[%s4008_s16 + $0x178] sm:$0xff]  ;;  %v463_v19 = vld [vmem:[%s4008_s16 + $0x170] sm:$0xff]  ;;  %v3697_v20 = vld [vmem:[%s4003_s13 + $0x40] sm:$0xff]  }
  0x36   : > { %1075 = vmatpush1.bf16.msra.mxu0 %v3677_v28  ;;  %521 = vperm.xlu0 %3655, %v429_v30   ;;  %v466_v21 = vld [vmem:[%s4008_s16 + $0x188] sm:$0xff]  ;;  %v465_v22 = vld [vmem:[%s4008_s16 + $0x180] sm:$0xff]  ;;  %v3698_v23 = vld [vmem:[%s4003_s13 + $0xd8] sm:$0xff]  }
  0x37   : > { %1076 = vmatprep.subr.bf16.mxu0 %v3678_v31  ;;  %v468_v24 = vld [vmem:[%s4008_s16 + $0x198] sm:$0xff]  ;;  %v467_v25 = vld [vmem:[%s4008_s16 + $0x190] sm:$0xff]  ;;  %v3699_v26 = vld [vmem:[%s4003_s13 + $0x48] sm:$0xff]  }
  0x38   : > { %3620 = vmatpush1.bf16.msra.mxu1 %v3677_v28  ;;  %v470_v27 = vld [vmem:[%s4008_s16 + $0x1a8] sm:$0xff]  ;;  %v469_v28 = vld [vmem:[%s4008_s16 + $0x1a0] sm:$0xff]  ;;  %v472_v30 = vld [vmem:[%s4008_s16 + $0x1b8] sm:$0xff] }
  0x39   : > { %530 = vperm.xlu1 %3656, %v432_v33   ;;  %3613 = vmatprep.subr.bf16.mxu1 %v3678_v31  ;;  %v3700_v29 = vld [vmem:[%s4003_s13 + $0xe0] sm:$0xff]   ;;  %v471_v31 = vld [vmem:[%s4008_s16 + $0x1b0] sm:$0xff]  ;;  %v474_v33 = vld [vmem:[%s4008_s16 + $0x1c8] sm:$0xff] }
  0x3a   : > { %1077 = vmatpush1.bf16.msra.mxu0 %v3680_v32  ;;  %527 = vperm.xlu0 %3655, %v431_v34   ;;  %v473_v34 = vld [vmem:[%s4008_s16 + $0x1c0] sm:$0xff] }
  0x3c   : > { %3621 = vmatpush1.bf16.msra.mxu1 %v3680_v32  ;;  %v3701_v32 = vld [vmem:[%s4003_s13 + $0x50] sm:$0xff]  }
  0x3d   : > { %1095 = vmatmul.mubr.bf16.vlgmr.msra.gmra.mxu0 %v3681_v35  ;;  %536 = vperm.xlu1 %3656, %v434_v36   ;;  %v3702_v35 = vld [vmem:[%s4003_s13 + $0xe8] sm:$0xff]   ;;  %v476_v36 = vld [vmem:[%s4008_s16 + $0x1d8] sm:$0xff] }
  0x3e   : > { %533 = vperm.xlu0 %3655, %v433_v37   ;;  %1104 = vmatprep.mubr.bf16.mxu0 %v3936_v3  ;;  %v475_v37 = vld [vmem:[%s4008_s16 + $0x1d0] sm:$0xff] }
  0x3f   : > { %1285 = vmatmul.mubr.bf16.vlgmr.msra.gmra.mxu1 %v3682_v38  ;;  %v3703_v38 = vld [vmem:[%s4003_s13 + $0x58] sm:$0xff]  }
  0x40   : > { %1294 = vmatprep.mubr.bf16.mxu1 %v3936_v3 }
  0x41   : > { %542 = vperm.xlu1 %3656, %v436_v39   ;;  %v478_v39 = vld [vmem:[%s4008_s16 + $0x1e8] sm:$0xff] }
  0x42   : > { %539 = vperm.xlu0 %3655, %v435_v40   ;;  %v477_v40 = vld [vmem:[%s4008_s16 + $0x1e0] sm:$0xff] }
  0x45   : > { %1105 = vmatmul.mubr.bf16.gmra.mxu0 %v3683_v41  ;;  %548 = vperm.xlu1 %3656, %v438_v42   ;;  %v3704_v41 = vld [vmem:[%s4003_s13 + $0xf0] sm:$0xff]   ;;  %v480_v42 = vld [vmem:[%s4008_s16 + $0x1f8] sm:$0xff] }
  0x46   : > { %545 = vperm.xlu0 %3655, %v437_v43   ;;  %1114 = vmatprep.mubr.bf16.mxu0 %v3936_v3  ;;  %v479_v43 = vld [vmem:[%s4008_s16 + $0x1f0] sm:$0xff] }
  0x47   : > { %1295 = vmatmul.mubr.bf16.gmra.mxu1 %v3684_v44  ;;  %v3705_v44 = vld [vmem:[%s4003_s13 + $0x60] sm:$0xff]  }
  0x48   : > { %1304 = vmatprep.mubr.bf16.mxu1 %v3936_v3 }
  0x49   : > { %554 = vperm.xlu1 %3656, %v440_v45   ;;  %v3706_v45 = vld [vmem:[%s4003_s13 + $0xf8] sm:$0xff]  }
  0x4a   : > { %551 = vperm.xlu0 %3655, %v439_v46   ;;  %v3707_v46 = vld [vmem:[%s4003_s13 + $0x68] sm:$0xff]  }
  0x4d   : > { %1115 = vmatmul.mubr.bf16.gmra.mxu0 %v3685_v47  ;;  %560 = vperm.xlu1 %3656, %v442_v48   ;;  %v3708_v47 = vld [vmem:[%s4003_s13 + $0x70] sm:$0xff]   ;;  %v3709_v48 = vld [vmem:[%s4003_s13 + $0x78] sm:$0xff]  }
  0x4e   : > { %557 = vperm.xlu0 %3655, %v441_v49   ;;  %1124 = vmatprep.mubr.bf16.mxu0 %v3936_v3  ;;  %v3710_v49 = vld [vmem:[%s4003_s13 + $0x80] sm:$0xff]  }
  0x4f   : > { %1305 = vmatmul.mubr.bf16.gmra.mxu1 %v3686_v50 }
  0x50   : > { %1314 = vmatprep.mubr.bf16.mxu1 %v3936_v3 }
  0x51   : > { %566 = vperm.xlu1 %3656, %v444_v51   ;;  %v3711_v51 = vld [vmem:[%s4003_s13 + $0x88] sm:$0xff]  }
  0x52   : > { %563 = vperm.xlu0 %3655, %v443_v52  }
  0x55   : > { %1125 = vmatmul.mubr.bf16.gmra.mxu0 %v3687_v53  ;;  %572 = vperm.xlu1 %3656, %v446_v54  }
  0x56   : > { %569 = vperm.xlu0 %3655, %v445_v55   ;;  %1134 = vmatprep.mubr.bf16.mxu0 %v3936_v3  ;;  %v3712_v55 = vld [vmem:[%s4003_s13 + $0x90] sm:$0xff]  }
  0x57   : > { %1315 = vmatmul.mubr.bf16.gmra.mxu1 %v3688_v56 }
  0x58   : > { %1324 = vmatprep.mubr.bf16.mxu1 %v3936_v3 }
  0x59   : > { %578 = vperm.xlu1 %3656, %v448_v57  }
  0x5a   : > { %575 = vperm.xlu0 %3655, %v447_v58  }
  0x5d   : > { %1135 = vmatmul.mubr.bf16.gmra.mxu0 %v3689_v59  ;;  %584 = vperm.xlu1 %3656, %v450_v60  }
  0x5e   : > { %581 = vperm.xlu0 %3655, %v449_v61   ;;  %1144 = vmatprep.mubr.bf16.mxu0 %v3936_v3 }
  0x5f   : > { %1325 = vmatmul.mubr.bf16.gmra.mxu1 %v3690_v62 }
  0x60   : > { %1334 = vmatprep.mubr.bf16.mxu1 %v3936_v3 }
  0x61   : > { %590 = vperm.xlu1 %3656, %v452_v63  }
  0x62   : > { %587 = vperm.xlu0 %3655, %v451_v0  }
  0x65   : > { %1145 = vmatmul.mubr.bf16.gmra.mxu0 %v3691_v1  ;;  %596 = vperm.xlu1 %3656, %v454_v2  }
  0x66   : > { %593 = vperm.xlu0 %3655, %v453_v4   ;;  %1154 = vmatprep.mubr.bf16.mxu0 %v3936_v3 }
  0x67   : > { %1335 = vmatmul.mubr.bf16.gmra.mxu1 %v3692_v5  ;;  %v6773_v5 = vlaneseq }
  0x68   : > { %1344 = vmatprep.mubr.bf16.mxu1 %v3936_v3 }
  0x69   : > { %602 = vperm.xlu1 %3656, %v456_v6  }
  0x6a   : > { %599 = vperm.xlu0 %3655, %v455_v7  }
  0x6d   : > { %1155 = vmatmul.mubr.bf16.gmra.mxu0 %v3693_v8  ;;  %608 = vperm.xlu1 %3656, %v458_v9   ;;  %v4237_v8 = vshrl.u32 %v6773_v5, 7 }
  0x6e   : > { %605 = vperm.xlu0 %3655, %v457_v10   ;;  %1164 = vmatprep.mubr.bf16.mxu0 %v3936_v3 }
  0x6f   : > { %1345 = vmatmul.mubr.bf16.gmra.mxu1 %v3694_v11  ;;  %7016 = vst [vmem:[#allocation17_spill] sm:$0xff] %v4237_v8  ;;  %v6772_v10 = vsub.s32 1, %v4237_v8 }
  0x70   : > { %1354 = vmatprep.mubr.bf16.mxu1 %v3936_v3 }
  0x71   : > { %614 = vperm.xlu1 %3656, %v460_v12   ;;  %v778_v12 = vld [vmem:[%s6767_s4] sm:$0x3] }
  0x72   : > { %611 = vperm.xlu0 %3655, %v459_v13   ;;  %v4249_v13 = vrot.slane %v778_v12, %v6772_v10 }
  0x75   : > { %1165 = vmatmul.mubr.bf16.gmra.mxu0 %v3695_v14  ;;  %620 = vperm.xlu1 %3656, %v462_v15  }
  0x76   : > { %617 = vperm.xlu0 %3655, %v461_v16   ;;  %1174 = vmatprep.mubr.bf16.mxu0 %v3936_v3 }
  0x77   : > { %1355 = vmatmul.mubr.bf16.gmra.mxu1 %v3696_v17 }
  0x78   : > { %1364 = vmatprep.mubr.bf16.mxu1 %v3936_v3 }
  0x79   : > { %626 = vperm.xlu1 %3656, %v464_v18  }
  0x7a   : > { %623 = vperm.xlu0 %3655, %v463_v19  }
  0x7d   : > { %1175 = vmatmul.mubr.bf16.gmra.mxu0 %v3697_v20  ;;  %632 = vperm.xlu1 %3656, %v466_v21  }
  0x7e   : > { %629 = vperm.xlu0 %3655, %v465_v22   ;;  %1184 = vmatprep.mubr.bf16.mxu0 %v3936_v3 }
  0x7f   : > { %1365 = vmatmul.mubr.bf16.gmra.mxu1 %v3698_v23 }
  0x80   : > { %1374 = vmatprep.mubr.bf16.mxu1 %v3936_v3 }
  0x81   : > { %638 = vperm.xlu1 %3656, %v468_v24  }
  0x82   : > { %635 = vperm.xlu0 %3655, %v467_v25  }
  0x85   : > { %1185 = vmatmul.mubr.bf16.gmra.mxu0 %v3699_v26  ;;  %644 = vperm.xlu1 %3656, %v470_v27  }
  0x86   : > { %641 = vperm.xlu0 %3655, %v469_v28   ;;  %1194 = vmatprep.mubr.bf16.mxu0 %v3936_v3 }
  0x87   : > { %1375 = vmatmul.mubr.bf16.gmra.mxu1 %v3700_v29 }
  0x88   : > { %1384 = vmatprep.mubr.bf16.mxu1 %v3936_v3 }
  0x89   : > { %650 = vperm.xlu1 %3656, %v472_v30  }
  0x8a   : > { %647 = vperm.xlu0 %3655, %v471_v31  }
  0x8d   : > { %1195 = vmatmul.mubr.bf16.gmra.mxu0 %v3701_v32  ;;  %656 = vperm.xlu1 %3656, %v474_v33  }
  0x8e   : > { %653 = vperm.xlu0 %3655, %v473_v34   ;;  %1204 = vmatprep.mubr.bf16.mxu0 %v3936_v3 }
  0x8f   : > { %1385 = vmatmul.mubr.bf16.gmra.mxu1 %v3702_v35 }
  0x90   : > { %1394 = vmatprep.mubr.bf16.mxu1 %v3936_v3 }
  0x91   : > { %662 = vperm.xlu1 %3656, %v476_v36  }
  0x92   : > { %659 = vperm.xlu0 %3655, %v475_v37  }
  0x95   : > { %1205 = vmatmul.mubr.bf16.gmra.mxu0 %v3703_v38  ;;  %668 = vperm.xlu1 %3656, %v478_v39  }
  0x96   : > { %665 = vperm.xlu0 %3655, %v477_v40   ;;  %1214 = vmatprep.mubr.bf16.mxu0 %v3936_v3 }
  0x97   : > { %1395 = vmatmul.mubr.bf16.gmra.mxu1 %v3704_v41 }
  0x98   : > { %1404 = vmatprep.mubr.bf16.mxu1 %v3936_v3  ;;  %v4198_v52 = vpop.permute.xlu1 %491 }
  0x99   : > { %674 = vperm.xlu1 %3656, %v480_v42   ;;  %v4195_v50 = vpop.permute.xlu0 %485  ;;  %7008 = vst [vmem:[#allocation9_spill] sm:$0xff] %v4198_v52 }
  0x9a   : > { %671 = vperm.xlu0 %3655, %v479_v43  }
  0x9c   : > { %v4203_v54 = vpop.permute.xlu1 %494 }
  0x9d   : > { %1215 = vmatmul.mubr.bf16.gmra.mxu0 %v3705_v44  ;;  %v4200_v53 = vpop.permute.xlu0 %488  ;;  %7010 = vst [vmem:[#allocation11_spill] sm:$0xff] %v4203_v54 }
  0x9e   : > { %1224 = vmatprep.mubr.bf16.mxu0 %v3936_v3  ;;  %7009 = vst [vmem:[#allocation10_spill] sm:$0xff] %v4200_v53 }
  0x9f   : > { %1405 = vmatmul.mubr.bf16.gmra.mxu1 %v3706_v45 }
  0xa0   : > { %v4208_v57 = vpop.permute.xlu1 %500 }
  0xa1   : > { %v4206_v56 = vpop.permute.xlu0 %497 }
  0xa2   : > { %7011 = vst [vmem:[#allocation12_spill] sm:$0xff] %v4206_v56 }
  0xa4   : > { %v4212_v59 = vpop.permute.xlu1 %506 }
  0xa5   : > { %1225 = vmatmul.mubr.bf16.gmra.mxu0 %v3707_v46  ;;  %v4210_v58 = vpop.permute.xlu0 %503 }
  0xa6   : > { %1234 = vmatprep.mubr.bf16.mxu0 %v3936_v3 }
  0xa8   : > { %v4216_v61 = vpop.permute.xlu1 %512 }
  0xa9   : > { %v4214_v60 = vpop.permute.xlu0 %509 }
  0xac   : > { %v4220_v63 = vpop.permute.xlu1 %518 }
  0xad   : > { %1235 = vmatmul.mubr.bf16.gmra.mxu0 %v3708_v47  ;;  %v4218_v62 = vpop.permute.xlu0 %515 }
  0xae   : > { %1244 = vmatprep.mubr.bf16.mxu0 %v3936_v3 }
  0xb0   : > { %v4224_v0 = vpop.permute.xlu1 %524 }
  0xb4   : > { %v4228_v2 = vpop.permute.xlu1 %530 }
  0xb5   : > { %1245 = vmatmul.mubr.bf16.gmra.mxu0 %v3709_v48  ;;  %7012 = vst [vmem:[#allocation13_spill] sm:$0xff] %v4228_v2 }
  0xb6   : > { %1254 = vmatprep.mubr.bf16.mxu0 %v3936_v3 }
  0xb8   : > { %v4232_v6 = vpop.permute.xlu1 %536 }
  0xb9   : > { %7014 = vst [vmem:[#allocation15_spill] sm:$0xff] %v4232_v6 }
  0xbc   : > { %v4239_v9 = vpop.permute.xlu1 %542 }
  0xbd   : > { %1255 = vmatmul.mubr.bf16.gmra.mxu0 %v3710_v49  ;;  %7017 = vst [vmem:[#allocation18_spill] sm:$0xff] %v4239_v9 }
  0xbe   : > { %1264 = vmatprep.mubr.bf16.mxu0 %v3936_v3 }
  0xc0   : > { %v4253_v15 = vpop.permute.xlu1 %548 }
  0xc1   : > { %7020 = vst [vmem:[#allocation21_spill] sm:$0xff] %v4253_v15 }
  0xc4   : > { %v4271_v24 = vpop.permute.xlu1 %554 }
  0xc5   : > { %1265 = vmatmul.mubr.bf16.gmra.mxu0 %v3711_v51  ;;  %7026 = vst [vmem:[#allocation27_spill] sm:$0xff] %v4271_v24 }
  0xc6   : > { %1274 = vmatprep.mubr.bf16.mxu0 %v3936_v3  ;;  %v4222_v3 = vpop.permute.xlu0 %521 }
  0xc8   : > { %v4303_v35 = vpop.permute.xlu1 %560 }
  0xc9   : > { %7035 = vst [vmem:[#allocation36_spill] sm:$0xff] %v4303_v35 }
  0xca   : > { %v4226_v1 = vpop.permute.xlu0 %527 }
  0xcc   : > { %v4333_v46 = vpop.permute.xlu1 %566 }
  0xcd   : > { %1275 = vmatmul.mubr.bf16.gmra.mxu0 %v3712_v55  ;;  %7042 = vst [vmem:[#allocation43_spill] sm:$0xff] %v4333_v46 }
  0xce   : > { %v4230_v4 = vpop.permute.xlu0 %533 }
  0xcf   : > { %7013 = vst [vmem:[#allocation14_spill] sm:$0xff] %v4230_v4 }
  0xd2   : > { %v4234_v7 = vpop.permute.xlu0 %539 }
  0xd3   : > { %7015 = vst [vmem:[#allocation16_spill] sm:$0xff] %v4234_v7 }
  0xd6   : > { %v4242_v11 = vpop.permute.xlu0 %545 }
  0xd7   : > { %7018 = vst [vmem:[#allocation19_spill] sm:$0xff] %v4242_v11 }
  0xda   : > { %v4260_v19 = vpop.permute.xlu0 %551 }
  0xdb   : > { %7023 = vst [vmem:[#allocation24_spill] sm:$0xff] %v4260_v19 }
  0xde   : > { %v4288_v29 = vpop.permute.xlu0 %557 }
  0xdf   : > { %7030 = vst [vmem:[#allocation31_spill] sm:$0xff] %v4288_v29 }
  0xe2   : > { %v4318_v41 = vpop.permute.xlu0 %563 }
  0xe3   : > { %7039 = vst [vmem:[#allocation40_spill] sm:$0xff] %v4318_v41 }
  0xe6   : > { %v4350_v55 = vpop.permute.xlu0 %569 }
  0xe7   : > { %7046 = vst [vmem:[#allocation47_spill] sm:$0xff] %v4350_v55 }
  0xfd   : > { %v4251_v14 = vpop.f32.mrf.mxu0 }
  0xfe   : > { %7019 = vst [vmem:[#allocation20_spill] sm:$0xff] %v4251_v14 }
  0xff   : > { %v1098_v16 = vpop.f32.mrf.mxu0  ;;  %v4255_v17 = vpop.f32.mrf.mxu1 }
 0x100   : > { %7021 = vst [vmem:[#allocation22_spill] sm:$0xff] %v4255_v17  ;;  %v4258_v18 = vadd.f32 %v1098_v16, %v4249_v13 }
 0x101   : > { %v4262_v20 = vpop.f32.mrf.mxu0  ;;  %v1288_v21 = vpop.f32.mrf.mxu1 }
 0x102   : > { %7022 = vst [vmem:[#allocation23_spill] sm:$0xff] %v4258_v18  ;;  %7024 = vst [vmem:[#allocation25_spill] sm:$0xff] %v4262_v20  ;;  %1483 = vperm.xlu0 %3655, %v4258_v18   ;;  %v4269_v23 = vadd.f32 %v1288_v21, %v4249_v13 }
 0x103   : > { %1416 = vst.msk [vmem:[%s4017_s22] sm:$0xff] %vm1415_vm1, %v4258_v18  ;;  %v1102_v22 = vpop.f32.mrf.mxu0  ;;  %v4276_v26 = vpop.f32.mrf.mxu1 }
 0x104   : > { %7025 = vst [vmem:[#allocation26_spill] sm:$0xff] %v4269_v23  ;;  %v4274_v25 = vadd.f32 %v1102_v22, %v4249_v13  ;;  %7028 = vst [vmem:[#allocation29_spill] sm:$0xff] %v4276_v26 }
 0x105   : > { %1454 = vst.msk [vmem:[%s4017_s22 + $0x130] sm:$0xff] %vm1415_vm1, %v4269_v23  ;;  %v4281_v27 = vpop.f32.mrf.mxu0  ;;  %v1292_v28 = vpop.f32.mrf.mxu1 }
 0x106   : > { %7027 = vst [vmem:[#allocation28_spill] sm:$0xff] %v4274_v25  ;;  %7029 = vst [vmem:[#allocation30_spill] sm:$0xff] %v4281_v27  ;;  %1488 = vperm.xlu1 %3656, %v4274_v25   ;;  %1673 = vperm.xlu0 %3655, %v4269_v23   ;;  %v4291_v31 = vadd.f32 %v1292_v28, %v4249_v13 }
 0x107   : > { %1417 = vst.msk [vmem:[%s4017_s22 + $0x8] sm:$0xff] %vm1415_vm1, %v4274_v25  ;;  %v1108_v30 = vpop.f32.mrf.mxu0  ;;  %v4296_v33 = vpop.f32.mrf.mxu1 }
 0x108   : > { %7031 = vst [vmem:[#allocation32_spill] sm:$0xff] %v4291_v31  ;;  %v4294_v32 = vadd.f32 %v1108_v30, %v4249_v13  ;;  %7033 = vst [vmem:[#allocation34_spill] sm:$0xff] %v4296_v33  ;;  %v4365_v30 = vpop.permute.xlu1 %572 }
 0x109   : > { %1455 = vst.msk [vmem:[%s4017_s22 + $0x138] sm:$0xff] %vm1415_vm1, %v4291_v31  ;;  %v4301_v34 = vpop.f32.mrf.mxu0  ;;  %v1298_v36 = vpop.f32.mrf.mxu1  ;;  %7051 = vst [vmem:[#allocation52_spill] sm:$0xff] %v4365_v30 }
 0x10a   : > { %7032 = vst [vmem:[#allocation33_spill] sm:$0xff] %v4294_v32  ;;  %7034 = vst [vmem:[#allocation35_spill] sm:$0xff] %v4301_v34  ;;  %1678 = vperm.xlu1 %3656, %v4291_v31   ;;  %1493 = vperm.xlu0 %3655, %v4294_v32   ;;  %v4311_v38 = vadd.f32 %v1298_v36, %v4249_v13 }
 0x10b   : > { %1418 = vst.msk [vmem:[%s4017_s22 + $0x10] sm:$0xff] %vm1415_vm1, %v4294_v32  ;;  %v1112_v37 = vpop.f32.mrf.mxu0  ;;  %v4316_v40 = vpop.f32.mrf.mxu1 }
 0x10c   : > { %7036 = vst [vmem:[#allocation37_spill] sm:$0xff] %v4311_v38  ;;  %v4314_v39 = vadd.f32 %v1112_v37, %v4249_v13  ;;  %7038 = vst [vmem:[#allocation39_spill] sm:$0xff] %v4316_v40  ;;  %v4395_v26 = vpop.permute.xlu1 %578 }
 0x10d   : > { %1456 = vst.msk [vmem:[%s4017_s22 + $0x140] sm:$0xff] %vm1415_vm1, %v4311_v38  ;;  %v4323_v42 = vpop.f32.mrf.mxu0  ;;  %v1302_v43 = vpop.f32.mrf.mxu1  ;;  %7058 = vst [vmem:[#allocation59_spill] sm:$0xff] %v4395_v26 }
 0x10e   : > { %7037 = vst [vmem:[#allocation38_spill] sm:$0xff] %v4314_v39  ;;  %7040 = vst [vmem:[#allocation41_spill] sm:$0xff] %v4323_v42  ;;  %1498 = vperm.xlu1 %3656, %v4314_v39   ;;  %1683 = vperm.xlu0 %3655, %v4311_v38   ;;  %v4331_v45 = vadd.f32 %v1302_v43, %v4249_v13 }
 0x10f   : > { %1419 = vst.msk [vmem:[%s4017_s22 + $0x18] sm:$0xff] %vm1415_vm1, %v4314_v39  ;;  %v1118_v44 = vpop.f32.mrf.mxu0  ;;  %v4338_v48 = vpop.f32.mrf.mxu1 }
 0x110   : > { %7041 = vst [vmem:[#allocation42_spill] sm:$0xff] %v4331_v45  ;;  %v4336_v47 = vadd.f32 %v1118_v44, %v4249_v13  ;;  %7044 = vst [vmem:[#allocation45_spill] sm:$0xff] %v4338_v48  ;;  %v4427_v14 = vpop.permute.xlu1 %584 }
 0x111   : > { %1457 = vst.msk [vmem:[%s4017_s22 + $0x148] sm:$0xff] %vm1415_vm1, %v4331_v45  ;;  %v4343_v49 = vpop.f32.mrf.mxu0  ;;  %v1308_v51 = vpop.f32.mrf.mxu1  ;;  %7067 = vst [vmem:[#allocation68_spill] sm:$0xff] %v4427_v14 }
 0x112   : > { %7043 = vst [vmem:[#allocation44_spill] sm:$0xff] %v4336_v47  ;;  %7045 = vst [vmem:[#allocation46_spill] sm:$0xff] %v4343_v49  ;;  %1688 = vperm.xlu1 %3656, %v4331_v45   ;;  %1503 = vperm.xlu0 %3655, %v4336_v47   ;;  %v4353_v16 = vadd.f32 %v1308_v51, %v4249_v13 }
 0x113   : > { %1420 = vst.msk [vmem:[%s4017_s22 + $0x20] sm:$0xff] %vm1415_vm1, %v4336_v47  ;;  %v1122_v12 = vpop.f32.mrf.mxu0  ;;  %v4358_v22 = vpop.f32.mrf.mxu1 }
 0x114   : > { %7047 = vst [vmem:[#allocation48_spill] sm:$0xff] %v4353_v16  ;;  %v4356_v21 = vadd.f32 %v1122_v12, %v4249_v13  ;;  %7049 = vst [vmem:[#allocation50_spill] sm:$0xff] %v4358_v22  ;;  %v4380_v12 = vpop.permute.xlu0 %575 }
 0x115   : > { %1458 = vst.msk [vmem:[%s4017_s22 + $0x150] sm:$0xff] %vm1415_vm1, %v4353_v16  ;;  %v4363_v28 = vpop.f32.mrf.mxu0  ;;  %v1312_v36 = vpop.f32.mrf.mxu1  ;;  %7055 = vst [vmem:[#allocation56_spill] sm:$0xff] %v4380_v12 }
 0x116   : > { %7048 = vst [vmem:[#allocation49_spill] sm:$0xff] %v4356_v21  ;;  %7050 = vst [vmem:[#allocation51_spill] sm:$0xff] %v4363_v28  ;;  %1508 = vperm.xlu1 %3656, %v4356_v21   ;;  %1693 = vperm.xlu0 %3655, %v4353_v16   ;;  %v4373_v43 = vadd.f32 %v1312_v36, %v4249_v13 }
 0x117   : > { %1421 = vst.msk [vmem:[%s4017_s22 + $0x28] sm:$0xff] %vm1415_vm1, %v4356_v21  ;;  %v1128_v37 = vpop.f32.mrf.mxu0  ;;  %v4378_v51 = vpop.f32.mrf.mxu1 }
 0x118   : > { %7052 = vst [vmem:[#allocation53_spill] sm:$0xff] %v4373_v43  ;;  %v4376_v44 = vadd.f32 %v1128_v37, %v4249_v13  ;;  %7054 = vst [vmem:[#allocation55_spill] sm:$0xff] %v4378_v51  ;;  %v4412_v22 = vpop.permute.xlu0 %581 }
 0x119   : > { %1459 = vst.msk [vmem:[%s4017_s22 + $0x158] sm:$0xff] %vm1415_vm1, %v4373_v43  ;;  %v4385_v10 = vpop.f32.mrf.mxu0  ;;  %v1318_v36 = vpop.f32.mrf.mxu1  ;;  %7062 = vst [vmem:[#allocation63_spill] sm:$0xff] %v4412_v22 }
 0x11a   : > { %7053 = vst [vmem:[#allocation54_spill] sm:$0xff] %v4376_v44  ;;  %7056 = vst [vmem:[#allocation57_spill] sm:$0xff] %v4385_v10  ;;  %1698 = vperm.xlu1 %3656, %v4373_v43   ;;  %1513 = vperm.xlu0 %3655, %v4376_v44   ;;  %v4393_v5 = vadd.f32 %v1318_v36, %v4249_v13 }
 0x11b   : > { %1422 = vst.msk [vmem:[%s4017_s22 + $0x30] sm:$0xff] %vm1415_vm1, %v4376_v44  ;;  %v1132_v37 = vpop.f32.mrf.mxu0  ;;  %v4400_v40 = vpop.f32.mrf.mxu1 }
 0x11c   : > { %7057 = vst [vmem:[#allocation58_spill] sm:$0xff] %v4393_v5  ;;  %v4398_v17 = vadd.f32 %v1132_v37, %v4249_v13  ;;  %7060 = vst [vmem:[#allocation61_spill] sm:$0xff] %v4400_v40  ;;  %v4442_v49 = vpop.permute.xlu0 %587 }
 0x11d   : > { %1460 = vst.msk [vmem:[%s4017_s22 + $0x160] sm:$0xff] %vm1415_vm1, %v4393_v5  ;;  %v4405_v33 = vpop.f32.mrf.mxu0  ;;  %v1322_v36 = vpop.f32.mrf.mxu1  ;;  %7071 = vst [vmem:[#allocation72_spill] sm:$0xff] %v4442_v49 }
 0x11e   : > { %7059 = vst [vmem:[#allocation60_spill] sm:$0xff] %v4398_v17  ;;  %7061 = vst [vmem:[#allocation62_spill] sm:$0xff] %v4405_v33  ;;  %1518 = vperm.xlu1 %3656, %v4398_v17   ;;  %1703 = vperm.xlu0 %3655, %v4393_v5   ;;  %v4415_v48 = vadd.f32 %v1322_v36, %v4249_v13 }
 0x11f   : > { %1423 = vst.msk [vmem:[%s4017_s22 + $0x38] sm:$0xff] %vm1415_vm1, %v4398_v17  ;;  %v1138_v37 = vpop.f32.mrf.mxu0  ;;  %v4420_v51 = vpop.f32.mrf.mxu1 }
 0x120   : > { %7063 = vst [vmem:[#allocation64_spill] sm:$0xff] %v4415_v48  ;;  %v4418_v40 = vadd.f32 %v1138_v37, %v4249_v13  ;;  %7065 = vst [vmem:[#allocation66_spill] sm:$0xff] %v4420_v51 }
 0x121   : > { %1461 = vst.msk [vmem:[%s4017_s22 + $0x168] sm:$0xff] %vm1415_vm1, %v4415_v48  ;;  %v4425_v20 = vpop.f32.mrf.mxu0  ;;  %v1328_v36 = vpop.f32.mrf.mxu1 }
 0x122   : > { %7064 = vst [vmem:[#allocation65_spill] sm:$0xff] %v4418_v40  ;;  %7066 = vst [vmem:[#allocation67_spill] sm:$0xff] %v4425_v20  ;;  %1708 = vperm.xlu1 %3656, %v4415_v48   ;;  %1523 = vperm.xlu0 %3655, %v4418_v40   ;;  %v4435_v34 = vadd.f32 %v1328_v36, %v4249_v13 }
 0x123   : > { %1424 = vst.msk [vmem:[%s4017_s22 + $0x40] sm:$0xff] %vm1415_vm1, %v4418_v40  ;;  %v1142_v37 = vpop.f32.mrf.mxu0  ;;  %v4440_v27 = vpop.f32.mrf.mxu1 }
 0x124   : > { %7068 = vst [vmem:[#allocation69_spill] sm:$0xff] %v4435_v34  ;;  %v4438_v51 = vadd.f32 %v1142_v37, %v4249_v13  ;;  %7070 = vst [vmem:[#allocation71_spill] sm:$0xff] %v4440_v27  ;;  %v4457_v27 = vpop.permute.xlu1 %590 }
 0x125   : > { %1462 = vst.msk [vmem:[%s4017_s22 + $0x170] sm:$0xff] %vm1415_vm1, %v4435_v34  ;;  %v4447_v42 = vpop.f32.mrf.mxu0  ;;  %v1332_v36 = vpop.f32.mrf.mxu1  ;;  %7074 = vst [vmem:[#allocation75_spill] sm:$0xff] %v4457_v27 }
 0x126   : > { %7069 = vst [vmem:[#allocation70_spill] sm:$0xff] %v4438_v51  ;;  %7072 = vst [vmem:[#allocation73_spill] sm:$0xff] %v4447_v42  ;;  %1528 = vperm.xlu1 %3656, %v4438_v51   ;;  %1713 = vperm.xlu0 %3655, %v4435_v34   ;;  %v4455_v10 = vadd.f32 %v1332_v36, %v4249_v13  ;;  %v4474_v42 = vpop.permute.xlu0 %593 }
 0x127   : > { %1425 = vst.msk [vmem:[%s4017_s22 + $0x48] sm:$0xff] %vm1415_vm1, %v4438_v51  ;;  %v1148_v37 = vpop.f32.mrf.mxu0  ;;  %v4462_v20 = vpop.f32.mrf.mxu1  ;;  %7078 = vst [vmem:[#allocation79_spill] sm:$0xff] %v4474_v42 }
 0x128   : > { %7073 = vst [vmem:[#allocation74_spill] sm:$0xff] %v4455_v10  ;;  %v4460_v28 = vadd.f32 %v1148_v37, %v4249_v13  ;;  %7076 = vst [vmem:[#allocation77_spill] sm:$0xff] %v4462_v20  ;;  %v4489_v45 = vpop.permute.xlu1 %596 }
 0x129   : > { %1463 = vst.msk [vmem:[%s4017_s22 + $0x178] sm:$0xff] %vm1415_vm1, %v4455_v10  ;;  %v4467_v33 = vpop.f32.mrf.mxu0  ;;  %v1338_v36 = vpop.f32.mrf.mxu1  ;;  %7083 = vst [vmem:[#allocation84_spill] sm:$0xff] %v4489_v45 }
 0x12a   : > { %7075 = vst [vmem:[#allocation76_spill] sm:$0xff] %v4460_v28  ;;  %7077 = vst [vmem:[#allocation78_spill] sm:$0xff] %v4467_v33  ;;  %1718 = vperm.xlu1 %3656, %v4455_v10   ;;  %1533 = vperm.xlu0 %3655, %v4460_v28   ;;  %v4477_v31 = vadd.f32 %v1338_v36, %v4249_v13  ;;  %v4504_v43 = vpop.permute.xlu0 %599 }
 0x12b   : > { %1426 = vst.msk [vmem:[%s4017_s22 + $0x50] sm:$0xff] %vm1415_vm1, %v4460_v28  ;;  %v1152_v37 = vpop.f32.mrf.mxu0  ;;  %v4482_v33 = vpop.f32.mrf.mxu1  ;;  %7087 = vst [vmem:[#allocation88_spill] sm:$0xff] %v4504_v43 }
 0x12c   : > { %7079 = vst [vmem:[#allocation80_spill] sm:$0xff] %v4477_v31  ;;  %v4480_v20 = vadd.f32 %v1152_v37, %v4249_v13  ;;  %7081 = vst [vmem:[#allocation82_spill] sm:$0xff] %v4482_v33 }
 0x12d   : > { %1464 = vst.msk [vmem:[%s4017_s22 + $0x180] sm:$0xff] %vm1415_vm1, %v4477_v31  ;;  %v4487_v23 = vpop.f32.mrf.mxu0  ;;  %v1342_v36 = vpop.f32.mrf.mxu1 }
 0x12e   : > { %7080 = vst [vmem:[#allocation81_spill] sm:$0xff] %v4480_v20  ;;  %7082 = vst [vmem:[#allocation83_spill] sm:$0xff] %v4487_v23  ;;  %1538 = vperm.xlu1 %3656, %v4480_v20   ;;  %1723 = vperm.xlu0 %3655, %v4477_v31   ;;  %v4497_v38 = vadd.f32 %v1342_v36, %v4249_v13  ;;  %v4536_v5 = vpop.permute.xlu0 %605 }
 0x12f   : > { %1427 = vst.msk [vmem:[%s4017_s22 + $0x58] sm:$0xff] %vm1415_vm1, %v4480_v20  ;;  %v1158_v37 = vpop.f32.mrf.mxu0  ;;  %v4502_v23 = vpop.f32.mrf.mxu1  ;;  %7094 = vst [vmem:[#allocation95_spill] sm:$0xff] %v4536_v5 }
 0x130   : > { %7084 = vst [vmem:[#allocation85_spill] sm:$0xff] %v4497_v38  ;;  %v4500_v33 = vadd.f32 %v1158_v37, %v4249_v13  ;;  %7086 = vst [vmem:[#allocation87_spill] sm:$0xff] %v4502_v23  ;;  %v4519_v23 = vpop.permute.xlu1 %602 }
 0x131   : > { %1465 = vst.msk [vmem:[%s4017_s22 + $0x188] sm:$0xff] %vm1415_vm1, %v4497_v38  ;;  %v4509_v16 = vpop.f32.mrf.mxu0  ;;  %v1348_v36 = vpop.f32.mrf.mxu1  ;;  %7090 = vst [vmem:[#allocation91_spill] sm:$0xff] %v4519_v23 }
 0x132   : > { %7085 = vst [vmem:[#allocation86_spill] sm:$0xff] %v4500_v33  ;;  %7088 = vst [vmem:[#allocation89_spill] sm:$0xff] %v4509_v16  ;;  %1728 = vperm.xlu1 %3656, %v4497_v38   ;;  %1543 = vperm.xlu0 %3655, %v4500_v33   ;;  %v4517_v31 = vadd.f32 %v1348_v36, %v4249_v13  ;;  %v4566_v32 = vpop.permute.xlu0 %611 }
 0x133   : > { %1428 = vst.msk [vmem:[%s4017_s22 + $0x60] sm:$0xff] %vm1415_vm1, %v4500_v33  ;;  %v1162_v37 = vpop.f32.mrf.mxu0  ;;  %v4524_v16 = vpop.f32.mrf.mxu1  ;;  %7103 = vst [vmem:[#allocation104_spill] sm:$0xff] %v4566_v32 }
 0x134   : > { %7089 = vst [vmem:[#allocation90_spill] sm:$0xff] %v4517_v31  ;;  %v4522_v48 = vadd.f32 %v1162_v37, %v4249_v13  ;;  %7092 = vst [vmem:[#allocation93_spill] sm:$0xff] %v4524_v16 }
 0x135   : > { %1466 = vst.msk [vmem:[%s4017_s22 + $0x190] sm:$0xff] %vm1415_vm1, %v4517_v31  ;;  %v4529_v38 = vpop.f32.mrf.mxu0  ;;  %v1352_v36 = vpop.f32.mrf.mxu1 }
 0x136   : > { %7091 = vst [vmem:[#allocation92_spill] sm:$0xff] %v4522_v48  ;;  %7093 = vst [vmem:[#allocation94_spill] sm:$0xff] %v4529_v38  ;;  %1548 = vperm.xlu1 %3656, %v4522_v48   ;;  %1733 = vperm.xlu0 %3655, %v4517_v31   ;;  %v4539_v10 = vadd.f32 %v1352_v36, %v4249_v13  ;;  %v4551_v31 = vpop.permute.xlu1 %608 }
 0x137   : > { %1429 = vst.msk [vmem:[%s4017_s22 + $0x68] sm:$0xff] %vm1415_vm1, %v4522_v48  ;;  %v1168_v37 = vpop.f32.mrf.mxu0  ;;  %v4544_v38 = vpop.f32.mrf.mxu1  ;;  %7099 = vst [vmem:[#allocation100_spill] sm:$0xff] %v4551_v31 }
 0x138   : > { %7095 = vst [vmem:[#allocation96_spill] sm:$0xff] %v4539_v10  ;;  %v4542_v16 = vadd.f32 %v1168_v37, %v4249_v13  ;;  %7097 = vst [vmem:[#allocation98_spill] sm:$0xff] %v4544_v38 }
 0x139   : > { %1467 = vst.msk [vmem:[%s4017_s22 + $0x198] sm:$0xff] %vm1415_vm1, %v4539_v10  ;;  %v4549_v34 = vpop.f32.mrf.mxu0  ;;  %v1358_v36 = vpop.f32.mrf.mxu1 }
 0x13a   : > { %7096 = vst [vmem:[#allocation97_spill] sm:$0xff] %v4542_v16  ;;  %7098 = vst [vmem:[#allocation99_spill] sm:$0xff] %v4549_v34  ;;  %1738 = vperm.xlu1 %3656, %v4539_v10   ;;  %1553 = vperm.xlu0 %3655, %v4542_v16   ;;  %v4559_v25 = vadd.f32 %v1358_v36, %v4249_v13 }
 0x13b   : > { %1430 = vst.msk [vmem:[%s4017_s22 + $0x70] sm:$0xff] %vm1415_vm1, %v4542_v16  ;;  %v1172_v37 = vpop.f32.mrf.mxu0  ;;  %v4564_v34 = vpop.f32.mrf.mxu1 }
 0x13c   : > { %7100 = vst [vmem:[#allocation101_spill] sm:$0xff] %v4559_v25  ;;  %v4562_v38 = vadd.f32 %v1172_v37, %v4249_v13  ;;  %7102 = vst [vmem:[#allocation103_spill] sm:$0xff] %v4564_v34  ;;  %v4581_v34 = vpop.permute.xlu1 %614 }
 0x13d   : > { %1468 = vst.msk [vmem:[%s4017_s22 + $0x1a0] sm:$0xff] %vm1415_vm1, %v4559_v25  ;;  %v4571_v10 = vpop.f32.mrf.mxu0  ;;  %v1362_v36 = vpop.f32.mrf.mxu1  ;;  %7106 = vst [vmem:[#allocation107_spill] sm:$0xff] %v4581_v34 }
 0x13e   : > { %7101 = vst [vmem:[#allocation102_spill] sm:$0xff] %v4562_v38  ;;  %7104 = vst [vmem:[#allocation105_spill] sm:$0xff] %v4571_v10  ;;  %1558 = vperm.xlu1 %3656, %v4562_v38   ;;  %1743 = vperm.xlu0 %3655, %v4559_v25   ;;  %v4579_v18 = vadd.f32 %v1362_v36, %v4249_v13  ;;  %v4598_v25 = vpop.permute.xlu0 %617 }
 0x13f   : > { %1431 = vst.msk [vmem:[%s4017_s22 + $0x78] sm:$0xff] %vm1415_vm1, %v4562_v38  ;;  %v1178_v37 = vpop.f32.mrf.mxu0  ;;  %v4586_v10 = vpop.f32.mrf.mxu1  ;;  %7110 = vst [vmem:[#allocation111_spill] sm:$0xff] %v4598_v25 }
 0x140   : > { %7105 = vst [vmem:[#allocation106_spill] sm:$0xff] %v4579_v18  ;;  %v4584_v39 = vadd.f32 %v1178_v37, %v4249_v13  ;;  %7108 = vst [vmem:[#allocation109_spill] sm:$0xff] %v4586_v10 }
 0x141   : > { %1469 = vst.msk [vmem:[%s4017_s22 + $0x1a8] sm:$0xff] %vm1415_vm1, %v4579_v18  ;;  %v4591_v47 = vpop.f32.mrf.mxu0  ;;  %v1368_v36 = vpop.f32.mrf.mxu1 }
 0x142   : > { %7107 = vst [vmem:[#allocation108_spill] sm:$0xff] %v4584_v39  ;;  %7109 = vst [vmem:[#allocation110_spill] sm:$0xff] %v4591_v47  ;;  %1748 = vperm.xlu1 %3656, %v4579_v18   ;;  %1563 = vperm.xlu0 %3655, %v4584_v39   ;;  %v4601_v21 = vadd.f32 %v1368_v36, %v4249_v13  ;;  %v4628_v17 = vpop.permute.xlu0 %623 }
 0x143   : > { %1432 = vst.msk [vmem:[%s4017_s22 + $0x80] sm:$0xff] %vm1415_vm1, %v4584_v39  ;;  %v1182_v37 = vpop.f32.mrf.mxu0  ;;  %v4606_v47 = vpop.f32.mrf.mxu1  ;;  %7119 = vst [vmem:[#allocation120_spill] sm:$0xff] %v4628_v17 }
 0x144   : > { %7111 = vst [vmem:[#allocation112_spill] sm:$0xff] %v4601_v21  ;;  %v4604_v10 = vadd.f32 %v1182_v37, %v4249_v13  ;;  %7113 = vst [vmem:[#allocation114_spill] sm:$0xff] %v4606_v47  ;;  %v4613_v39 = vpop.permute.xlu1 %620 }
 0x145   : > { %1470 = vst.msk [vmem:[%s4017_s22 + $0x1b0] sm:$0xff] %vm1415_vm1, %v4601_v21  ;;  %v4611_v18 = vpop.f32.mrf.mxu0  ;;  %7115 = vst [vmem:[#allocation116_spill] sm:$0xff] %v4613_v39  ;;  %v1372_v36 = vpop.f32.mrf.mxu1 }
 0x146   : > { %7112 = vst [vmem:[#allocation113_spill] sm:$0xff] %v4604_v10  ;;  %7114 = vst [vmem:[#allocation115_spill] sm:$0xff] %v4611_v18  ;;  %1568 = vperm.xlu1 %3656, %v4604_v10   ;;  %1753 = vperm.xlu0 %3655, %v4601_v21   ;;  %v4621_v44 = vadd.f32 %v1372_v36, %v4249_v13 }
 0x147   : > { %1433 = vst.msk [vmem:[%s4017_s22 + $0x88] sm:$0xff] %vm1415_vm1, %v4604_v10  ;;  %v1188_v37 = vpop.f32.mrf.mxu0  ;;  %v4626_v18 = vpop.f32.mrf.mxu1 }
 0x148   : > { %7116 = vst [vmem:[#allocation117_spill] sm:$0xff] %v4621_v44  ;;  %v4624_v47 = vadd.f32 %v1188_v37, %v4249_v13  ;;  %7118 = vst [vmem:[#allocation119_spill] sm:$0xff] %v4626_v18  ;;  %v4643_v18 = vpop.permute.xlu1 %626 }
 0x149   : > { %1471 = vst.msk [vmem:[%s4017_s22 + $0x1b8] sm:$0xff] %vm1415_vm1, %v4621_v44  ;;  %v4633_v10 = vpop.f32.mrf.mxu0  ;;  %v1378_v36 = vpop.f32.mrf.mxu1  ;;  %7122 = vst [vmem:[#allocation123_spill] sm:$0xff] %v4643_v18 }
 0x14a   : > { %7117 = vst [vmem:[#allocation118_spill] sm:$0xff] %v4624_v47  ;;  %7120 = vst [vmem:[#allocation121_spill] sm:$0xff] %v4633_v10  ;;  %1758 = vperm.xlu1 %3656, %v4621_v44   ;;  %1573 = vperm.xlu0 %3655, %v4624_v47   ;;  %v4641_v21 = vadd.f32 %v1378_v36, %v4249_v13 }
 0x14b   : > { %1434 = vst.msk [vmem:[%s4017_s22 + $0x90] sm:$0xff] %vm1415_vm1, %v4624_v47  ;;  %v1192_v37 = vpop.f32.mrf.mxu0  ;;  %v4648_v10 = vpop.f32.mrf.mxu1 }
 0x14c   : > { %7121 = vst [vmem:[#allocation122_spill] sm:$0xff] %v4641_v21  ;;  %v4646_v40 = vadd.f32 %v1192_v37, %v4249_v13  ;;  %7124 = vst [vmem:[#allocation125_spill] sm:$0xff] %v4648_v10  ;;  %v4660_v47 = vpop.permute.xlu0 %629 }
 0x14d   : > { %1472 = vst.msk [vmem:[%s4017_s22 + $0x1c0] sm:$0xff] %vm1415_vm1, %v4641_v21  ;;  %v4653_v44 = vpop.f32.mrf.mxu0  ;;  %v1382_v36 = vpop.f32.mrf.mxu1  ;;  %7126 = vst [vmem:[#allocation127_spill] sm:$0xff] %v4660_v47 }
 0x14e   : > { %7123 = vst [vmem:[#allocation124_spill] sm:$0xff] %v4646_v40  ;;  %7125 = vst [vmem:[#allocation126_spill] sm:$0xff] %v4653_v44  ;;  %1578 = vperm.xlu1 %3656, %v4646_v40   ;;  %1763 = vperm.xlu0 %3655, %v4641_v21   ;;  %v4663_v51 = vadd.f32 %v1382_v36, %v4249_v13  ;;  %v4675_v21 = vpop.permute.xlu1 %632 }
 0x14f   : > { %1435 = vst.msk [vmem:[%s4017_s22 + $0x98] sm:$0xff] %vm1415_vm1, %v4646_v40  ;;  %v1198_v37 = vpop.f32.mrf.mxu0  ;;  %v4668_v44 = vpop.f32.mrf.mxu1  ;;  %7131 = vst [vmem:[#allocation132_spill] sm:$0xff] %v4675_v21 }
 0x150   : > { %7127 = vst [vmem:[#allocation128_spill] sm:$0xff] %v4663_v51  ;;  %v4666_v10 = vadd.f32 %v1198_v37, %v4249_v13  ;;  %7129 = vst [vmem:[#allocation130_spill] sm:$0xff] %v4668_v44  ;;  %v4690_v20 = vpop.permute.xlu0 %635 }
 0x151   : > { %1473 = vst.msk [vmem:[%s4017_s22 + $0x1c8] sm:$0xff] %vm1415_vm1, %v4663_v51  ;;  %v4673_v40 = vpop.f32.mrf.mxu0  ;;  %v1388_v36 = vpop.f32.mrf.mxu1  ;;  %7135 = vst [vmem:[#allocation136_spill] sm:$0xff] %v4690_v20 }
 0x152   : > { %7128 = vst [vmem:[#allocation129_spill] sm:$0xff] %v4666_v10  ;;  %7130 = vst [vmem:[#allocation131_spill] sm:$0xff] %v4673_v40  ;;  %1768 = vperm.xlu1 %3656, %v4663_v51   ;;  %1583 = vperm.xlu0 %3655, %v4666_v10   ;;  %v4683_v28 = vadd.f32 %v1388_v36, %v4249_v13 }
 0x153   : > { %1436 = vst.msk [vmem:[%s4017_s22 + $0xa0] sm:$0xff] %vm1415_vm1, %v4666_v10  ;;  %v1202_v37 = vpop.f32.mrf.mxu0  ;;  %v4688_v40 = vpop.f32.mrf.mxu1 }
 0x154   : > { %7132 = vst [vmem:[#allocation133_spill] sm:$0xff] %v4683_v28  ;;  %v4686_v44 = vadd.f32 %v1202_v37, %v4249_v13  ;;  %7134 = vst [vmem:[#allocation135_spill] sm:$0xff] %v4688_v40  ;;  %v4705_v40 = vpop.permute.xlu1 %638 }
 0x155   : > { %1474 = vst.msk [vmem:[%s4017_s22 + $0x1d0] sm:$0xff] %vm1415_vm1, %v4683_v28  ;;  %v4695_v51 = vpop.f32.mrf.mxu0  ;;  %v1392_v36 = vpop.f32.mrf.mxu1  ;;  %7138 = vst [vmem:[#allocation139_spill] sm:$0xff] %v4705_v40 }
 0x156   : > { %7133 = vst [vmem:[#allocation134_spill] sm:$0xff] %v4686_v44  ;;  %7136 = vst [vmem:[#allocation137_spill] sm:$0xff] %v4695_v51  ;;  %1588 = vperm.xlu1 %3656, %v4686_v44   ;;  %1773 = vperm.xlu0 %3655, %v4683_v28   ;;  %v4703_v10 = vadd.f32 %v1392_v36, %v4249_v13  ;;  %v4722_v28 = vpop.permute.xlu0 %641 }
 0x157   : > { %1437 = vst.msk [vmem:[%s4017_s22 + $0xa8] sm:$0xff] %vm1415_vm1, %v4686_v44  ;;  %v1208_v37 = vpop.f32.mrf.mxu0  ;;  %v4710_v51 = vpop.f32.mrf.mxu1  ;;  %7142 = vst [vmem:[#allocation143_spill] sm:$0xff] %v4722_v28 }
 0x158   : > { %7137 = vst [vmem:[#allocation138_spill] sm:$0xff] %v4703_v10  ;;  %v4708_v33 = vadd.f32 %v1208_v37, %v4249_v13  ;;  %7140 = vst [vmem:[#allocation141_spill] sm:$0xff] %v4710_v51 }
 0x159   : > { %1475 = vst.msk [vmem:[%s4017_s22 + $0x1d8] sm:$0xff] %vm1415_vm1, %v4703_v10  ;;  %v4715_v44 = vpop.f32.mrf.mxu0  ;;  %v1398_v36 = vpop.f32.mrf.mxu1 }
 0x15a   : > { %7139 = vst [vmem:[#allocation140_spill] sm:$0xff] %v4708_v33  ;;  %7141 = vst [vmem:[#allocation142_spill] sm:$0xff] %v4715_v44  ;;  %1778 = vperm.xlu1 %3656, %v4703_v10   ;;  %1593 = vperm.xlu0 %3655, %v4708_v33   ;;  %v4725_v48 = vadd.f32 %v1398_v36, %v4249_v13  ;;  %v4752_v38 = vpop.permute.xlu0 %647 }
 0x15b   : > { %1438 = vst.msk [vmem:[%s4017_s22 + $0xb0] sm:$0xff] %vm1415_vm1, %v4708_v33  ;;  %v1212_v37 = vpop.f32.mrf.mxu0  ;;  %v4730_v44 = vpop.f32.mrf.mxu1  ;;  %7151 = vst [vmem:[#allocation152_spill] sm:$0xff] %v4752_v38 }
 0x15c   : > { %7143 = vst [vmem:[#allocation144_spill] sm:$0xff] %v4725_v48  ;;  %v4728_v51 = vadd.f32 %v1212_v37, %v4249_v13  ;;  %7145 = vst [vmem:[#allocation146_spill] sm:$0xff] %v4730_v44  ;;  %v4737_v33 = vpop.permute.xlu1 %644 }
 0x15d   : > { %1476 = vst.msk [vmem:[%s4017_s22 + $0x1e0] sm:$0xff] %vm1415_vm1, %v4725_v48  ;;  %v4735_v10 = vpop.f32.mrf.mxu0  ;;  %7147 = vst [vmem:[#allocation148_spill] sm:$0xff] %v4737_v33  ;;  %v1402_v36 = vpop.f32.mrf.mxu1 }
 0x15e   : > { %7144 = vst [vmem:[#allocation145_spill] sm:$0xff] %v4728_v51  ;;  %7146 = vst [vmem:[#allocation147_spill] sm:$0xff] %v4735_v10  ;;  %1598 = vperm.xlu1 %3656, %v4728_v51   ;;  %1783 = vperm.xlu0 %3655, %v4725_v48   ;;  %v4745_v16 = vadd.f32 %v1402_v36, %v4249_v13 }
 0x15f   : > { %1439 = vst.msk [vmem:[%s4017_s22 + $0xb8] sm:$0xff] %vm1415_vm1, %v4728_v51  ;;  %v1218_v37 = vpop.f32.mrf.mxu0  ;;  %v4750_v10 = vpop.f32.mrf.mxu1 }
 0x160   : > { %7148 = vst [vmem:[#allocation149_spill] sm:$0xff] %v4745_v16  ;;  %v4748_v44 = vadd.f32 %v1218_v37, %v4249_v13  ;;  %7150 = vst [vmem:[#allocation151_spill] sm:$0xff] %v4750_v10  ;;  %v4767_v10 = vpop.permute.xlu1 %650 }
 0x161   : > { %1477 = vst.msk [vmem:[%s4017_s22 + $0x1e8] sm:$0xff] %vm1415_vm1, %v4745_v16  ;;  %v4757_v51 = vpop.f32.mrf.mxu0  ;;  %v1408_v36 = vpop.f32.mrf.mxu1  ;;  %7154 = vst [vmem:[#allocation155_spill] sm:$0xff] %v4767_v10 }
 0x162   : > { %7149 = vst [vmem:[#allocation150_spill] sm:$0xff] %v4748_v44  ;;  %7152 = vst [vmem:[#allocation153_spill] sm:$0xff] %v4757_v51  ;;  %1788 = vperm.xlu1 %3656, %v4745_v16   ;;  %1603 = vperm.xlu0 %3655, %v4748_v44   ;;  %v4765_v48 = vadd.f32 %v1408_v36, %v4249_v13 }
 0x163   : > { %1440 = vst.msk [vmem:[%s4017_s22 + $0xc0] sm:$0xff] %vm1415_vm1, %v4748_v44  ;;  %v1222_v37 = vpop.f32.mrf.mxu0  ;;  %v4772_v51 = vpop.f32.mrf.mxu1 }
 0x164   : > { %7153 = vst [vmem:[#allocation154_spill] sm:$0xff] %v4765_v48  ;;  %v4770_v8 = vadd.f32 %v1222_v37, %v4249_v13  ;;  %7156 = vst [vmem:[#allocation157_spill] sm:$0xff] %v4772_v51  ;;  %v4784_v44 = vpop.permute.xlu0 %653 }
 0x165   : > { %1478 = vst.msk [vmem:[%s4017_s22 + $0x1f0] sm:$0xff] %vm1415_vm1, %v4765_v48  ;;  %v4777_v16 = vpop.f32.mrf.mxu0  ;;  %v1412_v36 = vpop.f32.mrf.mxu1  ;;  %7158 = vst [vmem:[#allocation159_spill] sm:$0xff] %v4784_v44 }
 0x166   : > { %7155 = vst [vmem:[#allocation156_spill] sm:$0xff] %v4770_v8  ;;  %7157 = vst [vmem:[#allocation158_spill] sm:$0xff] %v4777_v16  ;;  %1608 = vperm.xlu1 %3656, %v4770_v8   ;;  %1793 = vperm.xlu0 %3655, %v4765_v48   ;;  %v4787_v45 = vadd.f32 %v1412_v36, %v4249_v13 }
 0x167   : > { %1441 = vst.msk [vmem:[%s4017_s22 + $0xc8] sm:$0xff] %vm1415_vm1, %v4770_v8  ;;  %v1228_v37 = vpop.f32.mrf.mxu0  ;;  %v4797_v8 = vpop.permute.xlu1 %656 }
 0x168   : > { %7159 = vst [vmem:[#allocation160_spill] sm:$0xff] %v4787_v45  ;;  %v4790_v51 = vadd.f32 %v1228_v37, %v4249_v13  ;;  %1479 = vst.msk [vmem:[%s4017_s22 + $0x1f8] sm:$0xff] %vm1415_vm1, %v4787_v45  ;;  %v4807_v37 = vpop.permute.xlu0 %659 }
 0x169   : > { %v4795_v16 = vpop.f32.mrf.mxu0  ;;  %7162 = vst [vmem:[#allocation163_spill] sm:$0xff] %v4797_v8  ;;  %7164 = vst [vmem:[#allocation165_spill] sm:$0xff] %v4807_v37 }
 0x16a   : > { %7160 = vst [vmem:[#allocation161_spill] sm:$0xff] %v4790_v51  ;;  %7161 = vst [vmem:[#allocation162_spill] sm:$0xff] %v4795_v16  ;;  %1798 = vperm.xlu1 %3656, %v4787_v45   ;;  %1613 = vperm.xlu0 %3655, %v4790_v51  }
 0x16b   : > { %1442 = vst.msk [vmem:[%s4017_s22 + $0xd0] sm:$0xff] %vm1415_vm1, %v4790_v51  ;;  %v1232_v36 = vpop.f32.mrf.mxu0  ;;  %v4815_v14 = vpop.permute.xlu1 %662 }
 0x16c   : > { %v4805_v48 = vadd.f32 %v1232_v36, %v4249_v13  ;;  %7166 = vst [vmem:[#allocation167_spill] sm:$0xff] %v4815_v14  ;;  %v4826_v36 = vpop.permute.xlu0 %665 }
 0x16d   : > { %v4809_v42 = vpop.f32.mrf.mxu0  ;;  %7169 = vst [vmem:[#allocation170_spill] sm:$0xff] %v4826_v36 }
 0x16e   : > { %7163 = vst [vmem:[#allocation164_spill] sm:$0xff] %v4805_v48  ;;  %7165 = vst [vmem:[#allocation166_spill] sm:$0xff] %v4809_v42  ;;  %1618 = vperm.xlu1 %3656, %v4805_v48  }
 0x16f   : > { %1443 = vst.msk [vmem:[%s4017_s22 + $0xd8] sm:$0xff] %vm1415_vm1, %v4805_v48  ;;  %v1238_v16 = vpop.f32.mrf.mxu0  ;;  %v4833_v30 = vpop.permute.xlu1 %668 }
 0x170   : > { %v4818_v45 = vadd.f32 %v1238_v16, %v4249_v13  ;;  %7172 = vst [vmem:[#allocation173_spill] sm:$0xff] %v4833_v30 }
 0x171   : > { %v4820_v51 = vpop.f32.mrf.mxu0 }
 0x172   : > { %7167 = vst [vmem:[#allocation168_spill] sm:$0xff] %v4818_v45  ;;  %7168 = vst [vmem:[#allocation169_spill] sm:$0xff] %v4820_v51  ;;  %1623 = vperm.xlu0 %3655, %v4818_v45  }
 0x173   : > { %1444 = vst.msk [vmem:[%s4017_s22 + $0xe0] sm:$0xff] %vm1415_vm1, %v4818_v45  ;;  %v1242_v42 = vpop.f32.mrf.mxu0  ;;  %v4842_v45 = vpop.permute.xlu0 %671 }
 0x174   : > { %v4829_v27 = vadd.f32 %v1242_v42, %v4249_v13  ;;  %7174 = vst [vmem:[#allocation175_spill] sm:$0xff] %v4842_v45 }
 0x175   : > { %v4831_v48 = vpop.f32.mrf.mxu0 }
 0x176   : > { %7170 = vst [vmem:[#allocation171_spill] sm:$0xff] %v4829_v27  ;;  %7171 = vst [vmem:[#allocation172_spill] sm:$0xff] %v4831_v48  ;;  %1628 = vperm.xlu1 %3656, %v4829_v27   ;;  %v4850_v48 = vpop.permute.xlu1 %674 }
 0x177   : > { %1445 = vst.msk [vmem:[%s4017_s22 + $0xe8] sm:$0xff] %vm1415_vm1, %v4829_v27  ;;  %v1248_v16 = vpop.f32.mrf.mxu0  ;;  %7176 = vst [vmem:[#allocation177_spill] sm:$0xff] %v4850_v48 }
 0x178   : > { %v4840_v51 = vadd.f32 %v1248_v16, %v4249_v13 }
 0x179   : > { %v4844_v22 = vpop.f32.mrf.mxu0 }
 0x17a   : > { %7173 = vst [vmem:[#allocation174_spill] sm:$0xff] %v4840_v51  ;;  %7175 = vst [vmem:[#allocation176_spill] sm:$0xff] %v4844_v22  ;;  %1633 = vperm.xlu0 %3655, %v4840_v51  }
 0x17b   : > { %1446 = vst.msk [vmem:[%s4017_s22 + $0xf0] sm:$0xff] %vm1415_vm1, %v4840_v51  ;;  %v1252_v42 = vpop.f32.mrf.mxu0 }
 0x17c   : > { %v4853_v49 = vadd.f32 %v1252_v42, %v4249_v13 }
 0x17d   : > { %v4855_v27 = vpop.f32.mrf.mxu0  ;;  %v4857_v16 = vpop.permute.xlu0 %1483 }
 0x17e   : > { %7177 = vst [vmem:[#allocation178_spill] sm:$0xff] %v4853_v49  ;;  %7178 = vst [vmem:[#allocation179_spill] sm:$0xff] %v4855_v27  ;;  %1638 = vperm.xlu1 %3656, %v4853_v49  }
 0x17f   : > { %1447 = vst.msk [vmem:[%s4017_s22 + $0xf8] sm:$0xff] %vm1415_vm1, %v4853_v49  ;;  %v1258_v22 = vpop.f32.mrf.mxu0 }
 0x180   : > { %v4864_v26 = vadd.f32 %v1258_v22, %v4249_v13 }
 0x181   : > { %v4866_v51 = vpop.f32.mrf.mxu0  ;;  %v4868_v48 = vpop.permute.xlu1 %1488 }
 0x182   : > { %7179 = vst [vmem:[#allocation180_spill] sm:$0xff] %v4864_v26  ;;  %7180 = vst [vmem:[#allocation181_spill] sm:$0xff] %v4866_v51  ;;  %v4873_v42 = vpop.permute.xlu0 %1673  ;;  %1643 = vperm.xlu0 %3655, %v4864_v26  }
 0x183   : > { %1448 = vst.msk [vmem:[%s4017_s22 + $0x100] sm:$0xff] %vm1415_vm1, %v4864_v26  ;;  %v1262_v27 = vpop.f32.mrf.mxu0 }
 0x184   : > { %v4877_v55 = vadd.f32 %v1262_v27, %v4249_v13 }
 0x185   : > { %v4879_v49 = vpop.f32.mrf.mxu0  ;;  %v1679_v22 = vpop.permute.xlu1 %1678 }
 0x186   : > { %7181 = vst [vmem:[#allocation182_spill] sm:$0xff] %v4877_v55  ;;  %7182 = vst [vmem:[#allocation183_spill] sm:$0xff] %v4879_v49  ;;  %v4884_v51 = vpop.permute.xlu0 %1493  ;;  %1648 = vperm.xlu1 %3656, %v4877_v55  }
 0x187   : > { %1449 = vst.msk [vmem:[%s4017_s22 + $0x108] sm:$0xff] %vm1415_vm1, %v4877_v55  ;;  %v1268_v35 = vpop.f32.mrf.mxu0 }
 0x188   : > { %v4888_v45 = vadd.f32 %v1268_v35, %v4249_v13 }
 0x189   : > { %v4890_v26 = vpop.f32.mrf.mxu0  ;;  %v4892_v27 = vpop.permute.xlu1 %1498 }
 0x18a   : > { %7183 = vst [vmem:[#allocation184_spill] sm:$0xff] %v4888_v45  ;;  %7184 = vst [vmem:[#allocation185_spill] sm:$0xff] %v4890_v26  ;;  %v1684_v49 = vpop.permute.xlu0 %1683  ;;  %1653 = vperm.xlu0 %3655, %v4888_v45  }
 0x18b   : > { %1450 = vst.msk [vmem:[%s4017_s22 + $0x110] sm:$0xff] %vm1415_vm1, %v4888_v45  ;;  %v1272_v12 = vpop.f32.mrf.mxu0 }
 0x18c   : > { %v4899_v46 = vadd.f32 %v1272_v12, %v4249_v13 }
 0x18d   : > { %v4901_v55 = vpop.f32.mrf.mxu0  ;;  %v1689_v35 = vpop.permute.xlu1 %1688 }
 0x18e   : > { %7185 = vst [vmem:[#allocation186_spill] sm:$0xff] %v4899_v46  ;;  %7186 = vst [vmem:[#allocation187_spill] sm:$0xff] %v4901_v55  ;;  %v4906_v26 = vpop.permute.xlu0 %1503  ;;  %1658 = vperm.xlu1 %3656, %v4899_v46  }
 0x18f   : > { %1451 = vst.msk [vmem:[%s4017_s22 + $0x118] sm:$0xff] %vm1415_vm1, %v4899_v46  ;;  %v1278_v41 = vpop.f32.mrf.mxu0 }
 0x190   : > { %v4910_v30 = vadd.f32 %v1278_v41, %v4249_v13 }
 0x191   : > { %v4912_v45 = vpop.f32.mrf.mxu0  ;;  %v4914_v29 = vpop.permute.xlu1 %1508 }
 0x192   : > { %7187 = vst [vmem:[#allocation188_spill] sm:$0xff] %v4910_v30  ;;  %7188 = vst [vmem:[#allocation189_spill] sm:$0xff] %v4912_v45  ;;  %v1694_v12 = vpop.permute.xlu0 %1693  ;;  %1663 = vperm.xlu0 %3655, %v4910_v30  }
 0x193   : > { %1452 = vst.msk [vmem:[%s4017_s22 + $0x120] sm:$0xff] %vm1415_vm1, %v4910_v30  ;;  %v1282_v55 = vpop.f32.mrf.mxu0 }
 0x194   : > { %v4921_v36 = vadd.f32 %v1282_v55, %v4249_v13 }
 0x195   : > { %v1699_v24 = vpop.permute.xlu1 %1698 }
 0x196   : > { %7189 = vst [vmem:[#allocation190_spill] sm:$0xff] %v4921_v36  ;;  %1453 = vst.msk [vmem:[%s4017_s22 + $0x128] sm:$0xff] %vm1415_vm1, %v4921_v36  ;;  %v4926_v41 = vpop.permute.xlu0 %1513  ;;  %1668 = vperm.xlu1 %3656, %v4921_v36  }
 0x199   : > { %v4929_v45 = vpop.permute.xlu1 %1518 }
 0x19a   : > { %7190 = vst [vmem:[#allocation191_spill] sm:$0xff] %v4929_v45  ;;  %v1704_v46 = vpop.permute.xlu0 %1703 }
 0x19d   : > { %v1709_v14 = vpop.permute.xlu1 %1708 }
 0x19e   : > { %v4931_v19 = vpop.permute.xlu0 %1523 }
 0x19f   : > { %7191 = vst [vmem:[#allocation192_spill] sm:$0xff] %v4931_v19 }
 0x1a1   : > { %v4933_v11 = vpop.permute.xlu1 %1528 }
 0x1a2   : > { %7192 = vst [vmem:[#allocation193_spill] sm:$0xff] %v4933_v11  ;;  %v1714_v30 = vpop.permute.xlu0 %1713 }
 0x1a5   : > { %v4935_v15 = vpop.permute.xlu1 %1718 }
 0x1a6   : > { %v4937_v13 = vpop.permute.xlu0 %1533 }
 0x1a7   : > { %7193 = vst [vmem:[#allocation194_spill] sm:$0xff] %v4937_v13 }
 0x1a9   : > { %v4939_v55 = vpop.permute.xlu1 %1538 }
 0x1aa   : > { %7194 = vst [vmem:[#allocation195_spill] sm:$0xff] %v4939_v55  ;;  %v4941_v9 = vpop.permute.xlu0 %1723 }
 0x1ad   : > { %v4943_v37 = vpop.permute.xlu1 %1728 }
 0x1ae   : > { %v4945_v36 = vpop.permute.xlu0 %1543 }
 0x1af   : > { %7195 = vst [vmem:[#allocation196_spill] sm:$0xff] %v4945_v36 }
 0x1b1   : > { %v4947_v7 = vpop.permute.xlu1 %1548 }
 0x1b2   : > { %7196 = vst [vmem:[#allocation197_spill] sm:$0xff] %v4947_v7  ;;  %v4949_v8 = vpop.permute.xlu0 %1733 }
 0x1b5   : > { %v4951_v4 = vpop.permute.xlu1 %1738 }
 0x1b6   : > { %7197 = vst [vmem:[#allocation198_spill] sm:$0xff] %v4951_v4  ;;  %v4953_v11 = vpop.permute.xlu0 %1553 }
 0x1b7   : > { %7198 = vst [vmem:[#allocation199_spill] sm:$0xff] %v4953_v11 }
 0x1b9   : > { %v4955_v6 = vpop.permute.xlu1 %1558 }
 0x1ba   : > { %7199 = vst [vmem:[#allocation200_spill] sm:$0xff] %v4955_v6  ;;  %v4957_v19 = vpop.permute.xlu0 %1743  ;;  %v7204_v6 = vlaneseq }
 0x1bb   : > { %7200 = vst [vmem:[#allocation201_spill] sm:$0xff] %v4957_v19 }
 0x1bc   : > { %v4978_v19 = vand.u32 127, %v7204_v6 }
 0x1bd   : > { %v4959_v13 = vpop.permute.xlu1 %1748 }
 0x1be   : > { %7201 = vst [vmem:[#allocation202_spill] sm:$0xff] %v4959_v13  ;;  %v4961_v55 = vpop.permute.xlu0 %1563  ;;  %vm6879_vm2 = vcmp.eq.s32.totalorder %v4519_v23, %v4978_v19  ;;  %vm6881_vm3 = vcmp.eq.s32.totalorder %v4504_v43, %v4978_v19  ;;  %vm6883_vm4 = vcmp.eq.s32.totalorder %v4536_v5, %v4978_v19  ;;  %vm6880_vm6 = vcmp.eq.s32.totalorder %v4551_v31, %v4978_v19 }
 0x1bf   : > { %v1839_v6 = vsel %vm6881_vm3, %v4873_v42, -inf  ;;  %vm6885_vm7 = vcmp.eq.s32.totalorder %v4566_v32, %v4978_v19  ;;  %vm6882_vm8 = vcmp.eq.s32.totalorder %v4581_v34, %v4978_v19  ;;  %vm6887_vm9 = vcmp.eq.s32.totalorder %v4598_v25, %v4978_v19  ;;  %v7221_v25 = vld [vmem:[#allocation165_spill] sm:$0xff] }
 0x1c0   : > { %v1938_v42 = vsel %vm1865_vm5, %v1839_v6, -inf  ;;  %v1844_v31 = vsel %vm6882_vm8, %v1699_v24, -inf  ;;  %vm6884_vm10 = vcmp.eq.s32.totalorder %v4613_v39, %v4978_v19  ;;  %vm6889_vm11 = vcmp.eq.s32.totalorder %v4628_v17, %v4978_v19 }
 0x1c1   : > { %v4963_v45 = vpop.permute.xlu1 %1568  ;;  %v1846_v24 = vsel %vm6884_vm10, %v1709_v14, -inf  ;;  %vm6890_vm12 = vcmp.eq.s32.totalorder %v4195_v50, %v4978_v19  ;;  %vm6901_vm13 = vcmp.eq.s32.totalorder %v4198_v52, %v4978_v19  ;;  %vm6904_vm14 = vcmp.eq.s32.totalorder %v4203_v54, %v4978_v19 }
 0x1c2   : > { %7202 = vst [vmem:[#allocation203_spill] sm:$0xff] %v4963_v45  ;;  %v4965_v44 = vpop.permute.xlu0 %1753  ;;  %v1840_v45 = vsel %vm6879_vm2, %v1679_v22, -inf  ;;  %vm6891_vm15 = vcmp.eq.s32.totalorder %v4200_v53, %v4978_v19  ;;  %vm6886_vm0 = vcmp.eq.s32.totalorder %v4643_v18, %v4978_v19  ;;  %v1952_v14 = vsel %vm1865_vm5, %v1846_v24, -inf  ;;  %v7220_v18 = vld [vmem:[#allocation16_spill] sm:$0xff] }
 0x1c3   : > { %v1940_v22 = vsel %vm1865_vm5, %v1840_v45, -inf  ;;  %vm6895_vm1 = vcmp.eq.s32.totalorder %v4208_v57, %v4978_v19  ;;  %vm6893_vm2 = vcmp.eq.s32.totalorder %v4206_v56, %v4978_v19  ;;  %vm6920_vm3 = vcmp.eq.s32.totalorder %v4210_v58, %v4978_v19  ;;  %v7235_v56 = vld [vmem:[#allocation170_spill] sm:$0xff] }
 0x1c4   : > { %v1939_v5 = vmax.f32 %v1940_v22, %v1938_v42  ;;  %v1845_v22 = vsel %vm6887_vm9, %v1704_v46, -inf  ;;  %vm6888_vm8 = vcmp.eq.s32.totalorder %v4660_v47, %v4978_v19  ;;  %vm6923_vm10 = vcmp.eq.s32.totalorder %v4214_v60, %v4978_v19  ;;  %v7216_v47 = vld [vmem:[#allocation193_spill] sm:$0xff] }
 0x1c5   : > { %v4967_v36 = vpop.permute.xlu1 %1758  ;;  %vm6894_vm9 = vcmp.eq.s32.totalorder %v4690_v20, %v4978_v19  ;;  %v7219_v39 = vld [vmem:[#allocation202_spill] sm:$0xff] }
 0x1c6   : > { %v4969_v7 = vpop.permute.xlu0 %1573 }
 0x1c9   : > { %v4971_v2 = vpop.permute.xlu1 %1578 }
 0x1ca   : > { %7203 = vst [vmem:[#allocation204_spill] sm:$0xff] %v4971_v2  ;;  %v4973_v4 = vpop.permute.xlu0 %1763 }
 0x1cd   : > { %v4975_v11 = vpop.permute.xlu1 %1768 }
 0x1ce   : > { %v4980_v13 = vpop.permute.xlu0 %1583 }
 0x1cf   : > { %7205 = vst [vmem:[#allocation205_spill] sm:$0xff] %v4980_v13  ;;  %v1841_v13 = vsel %vm6883_vm4, %v1684_v49, -inf  ;;  %v1843_v49 = vsel %vm6885_vm7, %v1694_v12, -inf  ;;  %vm6892_vm7 = vcmp.eq.s32.totalorder %v4675_v21, %v4978_v19  ;;  %vm6924_vm4 = vcmp.eq.s32.totalorder %v4752_v38, %v4978_v19 }
 0x1d0   : > { %v1942_v43 = vsel %vm1865_vm5, %v1841_v13, -inf  ;;  %v1946_v13 = vsel %vm1865_vm5, %v1843_v49, -inf  ;;  %v1850_v24 = vsel %vm6892_vm7, %v4943_v37, -inf  ;;  %v1805_v37 = vsel %vm6893_vm2, %v4906_v26, -inf }
 0x1d1   : > { %v4991_v2 = vpop.permute.xlu1 %1588  ;;  %vm6942_vm7 = vcmp.eq.s32.totalorder %v4226_v1, %v4978_v19  ;;  %vm6941_vm2 = vcmp.eq.s32.totalorder %v4767_v10, %v4978_v19 }
 0x1d2   : > { %7206 = vst [vmem:[#allocation206_spill] sm:$0xff] %v4991_v2  ;;  %v5003_v23 = vpop.permute.xlu0 %1773  ;;  %v1842_v2 = vsel %vm6880_vm6, %v1689_v35, -inf  ;;  %v1947_v35 = vmax.f32 %v1939_v5, %v1942_v43  ;;  %v1950_v43 = vsel %vm1865_vm5, %v1845_v22, -inf  ;;  %vm6922_vm6 = vcmp.eq.s32.totalorder %v4212_v59, %v4978_v19 }
 0x1d3   : > { %7207 = vst [vmem:[#allocation207_spill] sm:$0xff] %v5003_v23  ;;  %v1944_v45 = vsel %vm1865_vm5, %v1842_v2, -inf  ;;  %v1948_v2 = vsel %vm1865_vm5, %v1844_v31, -inf  ;;  %v1847_v31 = vsel %vm6889_vm11, %v1714_v30, -inf  ;;  %vm6921_vm11 = vcmp.eq.s32.totalorder %v4737_v33, %v4978_v19 }
 0x1d4   : > { %v1955_v12 = vmax.f32 %v1947_v35, %v1944_v45  ;;  %v1848_v45 = vsel %vm6886_vm0, %v4935_v15, -inf  ;;  %v1954_v35 = vsel %vm1865_vm5, %v1847_v31, -inf  ;;  %v1849_v15 = vsel %vm6888_vm8, %v4941_v9, -inf }
 0x1d5   : > { %v5018_v23 = vpop.permute.xlu1 %1778  ;;  %vm6900_vm0 = vcmp.eq.s32.totalorder %v4705_v40, %v4978_v19  ;;  %v1802_v9 = vsel %vm6891_vm15, %v4868_v48, -inf  ;;  %vm6925_vm8 = vcmp.eq.s32.totalorder %v4218_v62, %v4978_v19  ;;  %v1958_v48 = vsel %vm1865_vm5, %v1849_v15, -inf  ;;  %v7214_v40 = vld [vmem:[#allocation15_spill] sm:$0xff] }
 0x1d6   : > { %v5026_v6 = vpop.permute.xlu0 %1593  ;;  %v1963_v5 = vmax.f32 %v1955_v12, %v1946_v13  ;;  %v1956_v12 = vsel %vm1865_vm5, %v1848_v45, -inf  ;;  %v1851_v31 = vsel %vm6894_vm9, %v4949_v8, -inf  ;;  %vm6940_vm15 = vcmp.eq.s32.totalorder %v4224_v0, %v4978_v19 }
 0x1d7   : > { %v1960_v8 = vsel %vm1865_vm5, %v1850_v24, -inf  ;;  %v1804_v45 = vsel %vm6904_vm14, %v4892_v27, -inf  ;;  %vm7217_vm14 = vcmp.eq.s32.totalorder %v4216_v61, %v4978_v19  ;;  %v1856_v33 = vsel %vm6941_vm2, %v4967_v36, -inf }
 0x1d8   : > { %v1971_v46 = vmax.f32 %v1963_v5, %v1948_v2  ;;  %v1801_v2 = vsel %vm6890_vm12, %v4857_v16, -inf  ;;  %vm6905_vm12 = vcmp.eq.s32.totalorder %v4722_v28, %v4978_v19 }
 0x1d9   : > { %v5040_v42 = vpop.permute.xlu1 %1598  ;;  %v1866_v26 = vsel %vm1865_vm5, %v1801_v2, -inf  ;;  %v1870_v2 = vsel %vm1865_vm5, %v1805_v37, -inf  ;;  %v7213_v37 = vld [vmem:[#allocation201_spill] sm:$0xff] }
 0x1da   : > { %v5056_v49 = vpop.permute.xlu0 %1783  ;;  %v1979_v30 = vmax.f32 %v1971_v46, %v1950_v43  ;;  %v1806_v43 = vsel %vm6895_vm1, %v4914_v29, -inf  ;;  %v1807_v29 = vsel %vm6920_vm3, %v4926_v41, -inf  ;;  %v7209_v41 = vld [vmem:[#allocation13_spill] sm:$0xff]  ;;  %v1871_v20 = vmax.f32 %v1866_v26, %v1870_v2 }
 0x1db   : > { %vm6951_vm9 = vcmp.eq.s32.totalorder %v7209_v41, %v4978_v19  ;;  %vm6953_vm3 = vcmp.eq.s32.totalorder %v7221_v25, %v4978_v19 }
 0x1dc   : > { %v1987_v13 = vmax.f32 %v1979_v30, %v1952_v14  ;;  %v1867_v14 = vsel %vm1865_vm5, %v1802_v9, -inf  ;;  %v1803_v30 = vsel %vm6901_vm13, %v4884_v51, -inf  ;;  %v1872_v51 = vsel %vm1865_vm5, %v1806_v43, -inf  ;;  %v7211_v9 = vld [vmem:[#allocation191_spill] sm:$0xff] }
 0x1dd   : > { %v5088_v22 = vpop.permute.xlu1 %1788  ;;  %v1808_v27 = vsel %vm6922_vm6, %v7211_v9, -inf  ;;  %v1853_v43 = vsel %vm6905_vm12, %v7213_v37, -inf  ;;  %v1868_v9 = vsel %vm1865_vm5, %v1803_v30, -inf  ;;  %v7218_v37 = vld [vmem:[#allocation163_spill] sm:$0xff]  ;;  %v1854_v30 = vsel %vm6921_vm11, %v7219_v39, -inf }
 0x1de   : > { %v1941_v5 = vmax.f32 %v1954_v35, %v1987_v13  ;;  %v5111_v16 = vpop.permute.xlu0 %1603  ;;  %v7208_v13 = vld [vmem:[#allocation198_spill] sm:$0xff]  ;;  %vm6950_vm12 = vcmp.eq.s32.totalorder %v7218_v37, %v4978_v19  ;;  %v1876_v28 = vsel %vm1865_vm5, %v1808_v27, -inf  ;;  %vm7225_vm6 = vcmp.eq.s32.totalorder %v4220_v63, %v4978_v19 }
 0x1df   : > { %v1852_v15 = vsel %vm6900_vm0, %v7208_v13, -inf  ;;  %vm6949_vm0 = vcmp.eq.s32.totalorder %v7214_v40, %v4978_v19 }
 0x1e0   : > { %v1949_v46 = vmax.f32 %v1941_v5, %v1956_v12  ;;  %v7210_v12 = vld [vmem:[#allocation159_spill] sm:$0xff]  ;;  %v1962_v5 = vsel %vm1865_vm5, %v1851_v31, -inf  ;;  %v7215_v31 = vld [vmem:[#allocation14_spill] sm:$0xff] }
 0x1e1   : > { %vm6943_vm1 = vcmp.eq.s32.totalorder %v7210_v12, %v4978_v19  ;;  %v5165_v24 = vpop.permute.xlu1 %1608  ;;  %vm6948_vm13 = vcmp.eq.s32.totalorder %v7215_v31, %v4978_v19 }
 0x1e2   : > { %v1957_v35 = vmax.f32 %v1949_v46, %v1958_v48  ;;  %v1874_v48 = vsel %vm1865_vm5, %v1807_v29, -inf  ;;  %v7212_v46 = vld [vmem:[#allocation192_spill] sm:$0xff]  ;;  %v1869_v29 = vsel %vm1865_vm5, %v1804_v45, -inf  ;;  %v1873_v45 = vmax.f32 %v1867_v14, %v1872_v51  ;;  %v7223_v51 = vld [vmem:[#allocation18_spill] sm:$0xff] }
 0x1e3   : > { %v1809_v13 = vsel %vm6923_vm10, %v7212_v46, -inf  ;;  %v5187_v46 = vpop.permute.xlu0 %1793  ;;  %v1875_v32 = vmax.f32 %v1868_v9, %v1874_v48  ;;  %v1855_v14 = vsel %vm6924_vm4, %v4965_v44, -inf  ;;  %v1877_v27 = vmax.f32 %v1869_v29, %v1876_v28  ;;  %v7228_v44 = vld [vmem:[#allocation21_spill] sm:$0xff]  ;;  %v7230_v28 = vld [vmem:[#allocation24_spill] sm:$0xff]  ;;  %v7231_v29 = vld [vmem:[#allocation167_spill] sm:$0xff] }
 0x1e4   : > { %v1965_v21 = vmax.f32 %v1957_v35, %v1960_v8  ;;  %v1810_v8 = vsel %vm7217_vm14, %v7216_v47, -inf  ;;  %v1964_v35 = vsel %vm1865_vm5, %v1852_v15, -inf  ;;  %v1878_v47 = vsel %vm1865_vm5, %v1809_v13, -inf  ;;  %v7226_v13 = vld [vmem:[#allocation196_spill] sm:$0xff] }
 0x1e5   : > { %v1966_v15 = vsel %vm1865_vm5, %v1853_v43, -inf  ;;  %vm6952_vm14 = vcmp.eq.s32.totalorder %v7220_v18, %v4978_v19  ;;  %v1880_v26 = vsel %vm1865_vm5, %v1810_v8, -inf  ;;  %vm7227_vm10 = vcmp.eq.s32.totalorder %v4222_v3, %v4978_v19  ;;  %v5222_v9 = vpop.permute.xlu1 %1798  ;;  %v7229_v8 = vld [vmem:[#allocation19_spill] sm:$0xff] }
 0x1e6   : > { %v1973_v34 = vmax.f32 %v1965_v21, %v1962_v5  ;;  %v7222_v21 = vld [vmem:[#allocation194_spill] sm:$0xff]  ;;  %v7224_v5 = vld [vmem:[#allocation195_spill] sm:$0xff]  ;;  %v1813_v43 = vsel %vm7227_vm10, %v7226_v13, -inf  ;;  %vm6962_vm4 = vcmp.eq.s32.totalorder %v7228_v44, %v4978_v19  ;;  %vm6967_vm11 = vcmp.eq.s32.totalorder %v7230_v28, %v4978_v19 }
 0x1e7   : > { %v1811_v2 = vsel %vm6925_vm8, %v7222_v21, -inf  ;;  %v1812_v48 = vsel %vm7225_vm6, %v7224_v5, -inf  ;;  %vm6961_vm8 = vcmp.eq.s32.totalorder %v7229_v8, %v4978_v19  ;;  %vm6959_vm6 = vcmp.eq.s32.totalorder %v7231_v29, %v4978_v19  ;;  %v5246_v54 = vpop.permute.xlu0 %1613  ;;  %v7254_v29 = vld [vmem:[#allocation177_spill] sm:$0xff] }
 0x1e8   : > { %v1981_v39 = vmax.f32 %v1973_v34, %v1964_v35  ;;  %v1968_v34 = vsel %vm1865_vm5, %v1854_v30, -inf  ;;  %v7232_v35 = vld [vmem:[#allocation197_spill] sm:$0xff]  ;;  %v7233_v30 = vld [vmem:[#allocation199_spill] sm:$0xff]  ;;  %v1879_v38 = vmax.f32 %v1871_v20, %v1878_v47  ;;  %v1881_v53 = vmax.f32 %v1873_v45, %v1880_v26 }
 0x1e9   : > { %v1814_v21 = vsel %vm6940_vm15, %v7232_v35, -inf  ;;  %v1815_v5 = vsel %vm6942_vm7, %v7233_v30, -inf  ;;  %v1882_v17 = vsel %vm1865_vm5, %v1811_v2, -inf  ;;  %v1970_v52 = vsel %vm1865_vm5, %v1855_v14, -inf  ;;  %v7234_v35 = vld [vmem:[#allocation27_spill] sm:$0xff]  ;;  %v7238_v30 = vld [vmem:[#allocation173_spill] sm:$0xff] }
 0x1ea   : > { %v1989_v13 = vmax.f32 %v1981_v39, %v1966_v15  ;;  %vm699_vm10 = vcmp.eq.s32.totalorder %v7234_v35, %v4978_v19  ;;  %vm6966_vm15 = vcmp.eq.s32.totalorder %v7235_v56, %v4978_v19  ;;  %v1884_v15 = vsel %vm1865_vm5, %v1812_v48, -inf  ;;  %v7236_v39 = vld [vmem:[#allocation200_spill] sm:$0xff]  ;;  %v7237_v48 = vld [vmem:[#allocation31_spill] sm:$0xff] }
 0x1eb   : > { %v1816_v20 = vsel %vm6951_vm9, %v7236_v39, -inf  ;;  %v1857_v45 = vsel %vm6943_vm1, %v4973_v4, -inf  ;;  %v1886_v47 = vsel %vm1865_vm5, %v1813_v43, -inf  ;;  %v1888_v26 = vsel %vm1865_vm5, %v1814_v21, -inf }
 0x1ec   : > { %v1991_v36 = vmax.f32 %v1968_v34, %v1989_v13  ;;  %v1890_v2 = vsel %vm1865_vm5, %v1815_v5, -inf  ;;  %v1972_v14 = vsel %vm1865_vm5, %v1856_v33, -inf  ;;  %vm700_vm2 = vcmp.eq.s32.totalorder %v7237_v48, %v4978_v19  ;;  %v7239_v13 = vld [vmem:[#allocation203_spill] sm:$0xff]  ;;  %v7240_v33 = vld [vmem:[#allocation40_spill] sm:$0xff] }
 0x1ed   : > { %vm6964_vm7 = vcmp.eq.s32.totalorder %v7238_v30, %v4978_v19  ;;  %v1883_v34 = vmax.f32 %v1875_v32, %v1882_v17  ;;  %v1817_v4 = vsel %vm6948_vm13, %v4961_v55, -inf  ;;  %v1818_v43 = vsel %vm6949_vm0, %v7239_v13, -inf  ;;  %v1619_v32 = vpop.permute.xlu1 %1618  ;;  %v5285_v55 = vpop.permute.xlu0 %1623 }
 0x1ee   : > { %v1943_v21 = vmax.f32 %v1970_v52, %v1991_v36  ;;  %vm702_vm1 = vcmp.eq.s32.totalorder %v7240_v33, %v4978_v19  ;;  %v1885_v5 = vmax.f32 %v1877_v27, %v1884_v15  ;;  %v1892_v39 = vsel %vm1865_vm5, %v1816_v20, -inf  ;;  %v7241_v36 = vld [vmem:[#allocation43_spill] sm:$0xff]  ;;  %v7242_v27 = vld [vmem:[#allocation56_spill] sm:$0xff] }
 0x1ef   : > { %v1974_v10 = vsel %vm1865_vm5, %v1857_v45, -inf  ;;  %v1858_v17 = vsel %vm6950_vm12, %v4975_v11, -inf  ;;  %v1887_v12 = vmax.f32 %v1879_v38, %v1886_v47  ;;  %v1889_v31 = vmax.f32 %v1881_v53, %v1888_v26  ;;  %v7243_v45 = vld [vmem:[#allocation207_spill] sm:$0xff]  ;;  %v7245_v26 = vld [vmem:[#allocation204_spill] sm:$0xff] }
 0x1f0   : > { %v1891_v13 = vmax.f32 %v1883_v34, %v1890_v2  ;;  %v1951_v52 = vmax.f32 %v1943_v21, %v1972_v14  ;;  %vm703_vm13 = vcmp.eq.s32.totalorder %v7241_v36, %v4978_v19  ;;  %v1894_v15 = vsel %vm1865_vm5, %v1817_v4, -inf  ;;  %v7244_v38 = vld [vmem:[#allocation175_spill] sm:$0xff]  ;;  %v7247_v4 = vld [vmem:[#allocation36_spill] sm:$0xff] }
 0x1f1   : > { %v1896_v20 = vsel %vm1865_vm5, %v1818_v43, -inf  ;;  %v1819_v11 = vsel %vm6952_vm14, %v4969_v7, -inf  ;;  %v1859_v53 = vsel %vm6953_vm3, %v7243_v45, -inf  ;;  %v1893_v47 = vmax.f32 %v1885_v5, %v1892_v39  ;;  %v7248_v7 = vld [vmem:[#allocation47_spill] sm:$0xff]  ;;  %v7250_v21 = vld [vmem:[#allocation72_spill] sm:$0xff]  ;;  %v7251_v5 = vld [vmem:[#allocation205_spill] sm:$0xff] }
 0x1f2   : > { %vm7246_vm9 = vcmp.eq.s32.totalorder %v7223_v51, %v4978_v19  ;;  %v1959_v14 = vmax.f32 %v1951_v52, %v1974_v10  ;;  %v1976_v34 = vsel %vm1865_vm5, %v1858_v17, -inf  ;;  %vm701_vm14 = vcmp.eq.s32.totalorder %v7247_v4, %v4978_v19  ;;  %v7249_v43 = vld [vmem:[#allocation59_spill] sm:$0xff]  ;;  %v7252_v10 = vld [vmem:[#allocation206_spill] sm:$0xff] }
 0x1f3   : > { %v1820_v2 = vsel %vm7246_vm9, %v7245_v26, -inf  ;;  %vm704_vm0 = vcmp.eq.s32.totalorder %v7248_v7, %v4978_v19  ;;  %vm6972_vm3 = vcmp.eq.s32.totalorder %v7249_v43, %v4978_v19  ;;  %vm710_vm12 = vcmp.eq.s32.totalorder %v7250_v21, %v4978_v19  ;;  %v1629_v26 = vpop.permute.xlu1 %1628 }
 0x1f4   : > { %v1821_v39 = vsel %vm6961_vm8, %v7251_v5, -inf  ;;  %v1822_v17 = vsel %vm6962_vm4, %v7252_v10, -inf  ;;  %v1860_v52 = vsel %vm6959_vm6, %v5018_v23, -inf  ;;  %v1823_v45 = vsel %vm6967_vm11, %v5026_v6, -inf  ;;  %v7253_v10 = vld [vmem:[#allocation63_spill] sm:$0xff] }
 0x1f5   : > { %v1634_v37 = vpop.permute.xlu0 %1633  ;;  %v1895_v25 = vmax.f32 %v1887_v12, %v1894_v15  ;;  %v5332_v40 = vmax.f32 %v1889_v31, %v1896_v20  ;;  %v1898_v5 = vsel %vm1865_vm5, %v1819_v11, -inf  ;;  %v1978_v18 = vsel %vm1865_vm5, %v1859_v53, -inf  ;;  %v7255_v53 = vld [vmem:[#allocation52_spill] sm:$0xff] }
 0x1f6   : > { %vm6970_vm9 = vcmp.eq.s32.totalorder %v7253_v10, %v4978_v19  ;;  %vm6985_vm6 = vcmp.eq.s32.totalorder %v7254_v29, %v4978_v19  ;;  %v1900_v23 = vsel %vm1865_vm5, %v1820_v2, -inf  ;;  %v1967_v51 = vmax.f32 %v1959_v14, %v1976_v34  ;;  %v7256_v2 = vld [vmem:[#allocation75_spill] sm:$0xff] }
 0x1f7   : > { %v1824_v6 = vsel %vm699_vm10, %v5040_v42, -inf  ;;  %v1861_v12 = vsel %vm6966_vm15, %v5056_v49, -inf  ;;  %v1902_v31 = vsel %vm1865_vm5, %v1821_v39, -inf  ;;  %v1904_v15 = vsel %vm1865_vm5, %v1822_v17, -inf }
 0x1f8   : > { %v1980_v20 = vsel %vm1865_vm5, %v1860_v52, -inf  ;;  %v1906_v11 = vsel %vm1865_vm5, %v1823_v45, -inf  ;;  %vm705_vm8 = vcmp.eq.s32.totalorder %v7255_v53, %v4978_v19  ;;  %vm6969_vm4 = vcmp.eq.s32.totalorder %v7256_v2, %v4978_v19 }
 0x1f9   : > { %v1899_v42 = vmax.f32 %v1891_v13, %v1898_v5  ;;  %v1975_v14 = vmax.f32 %v1967_v51, %v1978_v18  ;;  %v1862_v49 = vsel %vm6964_vm7, %v5088_v22, -inf  ;;  %v1825_v34 = vsel %vm700_vm2, %v5111_v16, -inf  ;;  %v1639_v39 = vpop.permute.xlu1 %1638  ;;  %v7257_v51 = vld [vmem:[#allocation68_spill] sm:$0xff] }
 0x1fa   : > { %v1901_v52 = vmax.f32 %v1893_v47, %v1900_v23  ;;  %v1908_v45 = vsel %vm1865_vm5, %v1824_v6, -inf  ;;  %v1982_v56 = vsel %vm1865_vm5, %v1861_v12, -inf  ;;  %v1827_v18 = vsel %vm702_vm1, %v5246_v54, -inf }
 0x1fb   : > { %vm6968_vm7 = vcmp.eq.s32.totalorder %v7257_v51, %v4978_v19  ;;  %v1903_v22 = vmax.f32 %v1895_v25, %v1902_v31  ;;  %v1905_v13 = vmax.f32 %v5332_v40, %v1904_v15  ;;  %v1983_v5 = vmax.f32 %v1975_v14, %v1980_v20 }
 0x1fc   : > { %v1907_v16 = vmax.f32 %v1899_v42, %v1906_v11  ;;  %v1984_v30 = vsel %vm1865_vm5, %v1862_v49, -inf  ;;  %v1910_v47 = vsel %vm1865_vm5, %v1825_v34, -inf  ;;  %v1828_v23 = vsel %vm703_vm13, %v1619_v32, -inf }
 0x1fd   : > { %v1644_v17 = vpop.permute.xlu0 %1643  ;;  %vm7258_vm15 = vcmp.eq.s32.totalorder %v7242_v27, %v4978_v19  ;;  %v1909_v6 = vmax.f32 %v1901_v52, %v1908_v45  ;;  %v1945_v12 = vmax.f32 %v1982_v56, %v1983_v5  ;;  %vm7259_vm11 = vcmp.eq.s32.totalorder %v7244_v38, %v4978_v19 }
 0x1fe   : > { %v1831_v54 = vsel %vm7258_vm15, %v1634_v37, -inf  ;;  %v1863_v25 = vsel %vm7259_vm11, %v5187_v46, -inf  ;;  %v1914_v40 = vsel %vm1865_vm5, %v1827_v18, -inf  ;;  %v1826_v32 = vsel %vm701_vm14, %v5165_v24, -inf }
 0x1ff   : > { %v1829_v37 = vsel %vm704_vm0, %v5285_v55, -inf  ;;  %v1832_v56 = vsel %vm6972_vm3, %v1639_v39, -inf  ;;  %v1953_v20 = vmax.f32 %v1945_v12, %v1984_v30  ;;  %v1911_v11 = vmax.f32 %v1903_v22, %v1910_v47 }
 0x200   : > { %v1916_v42 = vsel %vm1865_vm5, %v1828_v23, -inf  ;;  %v1922_v14 = vsel %vm1865_vm5, %v1831_v54, -inf  ;;  %v1986_v24 = vsel %vm1865_vm5, %v1863_v25, -inf  ;;  %v1864_v55 = vsel %vm6985_vm6, %v5222_v9, -inf }
 0x201   : > { %v1649_v31 = vpop.permute.xlu1 %1648  ;;  %v1915_v49 = vmax.f32 %v1907_v16, %v1914_v40  ;;  %v1833_v34 = vsel %vm6970_vm9, %v1644_v17, -inf  ;;  %v1912_v39 = vsel %vm1865_vm5, %v1826_v32, -inf  ;;  %v1918_v30 = vsel %vm1865_vm5, %v1829_v37, -inf }
 0x202   : > { %v1924_v52 = vsel %vm1865_vm5, %v1832_v56, -inf  ;;  %v1917_v22 = vmax.f32 %v1909_v6, %v1916_v42  ;;  %v1830_v5 = vsel %vm705_vm8, %v1629_v26, -inf  ;;  %v1961_v17 = vmax.f32 %v1953_v20, %v1986_v24  ;;  %v7260_v26 = vld [vmem:[#allocation79_spill] sm:$0xff] }
 0x203   : > { %v1923_v9 = vmax.f32 %v1915_v49, %v1922_v14  ;;  %v1988_v47 = vsel %vm1865_vm5, %v1864_v55, -inf  ;;  %v1926_v23 = vsel %vm1865_vm5, %v1833_v34, -inf  ;;  %v1919_v12 = vmax.f32 %v1911_v11, %v1918_v30  ;;  %v7261_v49 = vld [vmem:[#allocation84_spill] sm:$0xff] }
 0x204   : > { %v1925_v25 = vmax.f32 %v1917_v22, %v1924_v52  ;;  %v1834_v6 = vsel %vm6968_vm7, %v1649_v31, -inf  ;;  %vm712_vm11 = vcmp.eq.s32.totalorder %v7260_v26, %v4978_v19  ;;  %v1920_v32 = vsel %vm1865_vm5, %v1830_v5, -inf }
 0x205   : > { %v1654_v15 = vpop.permute.xlu0 %1653  ;;  %v1969_v56 = vmax.f32 %v1961_v17, %v1988_v47  ;;  %v1928_v42 = vsel %vm1865_vm5, %v1834_v6, -inf  ;;  %vm6986_vm15 = vcmp.eq.s32.totalorder %v7261_v49, %v4978_v19  ;;  %vm6971_vm7 = vcmask 32768  }
 0x206   : > { %v1835_v46 = vsel %vm710_vm12, %v1654_v15, -inf  ;;  %v1913_v15 = vmax.f32 %v1905_v13, %v1912_v39  ;;  %vm7265_vm9 = vcmp.eq.s32.totalorder %v4195_v50, %v4978_v19 }
 0x207   : > { %v1930_v45 = vsel %vm1865_vm5, %v1835_v46, -inf  ;;  %v1927_v46 = vmax.f32 %v1919_v12, %v1926_v23  ;;  %v1480_v23 = vld [vmem:[#allocation4] sm:$0x1]  ;;  %v7262_v12 = vld [vmem:[#allocation17_spill] sm:$0xff] }
 0x208   : > { %v1931_v40 = vmax.f32 %v1923_v9, %v1930_v45  ;;  %v1921_v31 = vmax.f32 %v1913_v15, %v1920_v32  ;;  %v756_v35 = vsub.s32 3, %v7262_v12 }
 0x209   : > { %v1659_v18 = vpop.permute.xlu1 %1658 }
 0x20a   : > { %v1836_v16 = vsel %vm6969_vm4, %v1659_v18, -inf  ;;  %v1977_v24 = vmax.f32 %v1969_v56, %v1931_v40  ;;  %v1929_v34 = vmax.f32 %v1921_v31, %v1928_v42  ;;  %vm7264_vm4 = vcmp.eq.s32.totalorder %v7242_v27, %v4978_v19 }
 0x20b   : > { %v1932_v54 = vsel %vm1865_vm5, %v1836_v16, -inf }
 0x20c   : > { %v1933_v20 = vmax.f32 %v1925_v25, %v1932_v54  ;;  %v5442_v25 = vsub.s32 0, %v7262_v12 }
 0x20d   : > { %v1664_v37 = vpop.permute.xlu0 %1663 }
 0x20e   : > { %v1837_v11 = vsel %vm712_vm11, %v1664_v37, -inf  ;;  %v1985_v39 = vmax.f32 %v1977_v24, %v1933_v20  ;;  %7263 = vst [vmem:[#allocation198_spill] sm:$0xff] %v5442_v25 }
 0x20f   : > { %v1934_v14 = vsel %vm1865_vm5, %v1837_v11, -inf }
 0x210   : > { %v1935_v55 = vmax.f32 %v1927_v46, %v1934_v14 }
 0x211   : > { %v1669_v13 = vpop.permute.xlu1 %1668 }
 0x212   : > { %v1838_v30 = vsel %vm6986_vm15, %v1669_v13, -inf  ;;  %v1990_v45 = vmax.f32 %v1935_v55, %v1985_v39 }
 0x213   : > { %v1936_v52 = vsel %vm1865_vm5, %v1838_v30, -inf }
 0x214   : > { %v1937_v18 = vmax.f32 %v1929_v34, %v1936_v52 }
 0x216   : > { %v1992_v22 = vmax.f32 %v1990_v45, %v1937_v18 }
 0x218   : > { %v1993_v5 = vrot.slane %v1992_v22, 4 }
 0x21a   : > { %v1994_v9 = vmax.f32 %v1992_v22, %v1993_v5 }
 0x21c   : > { %v1995_v16 = vrot.slane %v1994_v9, 2 }
 0x21e   : > { %v1996_v17 = vmax.f32 %v1994_v9, %v1995_v16 }
 0x220   : > { %v1997_v47 = vrot.slane %v1996_v17, 1 }
 0x222   : > { %v1998_v54 = vmax.f32 %v1996_v17, %v1997_v47 }
 0x224   : > { %v1999_v6 = vmax.f32 %v1480_v23, %v1998_v54 }
 0x226   : > { %v5445_v40 = vrot.slane %v1999_v6, %v5442_v25  ;;  %3109 = vst.msk [vmem:[#allocation4] sm:$0x1] %vm6971_vm7, %v1999_v6  ;;  %v2001_v15 = vsub.f32 %v1480_v23, %v1999_v6  ;;  %vm7266_vm7 = vcmp.eq.s32.totalorder %v7209_v41, %v4978_v19 }
 0x228   : > { %v2041_v32 = vsel %vm7264_vm4, %v5445_v40, -inf  ;;  %v2011_v37 = vsel %vm7265_vm9, %v5445_v40, -inf  ;;  %v2026_v20 = vsel %vm7266_vm7, %v5445_v40, -inf  ;;  %v2042_v11 = vsel %vm6972_vm3, %v5445_v40, -inf }
 0x229   : > { %v2165_v56 = vsel %vm1865_vm5, %v2041_v32, -inf  ;;  %v2075_v46 = vsel %vm1865_vm5, %v2011_v37, -inf  ;;  %v2120_v42 = vsel %vm1865_vm5, %v2026_v20, -inf  ;;  %v2168_v14 = vsel %vm1865_vm5, %v2042_v11, -inf }
 0x22a   : > { %2166 = vmax.xlane.f32.xlu1 %v2165_v56  ;;  %2076 = vmax.xlane.f32.xlu0 %v2075_v46  ;;  %v2040_v31 = vsel %vm705_vm8, %v5445_v40, -inf  ;;  %vm7267_vm4 = vcmp.eq.s32.totalorder %v4226_v1, %v4978_v19  ;;  %vm7268_vm7 = vcmp.eq.s32.totalorder %v4224_v0, %v4978_v19  ;;  %v2039_v39 = vsel %vm704_vm0, %v5445_v40, -inf }
 0x22b   : > { %v2025_v24 = vsel %vm7267_vm4, %v5445_v40, -inf  ;;  %v2162_v55 = vsel %vm1865_vm5, %v2040_v31, -inf  ;;  %v2024_v34 = vsel %vm7268_vm7, %v5445_v40, -inf  ;;  %v2159_v52 = vsel %vm1865_vm5, %v2039_v39, -inf }
 0x22c   : > { %v2117_v13 = vsel %vm1865_vm5, %v2025_v24, -inf  ;;  %v2114_v30 = vsel %vm1865_vm5, %v2024_v34, -inf  ;;  %v2038_v45 = vsel %vm703_vm13, %v5445_v40, -inf  ;;  %vm7269_vm9 = vcmp.eq.s32.totalorder %v4222_v3, %v4978_v19 }
 0x22d   : > { %v2023_v18 = vsel %vm7269_vm9, %v5445_v40, -inf  ;;  %v2156_v22 = vsel %vm1865_vm5, %v2038_v45, -inf  ;;  %vm7270_vm4 = vcmp.eq.s32.totalorder %v4220_v63, %v4978_v19  ;;  %v2037_v16 = vsel %vm702_vm1, %v5445_v40, -inf }
 0x22e   : > { %2121 = vmax.xlane.f32.xlu1 %v2120_v42  ;;  %2169 = vmax.xlane.f32.xlu0 %v2168_v14  ;;  %v2111_v5 = vsel %vm1865_vm5, %v2023_v18, -inf  ;;  %v2022_v9 = vsel %vm7270_vm4, %v5445_v40, -inf  ;;  %v2153_v47 = vsel %vm1865_vm5, %v2037_v16, -inf  ;;  %v2036_v23 = vsel %vm701_vm14, %v5445_v40, -inf  ;;  %v7280_v16 = vld [vmem:[#allocation18_spill] sm:$0xff] }
 0x22f   : > { %v2108_v17 = vsel %vm1865_vm5, %v2022_v9, -inf  ;;  %vm7271_vm7 = vcmp.eq.s32.totalorder %v4218_v62, %v4978_v19  ;;  %v2150_v32 = vsel %vm1865_vm5, %v2036_v23, -inf  ;;  %vm7272_vm9 = vcmp.eq.s32.totalorder %v4216_v61, %v4978_v19 }
 0x230   : > { %v2021_v54 = vsel %vm7271_vm7, %v5445_v40, -inf  ;;  %v2020_v56 = vsel %vm7272_vm9, %v5445_v40, -inf  ;;  %v2035_v46 = vsel %vm700_vm2, %v5445_v40, -inf  ;;  %vm2000_vm4 = vcmp.eq.f32.partialorder %v1999_v6, -inf }
 0x231   : > { %v2105_v37 = vsel %vm1865_vm5, %v2021_v54, -inf  ;;  %v2102_v20 = vsel %vm1865_vm5, %v2020_v56, -inf  ;;  %v2147_v11 = vsel %vm1865_vm5, %v2035_v46, -inf  ;;  %v2034_v42 = vsel %vm699_vm10, %v5445_v40, -inf  ;;  %v7286_v46 = vld [vmem:[#allocation16_spill] sm:$0xff] }
 0x232   : > { %2163 = vmax.xlane.f32.xlu1 %v2162_v55  ;;  %2118 = vmax.xlane.f32.xlu0 %v2117_v13  ;;  %vm7273_vm7 = vcmp.eq.s32.totalorder %v4214_v60, %v4978_v19  ;;  %v5536_v31 = vsel %vm2000_vm4, 0.0, %v2001_v15  ;;  %v2144_v24 = vsel %vm1865_vm5, %v2034_v42, -inf  ;;  %vm7274_vm9 = vcmp.eq.s32.totalorder %v4212_v59, %v4978_v19 }
 0x233   : > { %v2019_v14 = vsel %vm7273_vm7, %v5445_v40, -inf  ;;  %v2018_v6 = vsel %vm7274_vm9, %v5445_v40, -inf  ;;  %vm7275_vm3 = vcmp.eq.s32.totalorder %v7230_v28, %v4978_v19  ;;  %vm7276_vm4 = vcmp.eq.s32.totalorder %v7228_v44, %v4978_v19 }
 0x234   : > { %v2099_v55 = vsel %vm1865_vm5, %v2019_v14, -inf  ;;  %v2033_v13 = vsel %vm7275_vm3, %v5445_v40, -inf  ;;  %v2096_v34 = vsel %vm1865_vm5, %v2018_v6, -inf  ;;  %v2032_v39 = vsel %vm7276_vm4, %v5445_v40, -inf  ;;  %v7288_v14 = vld [vmem:[#allocation15_spill] sm:$0xff] }
 0x235   : > { %v2141_v15 = vsel %vm1865_vm5, %v2033_v13, -inf  ;;  %vm7277_vm7 = vcmp.eq.s32.totalorder %v4210_v58, %v4978_v19  ;;  %vm7278_vm3 = vcmp.eq.s32.totalorder %v4208_v57, %v4978_v19  ;;  %vm7279_vm9 = vcmp.eq.s32.totalorder %v7229_v8, %v4978_v19 }
 0x236   : > { %2115 = vmax.xlane.f32.xlu1 %v2114_v30  ;;  %2160 = vmax.xlane.f32.xlu0 %v2159_v52  ;;  %v2017_v30 = vsel %vm7277_vm7, %v5445_v40, -inf  ;;  %v2138_v52 = vsel %vm1865_vm5, %v2032_v39, -inf  ;;  %v2016_v18 = vsel %vm7278_vm3, %v5445_v40, -inf  ;;  %vm7281_vm4 = vcmp.eq.s32.totalorder %v7280_v16, %v4978_v19  ;;  %v7293_v39 = vld [vmem:[#allocation14_spill] sm:$0xff] }
 0x237   : > { %v2093_v45 = vsel %vm1865_vm5, %v2017_v30, -inf }
 0x23a   : > { %2157 = vmax.xlane.f32.xlu1 %v2156_v22  ;;  %2112 = vmax.xlane.f32.xlu0 %v2111_v5  ;;  %v2031_v22 = vsel %vm7279_vm9, %v5445_v40, -inf  ;;  %v2090_v5 = vsel %vm1865_vm5, %v2016_v18, -inf  ;;  %vm7287_vm9 = vcmp.eq.s32.totalorder %v7286_v46, %v4978_v19  ;;  %v7295_v18 = vld [vmem:[#allocation120_spill] sm:$0xff] }
 0x23b   : > { %v2135_v9 = vsel %vm1865_vm5, %v2031_v22, -inf }
 0x23e   : > { %2109 = vmax.xlane.f32.xlu1 %v2108_v17  ;;  %2154 = vmax.xlane.f32.xlu0 %v2153_v47  ;;  %v2030_v17 = vsel %vm7281_vm4, %v5445_v40, -inf  ;;  %v7282_v47 = vld [vmem:[#allocation12_spill] sm:$0xff]  ;;  %vm7289_vm4 = vcmp.eq.s32.totalorder %v7288_v14, %v4978_v19 }
 0x23f   : > { %vm7283_vm7 = vcmp.eq.s32.totalorder %v7282_v47, %v4978_v19  ;;  %v2132_v54 = vsel %vm1865_vm5, %v2030_v17, -inf }
 0x240   : > { %v2015_v23 = vsel %vm7283_vm7, %v5445_v40, -inf }
 0x242   : > { %2151 = vmax.xlane.f32.xlu1 %v2150_v32  ;;  %2106 = vmax.xlane.f32.xlu0 %v2105_v37  ;;  %v2087_v32 = vsel %vm1865_vm5, %v2015_v23, -inf  ;;  %v7284_v37 = vld [vmem:[#allocation11_spill] sm:$0xff] }
 0x243   : > { %vm7285_vm3 = vcmp.eq.s32.totalorder %v7284_v37, %v4978_v19 }
 0x244   : > { %v2014_v56 = vsel %vm7285_vm3, %v5445_v40, -inf  ;;  %vm7292_vm3 = vcmp.eq.s32.totalorder %v7244_v38, %v4978_v19 }
 0x246   : > { %2103 = vmax.xlane.f32.xlu1 %v2102_v20  ;;  %2148 = vmax.xlane.f32.xlu0 %v2147_v11  ;;  %v2029_v20 = vsel %vm7287_vm9, %v5445_v40, -inf  ;;  %v2084_v11 = vsel %vm1865_vm5, %v2014_v56, -inf  ;;  %vm7294_vm9 = vcmp.eq.s32.totalorder %v7293_v39, %v4978_v19  ;;  %v2074_v56 = vsel %vm6985_vm6, %v5445_v40, -inf }
 0x247   : > { %v2129_v42 = vsel %vm1865_vm5, %v2029_v20, -inf  ;;  %v2027_v30 = vsel %vm7294_vm9, %v5445_v40, -inf }
 0x24a   : > { %2145 = vmax.xlane.f32.xlu1 %v2144_v24  ;;  %2100 = vmax.xlane.f32.xlu0 %v2099_v55  ;;  %v2028_v24 = vsel %vm7289_vm4, %v5445_v40, -inf  ;;  %v7290_v55 = vld [vmem:[#allocation9_spill] sm:$0xff]  ;;  %vm7296_vm4 = vcmp.eq.s32.totalorder %v7295_v18, %v4978_v19 }
 0x24b   : > { %vm7291_vm7 = vcmp.eq.s32.totalorder %v7290_v55, %v4978_v19  ;;  %v2126_v13 = vsel %vm1865_vm5, %v2028_v24, -inf  ;;  %v2057_v22 = vsel %vm7296_vm4, %v5445_v40, -inf }
 0x24c   : > { %v2013_v6 = vsel %vm7291_vm7, %v5445_v40, -inf  ;;  %v2213_v17 = vsel %vm1865_vm5, %v2057_v22, -inf }
 0x24e   : > { %2097 = vmax.xlane.f32.xlu1 %v2096_v34  ;;  %2142 = vmax.xlane.f32.xlu0 %v2141_v15  ;;  %v2081_v34 = vsel %vm1865_vm5, %v2013_v6, -inf  ;;  %v2073_v15 = vsel %vm7292_vm3, %v5445_v40, -inf  ;;  %v7303_v6 = vld [vmem:[#allocation123_spill] sm:$0xff] }
 0x24f   : > { %vm7304_vm4 = vcmp.eq.s32.totalorder %v7303_v6, %v4978_v19  ;;  %v7350_v6 = vld [vmem:[#allocation102_spill] sm:$0xff] }
 0x252   : > { %2139 = vmax.xlane.f32.xlu1 %v2138_v52  ;;  %2094 = vmax.xlane.f32.xlu0 %v2093_v45  ;;  %v2261_v52 = vsel %vm1865_vm5, %v2073_v15, -inf  ;;  %v2123_v45 = vsel %vm1865_vm5, %v2027_v30, -inf  ;;  %v7305_v30 = vld [vmem:[#allocation165_spill] sm:$0xff] }
 0x256   : > { %2091 = vmax.xlane.f32.xlu1 %v2090_v5  ;;  %2136 = vmax.xlane.f32.xlu0 %v2135_v9  ;;  %v7297_v5 = vld [vmem:[#allocation10_spill] sm:$0xff] }
 0x257   : > { %vm7298_vm7 = vcmp.eq.s32.totalorder %v7297_v5, %v4978_v19 }
 0x258   : > { %v2012_v9 = vsel %vm7298_vm7, %v5445_v40, -inf  ;;  %vm7306_vm7 = vcmp.eq.s32.totalorder %v7305_v30, %v4978_v19 }
 0x259   : > { %v2078_v23 = vsel %vm1865_vm5, %v2012_v9, -inf }
 0x25a   : > { %2133 = vmax.xlane.f32.xlu1 %v2132_v54  ;;  %2088 = vmax.xlane.f32.xlu0 %v2087_v32  ;;  %v7299_v54 = vld [vmem:[#allocation170_spill] sm:$0xff] }
 0x25b   : > { %vm7300_vm3 = vcmp.eq.s32.totalorder %v7299_v54, %v4978_v19 }
 0x25c   : > { %v2071_v32 = vsel %vm7300_vm3, %v5445_v40, -inf }
 0x25d   : > { %v2255_v20 = vsel %vm1865_vm5, %v2071_v32, -inf }
 0x25e   : > { %2085 = vmax.xlane.f32.xlu1 %v2084_v11  ;;  %2130 = vmax.xlane.f32.xlu0 %v2129_v42  ;;  %v2264_v11 = vsel %vm1865_vm5, %v2074_v56, -inf  ;;  %v7301_v42 = vld [vmem:[#allocation111_spill] sm:$0xff]  ;;  %v7311_v56 = vld [vmem:[#allocation116_spill] sm:$0xff] }
 0x25f   : > { %vm7302_vm9 = vcmp.eq.s32.totalorder %v7301_v42, %v4978_v19 }
 0x260   : > { %v2055_v24 = vsel %vm7302_vm9, %v5445_v40, -inf }
 0x262   : > { %2127 = vmax.xlane.f32.xlu1 %v2126_v13  ;;  %2082 = vmax.xlane.f32.xlu0 %v2081_v34  ;;  %v2058_v13 = vsel %vm7304_vm4, %v5445_v40, -inf  ;;  %v2207_v34 = vsel %vm1865_vm5, %v2055_v24, -inf  ;;  %vm7312_vm4 = vcmp.eq.s32.totalorder %v7311_v56, %v4978_v19 }
 0x263   : > { %v2216_v15 = vsel %vm1865_vm5, %v2058_v13, -inf  ;;  %v7313_v13 = vld [vmem:[#allocation159_spill] sm:$0xff] }
 0x266   : > { %2262 = vmax.xlane.f32.xlu1 %v2261_v52  ;;  %2124 = vmax.xlane.f32.xlu0 %v2123_v45  ;;  %v2069_v52 = vsel %vm7306_vm7, %v5445_v40, -inf  ;;  %v7307_v45 = vld [vmem:[#allocation173_spill] sm:$0xff]  ;;  %vm7314_vm7 = vcmp.eq.s32.totalorder %v7313_v13, %v4978_v19 }
 0x267   : > { %vm7308_vm3 = vcmp.eq.s32.totalorder %v7307_v45, %v4978_v19  ;;  %v2249_v9 = vsel %vm1865_vm5, %v2069_v52, -inf }
 0x268   : > { %v2072_v22 = vsel %vm7308_vm3, %v5445_v40, -inf }
 0x26a   : > { %2214 = vmax.xlane.f32.xlu1 %v2213_v17  ;;  %2079 = vmax.xlane.f32.xlu0 %v2078_v23  ;;  %v2258_v17 = vsel %vm1865_vm5, %v2072_v22, -inf  ;;  %v7309_v23 = vld [vmem:[#allocation104_spill] sm:$0xff] }
 0x26b   : > { %vm7310_vm9 = vcmp.eq.s32.totalorder %v7309_v23, %v4978_v19 }
 0x26c   : > { %v2053_v32 = vsel %vm7310_vm9, %v5445_v40, -inf }
 0x26e   : > { %2256 = vmax.xlane.f32.xlu1 %v2255_v20  ;;  %2265 = vmax.xlane.f32.xlu0 %v2264_v11  ;;  %v2056_v20 = vsel %vm7312_vm4, %v5445_v40, -inf  ;;  %v2201_v11 = vsel %vm1865_vm5, %v2053_v32, -inf }
 0x26f   : > { %v2210_v24 = vsel %vm1865_vm5, %v2056_v20, -inf  ;;  %v7319_v20 = vld [vmem:[#allocation107_spill] sm:$0xff] }
 0x270   : > { %vm7320_vm4 = vcmp.eq.s32.totalorder %v7319_v20, %v4978_v19 }
 0x272   : > { %2208 = vmax.xlane.f32.xlu1 %v2207_v34  ;;  %2217 = vmax.xlane.f32.xlu0 %v2216_v15  ;;  %v2067_v34 = vsel %vm7314_vm7, %v5445_v40, -inf  ;;  %v7315_v15 = vld [vmem:[#allocation167_spill] sm:$0xff] }
 0x273   : > { %vm7316_vm3 = vcmp.eq.s32.totalorder %v7315_v15, %v4978_v19  ;;  %v2243_v22 = vsel %vm1865_vm5, %v2067_v34, -inf  ;;  %v7321_v34 = vld [vmem:[#allocation152_spill] sm:$0xff] }
 0x274   : > { %v2070_v52 = vsel %vm7316_vm3, %v5445_v40, -inf  ;;  %vm7322_vm7 = vcmp.eq.s32.totalorder %v7321_v34, %v4978_v19 }
 0x276   : > { %2250 = vmax.xlane.f32.xlu1 %v2249_v9  ;;  %2259 = vmax.xlane.f32.xlu0 %v2258_v17  ;;  %v2252_v9 = vsel %vm1865_vm5, %v2070_v52, -inf  ;;  %v7317_v17 = vld [vmem:[#allocation95_spill] sm:$0xff]  ;;  %v2065_v52 = vsel %vm7322_vm7, %v5445_v40, -inf }
 0x277   : > { %vm7318_vm9 = vcmp.eq.s32.totalorder %v7317_v17, %v4978_v19  ;;  %v2237_v38 = vsel %vm1865_vm5, %v2065_v52, -inf  ;;  %v7329_v52 = vld [vmem:[#allocation143_spill] sm:$0xff] }
 0x278   : > { %v2051_v32 = vsel %vm7318_vm9, %v5445_v40, -inf  ;;  %vm7330_vm7 = vcmp.eq.s32.totalorder %v7329_v52, %v4978_v19 }
 0x27a   : > { %2202 = vmax.xlane.f32.xlu1 %v2201_v11  ;;  %2211 = vmax.xlane.f32.xlu0 %v2210_v24  ;;  %v2054_v11 = vsel %vm7320_vm4, %v5445_v40, -inf  ;;  %v2195_v24 = vsel %vm1865_vm5, %v2051_v32, -inf  ;;  %v7325_v32 = vld [vmem:[#allocation88_spill] sm:$0xff] }
 0x27b   : > { %v2204_v29 = vsel %vm1865_vm5, %v2054_v11, -inf  ;;  %vm7326_vm9 = vcmp.eq.s32.totalorder %v7325_v32, %v4978_v19  ;;  %v7327_v11 = vld [vmem:[#allocation100_spill] sm:$0xff] }
 0x27c   : > { %vm7328_vm4 = vcmp.eq.s32.totalorder %v7327_v11, %v4978_v19 }
 0x27e   : > { %2244 = vmax.xlane.f32.xlu1 %v2243_v22  ;;  %2253 = vmax.xlane.f32.xlu0 %v2252_v9  ;;  %v7323_v22 = vld [vmem:[#allocation163_spill] sm:$0xff] }
 0x27f   : > { %vm7324_vm3 = vcmp.eq.s32.totalorder %v7323_v22, %v4978_v19 }
 0x280   : > { %v2068_v9 = vsel %vm7324_vm3, %v5445_v40, -inf }
 0x281   : > { %v2246_v45 = vsel %vm1865_vm5, %v2068_v9, -inf }
 0x282   : > { %2196 = vmax.xlane.f32.xlu1 %v2195_v24  ;;  %2205 = vmax.xlane.f32.xlu0 %v2204_v29  ;;  %v2049_v29 = vsel %vm7326_vm9, %v5445_v40, -inf  ;;  %v2052_v24 = vsel %vm7328_vm4, %v5445_v40, -inf }
 0x283   : > { %v2189_v54 = vsel %vm1865_vm5, %v2049_v29, -inf  ;;  %v2198_v15 = vsel %vm1865_vm5, %v2052_v24, -inf }
 0x286   : > { %2238 = vmax.xlane.f32.xlu1 %v2237_v38  ;;  %2247 = vmax.xlane.f32.xlu0 %v2246_v45  ;;  %v2063_v38 = vsel %vm7330_vm7, %v5445_v40, -inf  ;;  %v7331_v45 = vld [vmem:[#allocation155_spill] sm:$0xff] }
 0x287   : > { %vm7332_vm3 = vcmp.eq.s32.totalorder %v7331_v45, %v4978_v19  ;;  %v2231_v30 = vsel %vm1865_vm5, %v2063_v38, -inf  ;;  %v7335_v38 = vld [vmem:[#allocation136_spill] sm:$0xff] }
 0x288   : > { %v2066_v9 = vsel %vm7332_vm3, %v5445_v40, -inf  ;;  %vm7336_vm4 = vcmp.eq.s32.totalorder %v7335_v38, %v4978_v19 }
 0x289   : > { %v2240_v22 = vsel %vm1865_vm5, %v2066_v9, -inf }
 0x28a   : > { %2190 = vmax.xlane.f32.xlu1 %v2189_v54  ;;  %2199 = vmax.xlane.f32.xlu0 %v2198_v15  ;;  %v2047_v54 = vsel %vm712_vm11, %v5445_v40, -inf  ;;  %v7333_v15 = vld [vmem:[#allocation91_spill] sm:$0xff] }
 0x28b   : > { %vm7334_vm9 = vcmp.eq.s32.totalorder %v7333_v15, %v4978_v19  ;;  %v2183_v24 = vsel %vm1865_vm5, %v2047_v54, -inf  ;;  %v2048_v54 = vsel %vm6986_vm15, %v5445_v40, -inf }
 0x28c   : > { %v2050_v29 = vsel %vm7334_vm9, %v5445_v40, -inf }
 0x28d   : > { %v2192_v13 = vsel %vm1865_vm5, %v2050_v29, -inf }
 0x28e   : > { %2232 = vmax.xlane.f32.xlu1 %v2231_v30  ;;  %2241 = vmax.xlane.f32.xlu0 %v2240_v22  ;;  %v2061_v30 = vsel %vm7336_vm4, %v5445_v40, -inf  ;;  %v7337_v22 = vld [vmem:[#allocation148_spill] sm:$0xff]  ;;  %vm7343_vm4 = vcmp.eq.s32.totalorder %v7253_v10, %v4978_v19 }
 0x28f   : > { %vm7338_vm7 = vcmp.eq.s32.totalorder %v7337_v22, %v4978_v19  ;;  %v2225_v45 = vsel %vm1865_vm5, %v2061_v30, -inf  ;;  %v7339_v30 = vld [vmem:[#allocation127_spill] sm:$0xff] }
 0x290   : > { %v2064_v9 = vsel %vm7338_vm7, %v5445_v40, -inf  ;;  %vm7340_vm3 = vcmp.eq.s32.totalorder %v7339_v30, %v4978_v19  ;;  %vm7344_vm7 = vcmp.eq.s32.totalorder %v7256_v2, %v4978_v19 }
 0x291   : > { %v2234_v34 = vsel %vm1865_vm5, %v2064_v9, -inf }
 0x292   : > { %2184 = vmax.xlane.f32.xlu1 %v2183_v24  ;;  %2193 = vmax.xlane.f32.xlu0 %v2192_v13  ;;  %v2045_v13 = vsel %vm710_vm12, %v5445_v40, -inf  ;;  %v2186_v24 = vsel %vm1865_vm5, %v2048_v54, -inf  ;;  %v2046_v54 = vsel %vm7344_vm7, %v5445_v40, -inf }
 0x293   : > { %v2177_v29 = vsel %vm1865_vm5, %v2045_v13, -inf  ;;  %v2043_v13 = vsel %vm7343_vm4, %v5445_v40, -inf }
 0x296   : > { %2226 = vmax.xlane.f32.xlu1 %v2225_v45  ;;  %2235 = vmax.xlane.f32.xlu0 %v2234_v34  ;;  %v2059_v34 = vsel %vm7340_vm3, %v5445_v40, -inf  ;;  %v7341_v45 = vld [vmem:[#allocation139_spill] sm:$0xff] }
 0x297   : > { %vm7342_vm9 = vcmp.eq.s32.totalorder %v7341_v45, %v4978_v19  ;;  %v2219_v22 = vsel %vm1865_vm5, %v2059_v34, -inf  ;;  %v7345_v34 = vld [vmem:[#allocation132_spill] sm:$0xff] }
 0x298   : > { %v2062_v9 = vsel %vm7342_vm9, %v5445_v40, -inf  ;;  %vm7346_vm3 = vcmp.eq.s32.totalorder %v7345_v34, %v4978_v19  ;;  %vm7347_vm9 = vcmp.eq.s32.totalorder %v7257_v51, %v4978_v19 }
 0x299   : > { %v2228_v52 = vsel %vm1865_vm5, %v2062_v9, -inf  ;;  %v2044_v9 = vsel %vm7347_vm9, %v5445_v40, -inf }
 0x29a   : > { %2178 = vmax.xlane.f32.xlu1 %v2177_v29  ;;  %2187 = vmax.xlane.f32.xlu0 %v2186_v24  ;;  %v2171_v29 = vsel %vm1865_vm5, %v2043_v13, -inf  ;;  %v2180_v24 = vsel %vm1865_vm5, %v2046_v54, -inf  ;;  %v2174_v45 = vsel %vm1865_vm5, %v2044_v9, -inf }
 0x29e   : > { %2220 = vmax.xlane.f32.xlu1 %v2219_v22  ;;  %2229 = vmax.xlane.f32.xlu0 %v2228_v52  ;;  %v2060_v52 = vsel %vm7346_vm3, %v5445_v40, -inf }
 0x29f   : > { %v2222_v22 = vsel %vm1865_vm5, %v2060_v52, -inf  ;;  %v7349_v52 = vld [vmem:[#allocation178_spill] sm:$0xff] }
 0x2a2   : > { %2172 = vmax.xlane.f32.xlu1 %v2171_v29  ;;  %2181 = vmax.xlane.f32.xlu0 %v2180_v24  ;;  %v7348_v29 = vld [vmem:[#allocation174_spill] sm:$0xff] }
 0x2a6   : > { %2223 = vmax.xlane.f32.xlu0 %v2222_v22 }
 0x2aa   : > { %2175 = vmax.xlane.f32.xlu0 %v2174_v45  ;;  %v7351_v45 = vld [vmem:[#allocation97_spill] sm:$0xff] }
 0x2b3   : > { %v2167_v13 = vpop.xlane.xlu1 %2166  ;;  %v5770_v54 = vpop.xlane.xlu0 %2076 }
 0x2b4   : > { %v2361_v24 = vsub.f32 %v7348_v29, %v2167_v13  ;;  %v7352_v29 = vld [vmem:[#allocation171_spill] sm:$0xff]  ;;  %vm2297_vm4 = vcmp.eq.f32.partialorder %v2167_v13, -inf }
 0x2b6   : > { %v2455_v38 = vmul.f32 1.442695, %v2361_v24 }
 0x2b7   : > { %v5773_v30 = vpop.xlane.xlu1 %2121  ;;  %v2170_v34 = vpop.xlane.xlu0 %2169 }
 0x2b8   : > { %3713 = vpow2.f32 %v2455_v38  ;;  %v2362_v22 = vsub.f32 %v7349_v52, %v2170_v34  ;;  %v2346_v18 = vsub.f32 %v7350_v6, %v5773_v30  ;;  %v7353_v52 = vld [vmem:[#allocation168_spill] sm:$0xff]  ;;  %vm2298_vm7 = vcmp.eq.f32.partialorder %v2170_v34, -inf }
 0x2b9   : > { %v7360_v34 = vld [vmem:[#allocation156_spill] sm:$0xff]  ;;  %vm2282_vm9 = vcmp.eq.f32.partialorder %v5773_v30, -inf  ;;  %v7363_v30 = vld [vmem:[#allocation65_spill] sm:$0xff] }
 0x2ba   : > { %v2457_v56 = vmul.f32 1.442695, %v2362_v22  ;;  %v2425_v20 = vmul.f32 1.442695, %v2346_v18  ;;  %v7354_v22 = vld [vmem:[#allocation92_spill] sm:$0xff] }
 0x2bb   : > { %v5778_v40 = vpop.xlane.xlu1 %2163  ;;  %v2119_v9 = vpop.xlane.xlu0 %2118 }
 0x2bc   : > { %3715 = vpow2.f32 %v2457_v56  ;;  %v2345_v42 = vsub.f32 %v7351_v45, %v2119_v9  ;;  %v2360_v24 = vsub.f32 %v7352_v29, %v5778_v40  ;;  %vm2281_vm3 = vcmp.eq.f32.partialorder %v2119_v9, -inf }
 0x2be   : > { %v2423_v23 = vmul.f32 1.442695, %v2345_v42  ;;  %v2453_v6 = vmul.f32 1.442695, %v2360_v24  ;;  %v7355_v42 = vld [vmem:[#allocation86_spill] sm:$0xff] }
 0x2bf   : > { %v5783_v11 = vpop.xlane.xlu1 %2115  ;;  %v2161_v38 = vpop.xlane.xlu0 %2160 }
 0x2c0   : > { %3717 = vpow2.f32 %v2423_v23  ;;  %v2359_v17 = vsub.f32 %v7353_v52, %v2161_v38  ;;  %v2344_v15 = vsub.f32 %v7354_v22, %v5783_v11  ;;  %v7357_v22 = vld [vmem:[#allocation161_spill] sm:$0xff] }
 0x2c1   : > { %3719 = vpow2.f32 %v2425_v20  ;;  %v7356_v20 = vld [vmem:[#allocation164_spill] sm:$0xff] }
 0x2c2   : > { %v2451_v32 = vmul.f32 1.442695, %v2359_v17  ;;  %v2421_v23 = vmul.f32 1.442695, %v2344_v15 }
 0x2c3   : > { %v5788_v56 = vpop.xlane.xlu1 %2157  ;;  %v5790_v45 = vpop.xlane.xlu0 %2112 }
 0x2c4   : > { %3721 = vpow2.f32 %v2451_v32  ;;  %v2343_v29 = vsub.f32 %v7355_v42, %v5790_v45  ;;  %v2358_v24 = vsub.f32 %v7356_v20, %v5788_v56  ;;  %v7358_v42 = vld [vmem:[#allocation81_spill] sm:$0xff] }
 0x2c5   : > { %v3714_v18 = vpop.eup %3713  ;;  %3723 = vpow2.f32 %v2453_v6 }
 0x2c6   : > { %v2553_v49 = vsel %vm2297_vm4, 0.0, %v3714_v18  ;;  %v2419_v52 = vmul.f32 1.442695, %v2343_v29  ;;  %v2449_v15 = vmul.f32 1.442695, %v2358_v24  ;;  %vm2295_vm4 = vcmp.eq.f32.partialorder %v2161_v38, -inf }
 0x2c7   : > { %v5796_v26 = vpop.xlane.xlu1 %2109  ;;  %2739 = vperm.xlu1 %3656, %v2553_v49   ;;  %v5798_v17 = vpop.xlane.xlu0 %2154  ;;  %v7359_v49 = vld [vmem:[#allocation76_spill] sm:$0xff] }
 0x2c8   : > { %3725 = vpow2.f32 %v2419_v52  ;;  %v2357_v13 = vsub.f32 %v7357_v22, %v5798_v17  ;;  %v2342_v18 = vsub.f32 %v7358_v42, %v5796_v26 }
 0x2c9   : > { %v3716_v32 = vpop.eup %3715  ;;  %3727 = vpow2.f32 %v2421_v23 }
 0x2ca   : > { %v2447_v6 = vmul.f32 1.442695, %v2357_v13  ;;  %v2554_v29 = vsel %vm2298_vm7, 0.0, %v3716_v32  ;;  %v2417_v22 = vmul.f32 1.442695, %v2342_v18  ;;  %vm2296_vm7 = vcmp.eq.f32.partialorder %v5778_v40, -inf }
 0x2cb   : > { %v5804_v2 = vpop.xlane.xlu1 %2151  ;;  %v5806_v20 = vpop.xlane.xlu0 %2106  ;;  %2744 = vperm.xlu0 %3655, %v2554_v29  }
 0x2cc   : > { %3729 = vpow2.f32 %v2447_v6  ;;  %v2341_v52 = vsub.f32 %v7359_v49, %v5806_v20  ;;  %v2356_v51 = vsub.f32 %v7360_v34, %v5804_v2  ;;  %v7361_v6 = vld [vmem:[#allocation150_spill] sm:$0xff] }
 0x2cd   : > { %v3718_v21 = vpop.eup %3717  ;;  %3731 = vpow2.f32 %v2449_v15  ;;  %v7362_v15 = vld [vmem:[#allocation70_spill] sm:$0xff] }
 0x2ce   : > { %v2415_v23 = vmul.f32 1.442695, %v2341_v52  ;;  %v2537_v13 = vsel %vm2281_vm3, 0.0, %v3718_v21  ;;  %v3720_v32 = vpop.eup %3719  ;;  %v2445_v18 = vmul.f32 1.442695, %v2356_v51  ;;  %vm2279_vm3 = vcmp.eq.f32.partialorder %v5790_v45, -inf }
 0x2cf   : > { %v5812_v24 = vpop.xlane.xlu1 %2103  ;;  %v5814_v42 = vpop.xlane.xlu0 %2148  ;;  %2659 = vperm.xlu1 %3656, %v2537_v13   ;;  %v2538_v21 = vsel %vm2282_vm9, 0.0, %v3720_v32  ;;  %vm2280_vm9 = vcmp.eq.f32.partialorder %v5783_v11, -inf  ;;  %v7365_v45 = vld [vmem:[#allocation140_spill] sm:$0xff] }
 0x2d0   : > { %3733 = vpow2.f32 %v2415_v23  ;;  %v2355_v29 = vsub.f32 %v7361_v6, %v5814_v42  ;;  %v2340_v49 = vsub.f32 %v7362_v15, %v5812_v24  ;;  %v7364_v23 = vld [vmem:[#allocation145_spill] sm:$0xff] }
 0x2d1   : > { %v3722_v9 = vpop.eup %3721  ;;  %3735 = vpow2.f32 %v2417_v22 }
 0x2d2   : > { %v2443_v52 = vmul.f32 1.442695, %v2355_v29  ;;  %v2551_v10 = vsel %vm2295_vm4, 0.0, %v3722_v9  ;;  %v3724_v13 = vpop.eup %3723  ;;  %v2413_v22 = vmul.f32 1.442695, %v2340_v49  ;;  %vm2293_vm4 = vcmp.eq.f32.partialorder %v5798_v17, -inf }
 0x2d3   : > { %v5821_v34 = vpop.xlane.xlu1 %2145  ;;  %v5823_v43 = vpop.xlane.xlu0 %2100  ;;  %2664 = vperm.xlu1 %3656, %v2538_v21   ;;  %2729 = vperm.xlu0 %3655, %v2551_v10   ;;  %v2552_v9 = vsel %vm2296_vm7, 0.0, %v3724_v13  ;;  %v7366_v21 = vld [vmem:[#allocation60_spill] sm:$0xff]  ;;  %vm2294_vm7 = vcmp.eq.f32.partialorder %v5788_v56, -inf  ;;  %v7369_v56 = vld [vmem:[#allocation129_spill] sm:$0xff] }
 0x2d4   : > { %3737 = vpow2.f32 %v2443_v52  ;;  %v2339_v38 = vsub.f32 %v7363_v30, %v5823_v43  ;;  %v2354_v32 = vsub.f32 %v7364_v23, %v5821_v34 }
 0x2d5   : > { %v3726_v51 = vpop.eup %3725  ;;  %3739 = vpow2.f32 %v2445_v18 }
 0x2d6   : > { %v2411_v6 = vmul.f32 1.442695, %v2339_v38  ;;  %v2535_v15 = vsel %vm2279_vm3, 0.0, %v3726_v51  ;;  %v3728_v40 = vpop.eup %3727  ;;  %v2441_v52 = vmul.f32 1.442695, %v2354_v32  ;;  %vm2277_vm3 = vcmp.eq.f32.partialorder %v5806_v20, -inf }
 0x2d7   : > { %v5831_v29 = vpop.xlane.xlu1 %2097  ;;  %v5833_v10 = vpop.xlane.xlu0 %2142  ;;  %2734 = vperm.xlu1 %3656, %v2552_v9   ;;  %2649 = vperm.xlu0 %3655, %v2535_v15   ;;  %v2536_v51 = vsel %vm2280_vm9, 0.0, %v3728_v40  ;;  %v7368_v40 = vld [vmem:[#allocation134_spill] sm:$0xff]  ;;  %vm2278_vm9 = vcmp.eq.f32.partialorder %v5796_v26, -inf  ;;  %v7371_v26 = vld [vmem:[#allocation44_spill] sm:$0xff] }
 0x2d8   : > { %3741 = vpow2.f32 %v2411_v6  ;;  %v2353_v18 = vsub.f32 %v7365_v45, %v5833_v10  ;;  %v2338_v13 = vsub.f32 %v7366_v21, %v5831_v29  ;;  %v7367_v6 = vld [vmem:[#allocation54_spill] sm:$0xff] }
 0x2d9   : > { %v3730_v49 = vpop.eup %3729  ;;  %3743 = vpow2.f32 %v2413_v22 }
 0x2da   : > { %v2439_v30 = vmul.f32 1.442695, %v2353_v18  ;;  %v2549_v23 = vsel %vm2293_vm4, 0.0, %v3730_v49  ;;  %v3732_v11 = vpop.eup %3731  ;;  %v2409_v22 = vmul.f32 1.442695, %v2338_v13  ;;  %vm2291_vm4 = vcmp.eq.f32.partialorder %v5814_v42, -inf }
 0x2db   : > { %v5841_v38 = vpop.xlane.xlu1 %2139  ;;  %v5843_v9 = vpop.xlane.xlu0 %2094  ;;  %2654 = vperm.xlu1 %3656, %v2536_v51   ;;  %2719 = vperm.xlu0 %3655, %v2549_v23   ;;  %v2550_v21 = vsel %vm2294_vm7, 0.0, %v3732_v11  ;;  %v7370_v11 = vld [vmem:[#allocation49_spill] sm:$0xff]  ;;  %vm2292_vm7 = vcmp.eq.f32.partialorder %v5804_v2, -inf }
 0x2dc   : > { %3745 = vpow2.f32 %v2439_v30  ;;  %v2337_v15 = vsub.f32 %v7367_v6, %v5843_v9  ;;  %v2352_v45 = vsub.f32 %v7368_v40, %v5841_v38 }
 0x2dd   : > { %v3734_v17 = vpop.eup %3733  ;;  %3747 = vpow2.f32 %v2441_v52 }
 0x2de   : > { %v3736_v32 = vpop.eup %3735  ;;  %v2407_v18 = vmul.f32 1.442695, %v2337_v15  ;;  %v2533_v51 = vsel %vm2277_vm3, 0.0, %v3734_v17  ;;  %v2437_v6 = vmul.f32 1.442695, %v2352_v45  ;;  %vm2275_vm3 = vcmp.eq.f32.partialorder %v5823_v43, -inf }
 0x2df   : > { %v5851_v49 = vpop.xlane.xlu1 %2091  ;;  %v5853_v30 = vpop.xlane.xlu0 %2136  ;;  %2724 = vperm.xlu1 %3656, %v2550_v21   ;;  %2639 = vperm.xlu0 %3655, %v2533_v51   ;;  %v2534_v13 = vsel %vm2278_vm9, 0.0, %v3736_v32  ;;  %v7372_v32 = vld [vmem:[#allocation124_spill] sm:$0xff]  ;;  %vm2276_vm9 = vcmp.eq.f32.partialorder %v5812_v24, -inf  ;;  %v7373_v43 = vld [vmem:[#allocation118_spill] sm:$0xff]  ;;  %v7375_v24 = vld [vmem:[#allocation23_spill] sm:$0xff] }
 0x2e0   : > { %3749 = vpow2.f32 %v2407_v18  ;;  %v2351_v20 = vsub.f32 %v7369_v56, %v5853_v30  ;;  %v2336_v15 = vsub.f32 %v7370_v11, %v5851_v49 }
 0x2e1   : > { %v3738_v52 = vpop.eup %3737  ;;  %3751 = vpow2.f32 %v2409_v22 }
 0x2e2   : > { %v3740_v23 = vpop.eup %3739  ;;  %v2435_v17 = vmul.f32 1.442695, %v2351_v20  ;;  %v2547_v21 = vsel %vm2291_vm4, 0.0, %v3738_v52  ;;  %v2405_v20 = vmul.f32 1.442695, %v2336_v15  ;;  %vm2289_vm4 = vcmp.eq.f32.partialorder %v5833_v10, -inf }
 0x2e3   : > { %v5861_v40 = vpop.xlane.xlu1 %2133  ;;  %v5863_v51 = vpop.xlane.xlu0 %2088  ;;  %2644 = vperm.xlu1 %3656, %v2534_v13   ;;  %2709 = vperm.xlu0 %3655, %v2547_v21   ;;  %v2548_v18 = vsel %vm2292_vm7, 0.0, %v3740_v23  ;;  %vm2290_vm7 = vcmp.eq.f32.partialorder %v5821_v34, -inf  ;;  %v7376_v10 = vld [vmem:[#allocation33_spill] sm:$0xff] }
 0x2e4   : > { %3753 = vpow2.f32 %v2435_v17  ;;  %v2335_v42 = vsub.f32 %v7371_v26, %v5863_v51  ;;  %v2350_v45 = vsub.f32 %v7372_v32, %v5861_v40  ;;  %v7374_v26 = vld [vmem:[#allocation38_spill] sm:$0xff] }
 0x2e5   : > { %v3742_v22 = vpop.eup %3741  ;;  %3755 = vpow2.f32 %v2437_v6 }
 0x2e6   : > { %v3744_v56 = vpop.eup %3743  ;;  %v2403_v52 = vmul.f32 1.442695, %v2335_v42  ;;  %v2531_v13 = vsel %vm2275_vm3, 0.0, %v3742_v22  ;;  %v2433_v23 = vmul.f32 1.442695, %v2350_v45  ;;  %vm2273_vm3 = vcmp.eq.f32.partialorder %v5843_v9, -inf }
 0x2e7   : > { %v5871_v11 = vpop.xlane.xlu1 %2085  ;;  %v5873_v21 = vpop.xlane.xlu0 %2130  ;;  %2714 = vperm.xlu1 %3656, %v2548_v18   ;;  %2629 = vperm.xlu0 %3655, %v2531_v13   ;;  %v2532_v6 = vsel %vm2276_vm9, 0.0, %v3744_v56  ;;  %vm2274_vm9 = vcmp.eq.f32.partialorder %v5831_v29, -inf  ;;  %v7378_v9 = vld [vmem:[#allocation108_spill] sm:$0xff] }
 0x2e8   : > { %3757 = vpow2.f32 %v2403_v52  ;;  %v2349_v2 = vsub.f32 %v7373_v43, %v5873_v21  ;;  %v2334_v42 = vsub.f32 %v7374_v26, %v5871_v11  ;;  %v2331_v52 = vsub.f32 %v7375_v24, %v5770_v54 }
 0x2e9   : > { %v3746_v17 = vpop.eup %3745  ;;  %3759 = vpow2.f32 %v2405_v20 }
 0x2ea   : > { %v3748_v15 = vpop.eup %3747  ;;  %v2431_v22 = vmul.f32 1.442695, %v2349_v2  ;;  %v2545_v18 = vsel %vm2289_vm4, 0.0, %v3746_v17  ;;  %v2401_v2 = vmul.f32 1.442695, %v2334_v42  ;;  %v7377_v17 = vld [vmem:[#allocation113_spill] sm:$0xff] }
 0x2eb   : > { %v5881_v32 = vpop.xlane.xlu1 %2127  ;;  %v5883_v13 = vpop.xlane.xlu0 %2082  ;;  %2634 = vperm.xlu1 %3656, %v2532_v6   ;;  %2699 = vperm.xlu0 %3655, %v2545_v18   ;;  %v2546_v20 = vsel %vm2290_vm7, 0.0, %v3748_v15  ;;  %v2395_v34 = vmul.f32 1.442695, %v2331_v52  ;;  %vm2287_vm4 = vcmp.eq.f32.partialorder %v5853_v30, -inf  ;;  %v7379_v42 = vld [vmem:[#allocation154_spill] sm:$0xff]  ;;  %vm2288_vm7 = vcmp.eq.f32.partialorder %v5841_v38, -inf }
 0x2ec   : > { %3761 = vpow2.f32 %v2431_v22  ;;  %v2333_v45 = vsub.f32 %v7376_v10, %v5883_v13  ;;  %v2348_v26 = vsub.f32 %v7377_v17, %v5881_v32  ;;  %v7382_v38 = vld [vmem:[#allocation160_spill] sm:$0xff] }
 0x2ed   : > { %v3750_v56 = vpop.eup %3749  ;;  %3763 = vpow2.f32 %v2433_v23 }
 0x2ee   : > { %v3752_v43 = vpop.eup %3751  ;;  %v2399_v27 = vmul.f32 1.442695, %v2333_v45  ;;  %v2529_v6 = vsel %vm2273_vm3, 0.0, %v3750_v56  ;;  %v2429_v45 = vmul.f32 1.442695, %v2348_v26  ;;  %vm2271_vm3 = vcmp.eq.f32.partialorder %v5863_v51, -inf }
 0x2ef   : > { %v5893_v24 = vpop.xlane.xlu1 %2262  ;;  %v5895_v18 = vpop.xlane.xlu0 %2124  ;;  %2704 = vperm.xlu1 %3656, %v2546_v20   ;;  %2619 = vperm.xlu0 %3655, %v2529_v6   ;;  %v2530_v10 = vsel %vm2274_vm9, 0.0, %v3752_v43  ;;  %vm2272_vm9 = vcmp.eq.f32.partialorder %v5851_v49, -inf  ;;  %v7384_v49 = vld [vmem:[#allocation74_spill] sm:$0xff] }
 0x2f0   : > { %3765 = vpow2.f32 %v2399_v27  ;;  %v2347_v23 = vsub.f32 %v7378_v9, %v5895_v18  ;;  %v2393_v22 = vsub.f32 %v7379_v42, %v5893_v24  ;;  %v7380_v27 = vld [vmem:[#allocation28_spill] sm:$0xff] }
 0x2f1   : > { %v3754_v15 = vpop.eup %3753  ;;  %3767 = vpow2.f32 %v2401_v2  ;;  %v7381_v2 = vld [vmem:[#allocation69_spill] sm:$0xff] }
 0x2f2   : > { %v2427_v56 = vmul.f32 1.442695, %v2347_v23  ;;  %v2543_v52 = vsel %vm2287_vm4, 0.0, %v3754_v15  ;;  %v3756_v29 = vpop.eup %3755  ;;  %3769 = vpow2.f32 %v2395_v34  ;;  %v2519_v43 = vmul.f32 1.442695, %v2393_v22 }
 0x2f3   : > { %v5903_v17 = vpop.xlane.xlu1 %2214  ;;  %v5905_v20 = vpop.xlane.xlu0 %2079  ;;  %2624 = vperm.xlu1 %3656, %v2530_v10   ;;  %2689 = vperm.xlu0 %3655, %v2543_v52   ;;  %v2544_v34 = vsel %vm2288_vm7, 0.0, %v3756_v29  ;;  %vm2285_vm4 = vcmp.eq.f32.partialorder %v5873_v21, -inf  ;;  %vm2286_vm7 = vcmp.eq.f32.partialorder %v5861_v40, -inf }
 0x2f4   : > { %3771 = vpow2.f32 %v2427_v56  ;;  %v2332_v30 = vsub.f32 %v7380_v27, %v5905_v20  ;;  %v2377_v26 = vsub.f32 %v7381_v2, %v5903_v17  ;;  %v7383_v56 = vld [vmem:[#allocation144_spill] sm:$0xff] }
 0x2f5   : > { %v3758_v6 = vpop.eup %3757  ;;  %3773 = vpow2.f32 %v2429_v45 }
 0x2f6   : > { %v2397_v9 = vmul.f32 1.442695, %v2332_v30  ;;  %v2527_v15 = vsel %vm2271_vm3, 0.0, %v3758_v6  ;;  %v3760_v10 = vpop.eup %3759  ;;  %3775 = vpow2.f32 %v2519_v43  ;;  %v2487_v45 = vmul.f32 1.442695, %v2377_v26 }
 0x2f7   : > { %v5913_v23 = vpop.xlane.xlu1 %2256  ;;  %v5915_v42 = vpop.xlane.xlu0 %2265  ;;  %2694 = vperm.xlu1 %3656, %v2544_v34   ;;  %2609 = vperm.xlu0 %3655, %v2527_v15   ;;  %v2528_v6 = vsel %vm2272_vm9, 0.0, %v3760_v10  ;;  %vm2269_vm3 = vcmp.eq.f32.partialorder %v5883_v13, -inf  ;;  %vm2270_vm9 = vcmp.eq.f32.partialorder %v5871_v11, -inf  ;;  %v7386_v13 = vld [vmem:[#allocation149_spill] sm:$0xff] }
 0x2f8   : > { %v2394_v51 = vsub.f32 %v7382_v38, %v5915_v42  ;;  %v2391_v52 = vsub.f32 %v7383_v56, %v5913_v23  ;;  %3777 = vpow2.f32 %v2397_v9  ;;  %v7385_v9 = vld [vmem:[#allocation58_spill] sm:$0xff] }
 0x2f9   : > { %v3762_v22 = vpop.eup %3761  ;;  %3779 = vpow2.f32 %v2487_v45 }
 0x2fa   : > { %v3764_v29 = vpop.eup %3763  ;;  %v2521_v27 = vmul.f32 1.442695, %v2394_v51  ;;  %v2541_v2 = vsel %vm2285_vm4, 0.0, %v3762_v22  ;;  %v2515_v26 = vmul.f32 1.442695, %v2391_v52  ;;  %vm2283_vm4 = vcmp.eq.f32.partialorder %v5895_v18, -inf }
 0x2fb   : > { %v5923_v30 = vpop.xlane.xlu1 %2208  ;;  %v5925_v34 = vpop.xlane.xlu0 %2217  ;;  %2614 = vperm.xlu1 %3656, %v2528_v6   ;;  %2679 = vperm.xlu0 %3655, %v2541_v2   ;;  %v2542_v51 = vsel %vm2286_vm7, 0.0, %v3764_v29  ;;  %v7387_v2 = vld [vmem:[#allocation133_spill] sm:$0xff]  ;;  %vm2267_vm7 = vcmp.eq.f32.partialorder %v5770_v54, -inf  ;;  %v7388_v18 = vld [vmem:[#allocation64_spill] sm:$0xff] }
 0x2fc   : > { %v2378_v21 = vsub.f32 %v7384_v49, %v5925_v34  ;;  %v2375_v15 = vsub.f32 %v7385_v9, %v5923_v30  ;;  %3781 = vpow2.f32 %v2521_v27 }
 0x2fd   : > { %v3766_v43 = vpop.eup %3765  ;;  %3783 = vpow2.f32 %v2515_v26 }
 0x2fe   : > { %v2489_v10 = vmul.f32 1.442695, %v2378_v21  ;;  %v2525_v22 = vsel %vm2269_vm3, 0.0, %v3766_v43  ;;  %v3768_v40 = vpop.eup %3767  ;;  %v2483_v27 = vmul.f32 1.442695, %v2375_v15  ;;  %vm2284_vm3 = vcmp.eq.f32.partialorder %v5881_v32, -inf }
 0x2ff   : > { %v5933_v38 = vpop.xlane.xlu1 %2250  ;;  %v5935_v56 = vpop.xlane.xlu0 %2259  ;;  %2684 = vperm.xlu1 %3656, %v2542_v51   ;;  %2599 = vperm.xlu0 %3655, %v2525_v22   ;;  %v2526_v43 = vsel %vm2270_vm9, 0.0, %v3768_v40  ;;  %vm2329_vm9 = vcmp.eq.f32.partialorder %v5893_v24, -inf  ;;  %v7390_v32 = vld [vmem:[#allocation138_spill] sm:$0xff] }
 0x300   : > { %v3770_v6 = vpop.eup %3769  ;;  %v2392_v45 = vsub.f32 %v7386_v13, %v5935_v56  ;;  %v2389_v29 = vsub.f32 %v7387_v2, %v5933_v38  ;;  %3785 = vpow2.f32 %v2489_v10  ;;  %v7389_v10 = vld [vmem:[#allocation48_spill] sm:$0xff] }
 0x301   : > { %v3772_v52 = vpop.eup %3771  ;;  %3787 = vpow2.f32 %v2483_v27  ;;  %v2523_v2 = vsel %vm2267_vm7, 0.0, %v3770_v6  ;;  %vm2313_vm7 = vcmp.eq.f32.partialorder %v5903_v17, -inf }
 0x302   : > { %v2517_v49 = vmul.f32 1.442695, %v2392_v45  ;;  %v2539_v9 = vsel %vm2283_vm4, 0.0, %v3772_v52  ;;  %v3774_v11 = vpop.eup %3773  ;;  %v2511_v15 = vmul.f32 1.442695, %v2389_v29  ;;  %vm2268_vm4 = vcmp.eq.f32.partialorder %v5905_v20, -inf }
 0x303   : > { %v5943_v21 = vpop.xlane.xlu1 %2202  ;;  %v5945_v51 = vpop.xlane.xlu0 %2211  ;;  %2604 = vperm.xlu1 %3656, %v2526_v43   ;;  %2669 = vperm.xlu0 %3655, %v2539_v9   ;;  %v2540_v52 = vsel %vm2284_vm3, 0.0, %v3774_v11  ;;  %v7392_v20 = vld [vmem:[#allocation53_spill] sm:$0xff]  ;;  %vm2330_vm3 = vcmp.eq.f32.partialorder %v5915_v42, -inf }
 0x304   : > { %v2376_v26 = vsub.f32 %v7388_v18, %v5945_v51  ;;  %v2373_v22 = vsub.f32 %v7389_v10, %v5943_v21  ;;  %v3776_v13 = vpop.eup %3775  ;;  %3789 = vpow2.f32 %v2517_v49  ;;  %v7391_v49 = vld [vmem:[#allocation122_spill] sm:$0xff] }
 0x305   : > { %v3778_v54 = vpop.eup %3777  ;;  %3791 = vpow2.f32 %v2511_v15  ;;  %v2585_v11 = vsel %vm2329_vm9, 0.0, %v3776_v13  ;;  %v7393_v13 = vld [vmem:[#allocation37_spill] sm:$0xff]  ;;  %vm2327_vm9 = vcmp.eq.f32.partialorder %v5913_v23, -inf }
 0x306   : > { %v2485_v40 = vmul.f32 1.442695, %v2376_v26  ;;  %v2479_v29 = vmul.f32 1.442695, %v2373_v22  ;;  %v3780_v18 = vpop.eup %3779  ;;  %v2524_v6 = vsel %vm2268_vm4, 0.0, %v3778_v54  ;;  %vm2314_vm4 = vcmp.eq.f32.partialorder %v5925_v34, -inf }
 0x307   : > { %v5953_v45 = vpop.xlane.xlu1 %2244  ;;  %v5955_v43 = vpop.xlane.xlu0 %2253  ;;  %2674 = vperm.xlu1 %3656, %v2540_v52   ;;  %2589 = vperm.xlu0 %3655, %v2523_v2   ;;  %v2569_v54 = vsel %vm2313_vm7, 0.0, %v3780_v18  ;;  %vm2311_vm7 = vcmp.eq.f32.partialorder %v5923_v30, -inf  ;;  %v7397_v34 = vld [vmem:[#allocation26_spill] sm:$0xff]  ;;  %v7398_v30 = vld [vmem:[#allocation117_spill] sm:$0xff] }
 0x308   : > { %v2390_v27 = vsub.f32 %v7390_v32, %v5955_v43  ;;  %v2387_v9 = vsub.f32 %v7391_v49, %v5953_v45  ;;  %3793 = vpow2.f32 %v2485_v40 }
 0x309   : > { %v3782_v24 = vpop.eup %3781  ;;  %3795 = vpow2.f32 %v2479_v29  ;;  %v7395_v29 = vld [vmem:[#allocation128_spill] sm:$0xff] }
 0x30a   : > { %v2513_v26 = vmul.f32 1.442695, %v2390_v27  ;;  %v2507_v22 = vmul.f32 1.442695, %v2387_v9  ;;  %v3784_v2 = vpop.eup %3783  ;;  %v2586_v32 = vsel %vm2330_vm3, 0.0, %v3782_v24  ;;  %vm2328_vm3 = vcmp.eq.f32.partialorder %v5935_v56, -inf }
 0x30b   : > { %v5963_v10 = vpop.xlane.xlu1 %2196  ;;  %v5965_v52 = vpop.xlane.xlu0 %2205  ;;  %2899 = vperm.xlu0 %3655, %v2585_v11   ;;  %2594 = vperm.xlu1 %3656, %v2524_v6   ;;  %v7394_v6 = vld [vmem:[#allocation112_spill] sm:$0xff]  ;;  %v2583_v24 = vsel %vm2327_vm9, 0.0, %v3784_v2  ;;  %vm2325_vm9 = vcmp.eq.f32.partialorder %v5933_v38, -inf }
 0x30c   : > { %v2374_v15 = vsub.f32 %v7392_v20, %v5965_v52  ;;  %v2371_v40 = vsub.f32 %v7393_v13, %v5963_v10  ;;  %3797 = vpow2.f32 %v2513_v26  ;;  %v7400_v38 = vld [vmem:[#allocation32_spill] sm:$0xff] }
 0x30d   : > { %v3786_v17 = vpop.eup %3785  ;;  %3799 = vpow2.f32 %v2507_v22 }
 0x30e   : > { %v2481_v27 = vmul.f32 1.442695, %v2374_v15  ;;  %v2475_v18 = vmul.f32 1.442695, %v2371_v40  ;;  %v3788_v26 = vpop.eup %3787  ;;  %v2570_v20 = vsel %vm2314_vm4, 0.0, %v3786_v17  ;;  %vm2312_vm4 = vcmp.eq.f32.partialorder %v5945_v51, -inf }
 0x30f   : > { %v5973_v49 = vpop.xlane.xlu1 %2238  ;;  %v5975_v11 = vpop.xlane.xlu0 %2247  ;;  %2819 = vperm.xlu0 %3655, %v2569_v54   ;;  %2904 = vperm.xlu1 %3656, %v2586_v32   ;;  %v2567_v2 = vsel %vm2311_vm7, 0.0, %v3788_v26  ;;  %v7399_v26 = vld [vmem:[#allocation101_spill] sm:$0xff]  ;;  %vm2309_vm7 = vcmp.eq.f32.partialorder %v5943_v21, -inf }
 0x310   : > { %v2385_v42 = vsub.f32 %v7394_v6, %v5973_v49  ;;  %v2388_v9 = vsub.f32 %v7395_v29, %v5975_v11  ;;  %3801 = vpow2.f32 %v2481_v27  ;;  %v7396_v29 = vld [vmem:[#allocation42_spill] sm:$0xff] }
 0x311   : > { %v3790_v32 = vpop.eup %3789  ;;  %3803 = vpow2.f32 %v2475_v18 }
 0x312   : > { %v2509_v15 = vmul.f32 1.442695, %v2388_v9  ;;  %v2503_v6 = vmul.f32 1.442695, %v2385_v42  ;;  %v3792_v40 = vpop.eup %3791  ;;  %v2584_v27 = vsel %vm2328_vm3, 0.0, %v3790_v32  ;;  %vm2326_vm3 = vcmp.eq.f32.partialorder %v5955_v43, -inf }
 0x313   : > { %v5983_v13 = vpop.xlane.xlu1 %2190  ;;  %v5985_v54 = vpop.xlane.xlu0 %2199  ;;  %2889 = vperm.xlu0 %3655, %v2583_v24   ;;  %2824 = vperm.xlu1 %3656, %v2570_v20   ;;  %v2581_v32 = vsel %vm2325_vm9, 0.0, %v3792_v40  ;;  %v7401_v40 = vld [vmem:[#allocation188_spill] sm:$0xff]  ;;  %vm2323_vm9 = vcmp.eq.f32.partialorder %v5953_v45, -inf  ;;  %v7402_v43 = vld [vmem:[#allocation106_spill] sm:$0xff] }
 0x314   : > { %v2372_v23 = vsub.f32 %v7396_v29, %v5985_v54  ;;  %v2369_v22 = vsub.f32 %v7397_v34, %v5983_v13  ;;  %3805 = vpow2.f32 %v2509_v15 }
 0x315   : > { %v3794_v42 = vpop.eup %3793  ;;  %3807 = vpow2.f32 %v2503_v6 }
 0x316   : > { %v2477_v17 = vmul.f32 1.442695, %v2372_v23  ;;  %v2471_v18 = vmul.f32 1.442695, %v2369_v22  ;;  %v3796_v15 = vpop.eup %3795  ;;  %v2568_v29 = vsel %vm2312_vm4, 0.0, %v3794_v42  ;;  %vm2310_vm4 = vcmp.eq.f32.partialorder %v5965_v52, -inf }
 0x317   : > { %v5993_v9 = vpop.xlane.xlu1 %2232  ;;  %v5995_v24 = vpop.xlane.xlu0 %2241  ;;  %2809 = vperm.xlu0 %3655, %v2567_v2   ;;  %2894 = vperm.xlu1 %3656, %v2584_v27   ;;  %v2565_v42 = vsel %vm2309_vm7, 0.0, %v3796_v15  ;;  %v7403_v15 = vld [vmem:[#allocation90_spill] sm:$0xff]  ;;  %vm2307_vm7 = vcmp.eq.f32.partialorder %v5963_v10, -inf }
 0x318   : > { %v2386_v56 = vsub.f32 %v7398_v30, %v5995_v24  ;;  %v2383_v20 = vsub.f32 %v7399_v26, %v5993_v9  ;;  %3809 = vpow2.f32 %v2477_v17  ;;  %v7404_v52 = vld [vmem:[#allocation190_spill] sm:$0xff] }
 0x319   : > { %v3798_v6 = vpop.eup %3797  ;;  %3811 = vpow2.f32 %v2471_v18 }
 0x31a   : > { %v2505_v23 = vmul.f32 1.442695, %v2386_v56  ;;  %v2499_v22 = vmul.f32 1.442695, %v2383_v20  ;;  %v3800_v17 = vpop.eup %3799  ;;  %v2582_v30 = vsel %vm2326_vm3, 0.0, %v3798_v6  ;;  %vm2324_vm3 = vcmp.eq.f32.partialorder %v5975_v11, -inf }
 0x31b   : > { %v6003_v34 = vpop.xlane.xlu1 %2184  ;;  %v6005_v2 = vpop.xlane.xlu0 %2193  ;;  %2879 = vperm.xlu0 %3655, %v2581_v32   ;;  %2814 = vperm.xlu1 %3656, %v2568_v29   ;;  %v2579_v6 = vsel %vm2323_vm9, 0.0, %v3800_v17  ;;  %vm2321_vm9 = vcmp.eq.f32.partialorder %v5973_v49, -inf  ;;  %v6043_v11 = vld [vmem:[%s336_s19] sm:$0xf] }
 0x31c   : > { %v2370_v51 = vsub.f32 %v7400_v38, %v6005_v2  ;;  %v2367_v27 = vsub.f32 %v7401_v40, %v6003_v34  ;;  %3813 = vpow2.f32 %v2505_v23  ;;  %7406 = vst [vmem:[#allocation13_spill] sm:$0xff] %v6043_v11 }
 0x31d   : > { %v3802_v21 = vpop.eup %3801  ;;  %3815 = vpow2.f32 %v2499_v22 }
 0x31e   : > { %v2473_v56 = vmul.f32 1.442695, %v2370_v51  ;;  %v2467_v20 = vmul.f32 1.442695, %v2367_v27  ;;  %v3804_v23 = vpop.eup %3803  ;;  %v2566_v38 = vsel %vm2310_vm4, 0.0, %v3802_v21  ;;  %vm2308_vm4 = vcmp.eq.f32.partialorder %v5985_v54, -inf }
 0x31f   : > { %v6013_v26 = vpop.xlane.xlu1 %2226  ;;  %v6015_v32 = vpop.xlane.xlu0 %2235  ;;  %2799 = vperm.xlu0 %3655, %v2565_v42   ;;  %2884 = vperm.xlu1 %3656, %v2582_v30   ;;  %v7405_v30 = vld [vmem:[#allocation184_spill] sm:$0xff]  ;;  %v2563_v21 = vsel %vm2307_vm7, 0.0, %v3804_v23 }
 0x320   : > { %v2384_v18 = vsub.f32 %v7402_v43, %v6015_v32  ;;  %v2381_v29 = vsub.f32 %v7403_v15, %v6013_v26  ;;  %3817 = vpow2.f32 %v2473_v56 }
 0x321   : > { %v3806_v45 = vpop.eup %3805  ;;  %3819 = vpow2.f32 %v2467_v20 }
 0x322   : > { %v2501_v51 = vmul.f32 1.442695, %v2384_v18  ;;  %v3808_v27 = vpop.eup %3807  ;;  %v2495_v17 = vmul.f32 1.442695, %v2381_v29  ;;  %v2580_v43 = vsel %vm2324_vm3, 0.0, %v3806_v45  ;;  %v7407_v29 = vld [vmem:[#allocation96_spill] sm:$0xff] }
 0x323   : > { %v6023_v40 = vpop.xlane.xlu1 %2178  ;;  %v6025_v42 = vpop.xlane.xlu0 %2187  ;;  %2869 = vperm.xlu0 %3655, %v2579_v6   ;;  %2804 = vperm.xlu1 %3656, %v2566_v38   ;;  %v2577_v20 = vsel %vm2321_vm9, 0.0, %v3808_v27  ;;  %v7408_v38 = vsub.s32 1, %v7262_v12  ;;  %v7409_v45 = vld [vmem:[#allocation80_spill] sm:$0xff]  ;;  %vm2305_vm9 = vcmp.eq.f32.partialorder %v5983_v13, -inf }
 0x324   : > { %v2368_v22 = vsub.f32 %v7404_v52, %v6025_v42  ;;  %v2365_v56 = vsub.f32 %v7405_v30, %v6023_v40  ;;  %3821 = vpow2.f32 %v2501_v51  ;;  %vm2301_vm6 = vcmp.eq.f32.partialorder %v6023_v40, -inf  ;;  %v3843_v40 = vld [vmem:[%s6767_s4] sm:$0x3] }
 0x325   : > { %v3810_v10 = vpop.eup %3809  ;;  %v749_v51 = vrot.slane %v6043_v11, %v7408_v38  ;;  %3823 = vpow2.f32 %v2495_v17  ;;  %v7410_v17 = vld [vmem:[#allocation186_spill] sm:$0xff] }
 0x326   : > { %v2469_v18 = vmul.f32 1.442695, %v2368_v22  ;;  %v2463_v49 = vmul.f32 1.442695, %v2365_v56  ;;  %v3812_v22 = vpop.eup %3811  ;;  %v2564_v30 = vsel %vm2308_vm4, 0.0, %v3810_v10  ;;  %vm2322_vm4 = vcmp.eq.f32.partialorder %v5995_v24, -inf }
 0x327   : > { %v6033_v15 = vpop.xlane.xlu1 %2220  ;;  %v6035_v6 = vpop.xlane.xlu0 %2229  ;;  %2789 = vperm.xlu0 %3655, %v2563_v21   ;;  %2874 = vperm.xlu1 %3656, %v2580_v43   ;;  %vm759_vm7 = vcmp.eq.s32.totalorder %v749_v51, %v7262_v12  ;;  %v7411_v10 = vld [vmem:[#allocation180_spill] sm:$0xff]  ;;  %v2561_v51 = vsel %vm2305_vm9, 0.0, %v3812_v22  ;;  %vm2303_vm9 = vcmp.eq.f32.partialorder %v6003_v34, -inf }
 0x328   : > { %v2382_v23 = vsub.f32 %v7407_v29, %v6035_v6  ;;  %v2379_v52 = vsub.f32 %v7409_v45, %v6033_v15  ;;  %3825 = vpow2.f32 %v2469_v18  ;;  %vm3545_vm3 = vmpackc.low %vm759_vm7, %vm759_vm7  ;;  %v6983_v29 = vmov 1.0|1.0  }
 0x329   : > { %v3814_v54 = vpop.eup %3813  ;;  %3546 = vmatprep.mubr.msk.bf16.mxu1 %vm3545_vm3, %v6983_v29  ;;  %3827 = vpow2.f32 %v2463_v49  ;;  %vm2319_vm7 = vcmp.eq.f32.partialorder %v5993_v9, -inf  ;;  %vm2306_vm3 = vcmp.eq.f32.partialorder %v6005_v2, -inf }
 0x32a   : > { %v2497_v21 = vmul.f32 1.442695, %v2382_v23  ;;  %v2491_v18 = vmul.f32 1.442695, %v2379_v52  ;;  %v3816_v38 = vpop.eup %3815 }
 0x32b   : > { %v6053_v43 = vpop.xlane.xlu1 %2172  ;;  %v6055_v27 = vpop.xlane.xlu0 %2181  ;;  %2859 = vperm.xlu0 %3655, %v2577_v20   ;;  %2794 = vperm.xlu1 %3656, %v2564_v30   ;;  %v2578_v20 = vsel %vm2322_vm4, 0.0, %v3814_v54  ;;  %v2575_v52 = vsel %vm2319_vm7, 0.0, %v3816_v38  ;;  %vm2320_vm4 = vcmp.eq.f32.partialorder %v6015_v32, -inf  ;;  %vm2317_vm7 = vcmp.eq.f32.partialorder %v6013_v26, -inf }
 0x32c   : > { %v2366_v56 = vsub.f32 %v7410_v17, %v6055_v27  ;;  %v2363_v23 = vsub.f32 %v7411_v10, %v6053_v43  ;;  %3829 = vpow2.f32 %v2497_v21  ;;  %v7412_v17 = vld [vmem:[#allocation85_spill] sm:$0xff]  ;;  %v7413_v10 = vld [vmem:[#allocation182_spill] sm:$0xff]  ;;  %vm2302_vm15 = vcmp.eq.f32.partialorder %v6055_v27, -inf  ;;  %v7416_v27 = vld [vmem:[#allocation176_spill] sm:$0xff] }
 0x32d   : > { %v3818_v13 = vpop.eup %3817  ;;  %3831 = vpow2.f32 %v2491_v18 }
 0x32e   : > { %v2465_v45 = vmul.f32 1.442695, %v2366_v56  ;;  %v2459_v24 = vmul.f32 1.442695, %v2363_v23  ;;  %v3820_v49 = vpop.eup %3819  ;;  %v2562_v22 = vsel %vm2306_vm3, 0.0, %v3818_v13  ;;  %vm2304_vm3 = vcmp.eq.f32.partialorder %v6025_v42, -inf }
 0x32f   : > { %v6065_v30 = vpop.xlane.xlu0 %2223  ;;  %2779 = vperm.xlu0 %3655, %v2561_v51   ;;  %2864 = vperm.xlu1 %3656, %v2578_v20   ;;  %v2559_v2 = vsel %vm2303_vm9, 0.0, %v3820_v49  ;;  %vm2318_vm9 = vcmp.eq.f32.partialorder %v6035_v6, -inf  ;;  %v6084_v6 = vrot.slane %v3843_v40, %v5442_v25 }
 0x330   : > { %v2380_v29 = vsub.f32 %v7412_v17, %v6065_v30  ;;  %3833 = vpow2.f32 %v2465_v45 }
 0x331   : > { %v3822_v56 = vpop.eup %3821  ;;  %3835 = vpow2.f32 %v2459_v24 }
 0x332   : > { %v2493_v21 = vmul.f32 1.442695, %v2380_v29  ;;  %v3824_v9 = vpop.eup %3823  ;;  %v2576_v18 = vsel %vm2320_vm4, 0.0, %v3822_v56  ;;  %vm2315_vm4 = vcmp.eq.f32.partialorder %v6033_v15, -inf  ;;  %v1251_v56 = vadd.f32 %v7416_v27, %v6084_v6 }
 0x333   : > { %v2176_v54 = vpop.xlane.xlu0 %2175  ;;  %2849 = vperm.xlu0 %3655, %v2575_v52   ;;  %2784 = vperm.xlu1 %3656, %v2562_v22   ;;  %v2573_v20 = vsel %vm2317_vm7, 0.0, %v3824_v9 }
 0x334   : > { %v2364_v51 = vsub.f32 %v7413_v10, %v2176_v54  ;;  %3837 = vpow2.f32 %v2493_v21  ;;  %v7415_v21 = vld [vmem:[#allocation172_spill] sm:$0xff]  ;;  %vm2300_vm7 = vcmp.eq.f32.partialorder %v2176_v54, -inf }
 0x335   : > { %v3826_v38 = vpop.eup %3825  ;;  %v1247_v15 = vadd.f32 %v7415_v21, %v6084_v6 }
 0x336   : > { %v2461_v23 = vmul.f32 1.442695, %v2364_v51  ;;  %v3828_v29 = vpop.eup %3827  ;;  %v2560_v45 = vsel %vm2304_vm3, 0.0, %v3826_v38  ;;  %vm3110_vm3 = vcmp.eq.s32.totalorder %v7262_v12, %v4978_v19 }
 0x337   : > { %2769 = vperm.xlu0 %3655, %v2559_v2   ;;  %2854 = vperm.xlu1 %3656, %v2576_v18   ;;  %v2557_v13 = vsel %vm2301_vm6, 0.0, %v3828_v29  ;;  %vm2299_vm6 = vcmp.eq.f32.partialorder %v6053_v43, -inf  ;;  %v2003_v43 = vmul.f32 1.442695, %v5536_v31 }
 0x338   : > { %3839 = vpow2.f32 %v2461_v23 }
 0x339   : > { %v3830_v34 = vpop.eup %3829  ;;  %3841 = vpow2.f32 %v2003_v43 }
 0x33a   : > { %v3832_v32 = vpop.eup %3831  ;;  %v2574_v17 = vsel %vm2318_vm9, 0.0, %v3830_v34  ;;  %v7419_v34 = vld [vmem:[#allocation99_spill] sm:$0xff]  ;;  %vm7007_vm9 = vcmask 36864  }
 0x33b   : > { %2839 = vperm.xlu0 %3655, %v2573_v20   ;;  %2774 = vperm.xlu1 %3656, %v2560_v45   ;;  %v2571_v42 = vsel %vm2315_vm4, 0.0, %v3832_v32  ;;  %v1171_v32 = vadd.f32 %v7419_v34, %v6084_v6  ;;  %v7428_v34 = vld [vmem:[#allocation162_spill] sm:$0xff]  ;;  %vm7456_vm4 = vcmp.eq.s32.totalorder %v4195_v50, %v4978_v19  ;;  %v7460_v50 = vld [vmem:[#allocation157_spill] sm:$0xff] }
 0x33d   : > { %v3834_v24 = vpop.eup %3833 }
 0x33e   : > { %v3836_v26 = vpop.eup %3835  ;;  %v2558_v49 = vsel %vm2302_vm15, 0.0, %v3834_v24  ;;  %vm2316_vm15 = vcmp.eq.f32.partialorder %v6065_v30, -inf  ;;  %v7418_v30 = vld [vmem:[#allocation94_spill] sm:$0xff] }
 0x33f   : > { %2759 = vperm.xlu0 %3655, %v2557_v13   ;;  %2844 = vperm.xlu1 %3656, %v2574_v17   ;;  %v2555_v10 = vsel %vm2299_vm6, 0.0, %v3836_v26  ;;  %v1167_v45 = vadd.f32 %v7418_v30, %v6084_v6  ;;  %v7421_v26 = vld [vmem:[#allocation166_spill] sm:$0xff]  ;;  %vm7458_vm6 = vcmp.eq.s32.totalorder %v7290_v55, %v4978_v19 }
 0x340   : > { %v1237_v31 = vadd.f32 %v7421_v26, %v6084_v6  ;;  %v7427_v30 = vld [vmem:[#allocation158_spill] sm:$0xff] }
 0x341   : > { %v3838_v52 = vpop.eup %3837 }
 0x342   : > { %v6086_v22 = vpop.permute.xlu1 %2739  ;;  %v2572_v51 = vsel %vm2316_vm15, 0.0, %v3838_v52  ;;  %vm7459_vm15 = vcmp.eq.s32.totalorder %v7297_v5, %v4978_v19 }
 0x343   : > { %2829 = vperm.xlu0 %3655, %v2571_v42   ;;  %2764 = vperm.xlu1 %3656, %v2558_v49   ;;  %7414 = vst [vmem:[#allocation191_spill] sm:$0xff] %v6086_v22  ;;  %v3141_v18 = vmul.f32 %v6086_v22, %v1247_v15  ;;  %v7422_v42 = vld [vmem:[#allocation169_spill] sm:$0xff] }
 0x344   : > { %v1241_v49 = vadd.f32 %v7422_v42, %v6084_v6 }
 0x345   : > { %v3840_v2 = vpop.eup %3839 }
 0x346   : > { %v6094_v9 = vpop.permute.xlu0 %2744  ;;  %v2556_v29 = vsel %vm2300_vm7, 0.0, %v3840_v2 }
 0x347   : > { %7417 = vst [vmem:[#allocation192_spill] sm:$0xff] %v6094_v9  ;;  %v3142_v23 = vmul.f32 %v6094_v9, %v1251_v56  ;;  %2749 = vperm.xlu0 %3655, %v2555_v10   ;;  %2834 = vperm.xlu1 %3656, %v2572_v51   ;;  %v7424_v56 = vld [vmem:[#allocation83_spill] sm:$0xff]  ;;  %v7425_v51 = vld [vmem:[#allocation89_spill] sm:$0xff] }
 0x348   : > { %v1157_v10 = vadd.f32 %v7424_v56, %v6084_v6  ;;  %v1161_v2 = vadd.f32 %v7425_v51, %v6084_v6 }
 0x349   : > { %v3190_v38 = vpack.c.bf16 %v3142_v23, %v3141_v18 }
 0x34a   : > { %v6098_v20 = vpop.permute.xlu1 %2659 }
 0x34b   : > { %2754 = vperm.xlu1 %3656, %v2556_v29   ;;  %3562 = vmatprep.subr.bf16.mxu1 %v3190_v38  ;;  %v3125_v54 = vmul.f32 %v6098_v20, %v1167_v45  ;;  %v1227_v45 = vadd.f32 %v7427_v30, %v6084_v6  ;;  %v7434_v30 = vld [vmem:[#allocation147_spill] sm:$0xff] }
 0x34e   : > { %v6105_v13 = vpop.permute.xlu1 %2664  ;;  %v6107_v17 = vpop.permute.xlu0 %2729 }
 0x34f   : > { %7420 = vst [vmem:[#allocation201_spill] sm:$0xff] %v6107_v17  ;;  %v3126_v24 = vmul.f32 %v6105_v13, %v1171_v32  ;;  %v3139_v15 = vmul.f32 %v6107_v17, %v1237_v31  ;;  %v1231_v32 = vadd.f32 %v7428_v34, %v6084_v6  ;;  %v6139_v31 = vpop.eup %3841  ;;  %v7435_v34 = vld [vmem:[#allocation153_spill] sm:$0xff] }
 0x350   : > { %7430 = vst [vmem:[#allocation195_spill] sm:$0xff] %v6139_v31 }
 0x351   : > { %v3182_v52 = vpack.c.bf16 %v3126_v24, %v3125_v54 }
 0x352   : > { %v6115_v40 = vpop.permute.xlu1 %2734  ;;  %v6117_v21 = vpop.permute.xlu0 %2649 }
 0x353   : > { %7423 = vst [vmem:[#allocation193_spill] sm:$0xff] %v6115_v40  ;;  %v3140_v27 = vmul.f32 %v6115_v40, %v1241_v49  ;;  %3563 = vmatpush3.bf16.msra.mxu1 %v3182_v52  ;;  %v3123_v29 = vmul.f32 %v6117_v21, %v1157_v10  ;;  %v7431_v52 = vld [vmem:[#allocation73_spill] sm:$0xff] }
 0x355   : > { %v3189_v18 = vpack.c.bf16 %v3140_v27, %v3139_v15  ;;  %v1147_v15 = vadd.f32 %v7431_v52, %v6084_v6  ;;  %v7432_v27 = vld [vmem:[#allocation78_spill] sm:$0xff] }
 0x356   : > { %v6125_v23 = vpop.permute.xlu1 %2654  ;;  %v6127_v38 = vpop.permute.xlu0 %2719  ;;  %v1151_v56 = vadd.f32 %v7432_v27, %v6084_v6 }
 0x357   : > { %7426 = vst [vmem:[#allocation202_spill] sm:$0xff] %v6127_v38  ;;  %v3124_v43 = vmul.f32 %v6125_v23, %v1161_v2  ;;  %3564 = vmatprep.subr.bf16.mxu1 %v3189_v18  ;;  %v3137_v42 = vmul.f32 %v6127_v38, %v1227_v45  ;;  %v3304_v18 = vrot.slane %v6139_v31, %v5442_v25 }
 0x358   : > { %v1217_v45 = vadd.f32 %v7434_v30, %v6084_v6  ;;  %v7438_v30 = vld [vmem:[#allocation67_spill] sm:$0xff] }
 0x359   : > { %v3181_v54 = vpack.c.bf16 %v3124_v43, %v3123_v29  ;;  %v3306_v52 = vsel %vm3110_vm3, %v3304_v18, 0.0 }
 0x35a   : > { %v6135_v24 = vpop.permute.xlu1 %2724  ;;  %v6137_v26 = vpop.permute.xlu0 %2639 }
 0x35b   : > { %7429 = vst [vmem:[#allocation194_spill] sm:$0xff] %v6135_v24  ;;  %v3138_v49 = vmul.f32 %v6135_v24, %v1231_v32  ;;  %3565 = vmatpush3.bf16.msra.mxu1 %v3181_v54  ;;  %v3121_v29 = vmul.f32 %v6137_v26, %v1147_v15  ;;  %v1221_v32 = vadd.f32 %v7435_v34, %v6084_v6  ;;  %v3308_v34 = vsel %vm7007_vm9, %v3306_v52, 0.0 }
 0x35d   : > { %v3188_v10 = vpack.c.bf16 %v3138_v49, %v3137_v42 }
 0x35e   : > { %v6147_v51 = vpop.permute.xlu1 %2644  ;;  %v6149_v2 = vpop.permute.xlu0 %2709 }
 0x35f   : > { %7433 = vst [vmem:[#allocation196_spill] sm:$0xff] %v6149_v2  ;;  %v3122_v43 = vmul.f32 %v6147_v51, %v1151_v56  ;;  %3566 = vmatprep.subr.bf16.mxu1 %v3188_v10  ;;  %v3135_v15 = vmul.f32 %v6149_v2, %v1217_v45  ;;  %v7437_v56 = vld [vmem:[#allocation62_spill] sm:$0xff] }
 0x360   : > { %v1137_v10 = vadd.f32 %v7437_v56, %v6084_v6  ;;  %v7440_v56 = vld [vmem:[#allocation142_spill] sm:$0xff] }
 0x361   : > { %v3180_v54 = vpack.c.bf16 %v3122_v43, %v3121_v29  ;;  %v1141_v29 = vadd.f32 %v7438_v30, %v6084_v6  ;;  %v1211_v22 = vadd.f32 %v7440_v56, %v6084_v6 }
 0x362   : > { %v6161_v42 = vpop.permute.xlu1 %2714  ;;  %v6163_v49 = vpop.permute.xlu0 %2629 }
 0x363   : > { %7436 = vst [vmem:[#allocation21_spill] sm:$0xff] %v6161_v42  ;;  %v3136_v27 = vmul.f32 %v6161_v42, %v1221_v32  ;;  %3567 = vmatpush3.bf16.msra.mxu1 %v3180_v54  ;;  %v3119_v18 = vmul.f32 %v6163_v49, %v1137_v10  ;;  %v7439_v32 = vld [vmem:[#allocation137_spill] sm:$0xff]  ;;  %v7442_v10 = vld [vmem:[#allocation51_spill] sm:$0xff] }
 0x364   : > { %v1207_v54 = vadd.f32 %v7439_v32, %v6084_v6 }
 0x365   : > { %v3187_v43 = vpack.c.bf16 %v3136_v27, %v3135_v15 }
 0x366   : > { %v6175_v31 = vpop.permute.xlu1 %2634  ;;  %v6177_v9 = vpop.permute.xlu0 %2699  ;;  %3309 = vadd.xlane.f32.xlu0 %v3308_v34 }
 0x367   : > { %v3120_v45 = vmul.f32 %v6175_v31, %v1141_v29  ;;  %3568 = vmatprep.subr.bf16.mxu1 %v3187_v43  ;;  %v3133_v27 = vmul.f32 %v6177_v9, %v1207_v54  ;;  %v1127_v29 = vadd.f32 %v7442_v10, %v6084_v6  ;;  %v7443_v43 = vld [vmem:[#allocation57_spill] sm:$0xff]  ;;  %v7444_v54 = vld [vmem:[#allocation126_spill] sm:$0xff] }
 0x368   : > { %v1131_v53 = vadd.f32 %v7443_v43, %v6084_v6 }
 0x369   : > { %v3179_v30 = vpack.c.bf16 %v3120_v45, %v3119_v18 }
 0x36a   : > { %v6185_v15 = vpop.permute.xlu1 %2704  ;;  %v6187_v52 = vpop.permute.xlu0 %2619 }
 0x36b   : > { %7441 = vst [vmem:[#allocation19_spill] sm:$0xff] %v6185_v15  ;;  %v3134_v34 = vmul.f32 %v6185_v15, %v1211_v22  ;;  %3569 = vmatpush3.bf16.msra.mxu1 %v3179_v30  ;;  %v3117_v18 = vmul.f32 %v6187_v52, %v1127_v29  ;;  %v1197_v22 = vadd.f32 %v7444_v54, %v6084_v6  ;;  %v7445_v30 = vld [vmem:[#allocation131_spill] sm:$0xff]  ;;  %v7446_v29 = vld [vmem:[#allocation41_spill] sm:$0xff] }
 0x36c   : > { %v1201_v7 = vadd.f32 %v7445_v30, %v6084_v6  ;;  %v1117_v36 = vadd.f32 %v7446_v29, %v6084_v6 }
 0x36d   : > { %v3186_v32 = vpack.c.bf16 %v3134_v34, %v3133_v27 }
 0x36e   : > { %v6195_v40 = vpop.permute.xlu1 %2624  ;;  %v6197_v56 = vpop.permute.xlu0 %2689 }
 0x36f   : > { %v3118_v45 = vmul.f32 %v6195_v40, %v1131_v53  ;;  %3570 = vmatprep.subr.bf16.mxu1 %v3186_v32  ;;  %v3131_v27 = vmul.f32 %v6197_v56, %v1197_v22  ;;  %v7447_v53 = vld [vmem:[#allocation46_spill] sm:$0xff]  ;;  %v7448_v22 = vld [vmem:[#allocation115_spill] sm:$0xff] }
 0x370   : > { %v1121_v32 = vadd.f32 %v7447_v53, %v6084_v6  ;;  %v1187_v30 = vadd.f32 %v7448_v22, %v6084_v6 }
 0x371   : > { %v3178_v10 = vpack.c.bf16 %v3118_v45, %v3117_v18 }
 0x372   : > { %v6205_v17 = vpop.permute.xlu1 %2694  ;;  %v2610_v43 = vpop.permute.xlu0 %2609 }
 0x373   : > { %v3132_v34 = vmul.f32 %v6205_v17, %v1201_v7  ;;  %3571 = vmatpush3.bf16.msra.mxu1 %v3178_v10  ;;  %v3115_v18 = vmul.f32 %v2610_v43, %v1117_v36  ;;  %v7449_v7 = vld [vmem:[#allocation121_spill] sm:$0xff]  ;;  %v7450_v36 = vld [vmem:[#allocation30_spill] sm:$0xff] }
 0x374   : > { %v1191_v10 = vadd.f32 %v7449_v7, %v6084_v6  ;;  %v1107_v53 = vadd.f32 %v7450_v36, %v6084_v6 }
 0x375   : > { %v3185_v24 = vpack.c.bf16 %v3132_v34, %v3131_v27 }
 0x376   : > { %v6213_v54 = vpop.permute.xlu1 %2614  ;;  %v6215_v33 = vpop.permute.xlu0 %2679 }
 0x377   : > { %v3116_v45 = vmul.f32 %v6213_v54, %v1121_v32  ;;  %3572 = vmatprep.subr.bf16.mxu1 %v3185_v24  ;;  %v3129_v27 = vmul.f32 %v6215_v33, %v1187_v30  ;;  %v7451_v24 = vld [vmem:[#allocation35_spill] sm:$0xff]  ;;  %v7453_v30 = vld [vmem:[#allocation110_spill] sm:$0xff] }
 0x378   : > { %v1111_v32 = vadd.f32 %v7451_v24, %v6084_v6  ;;  %v745_v24 = vrot.slane %v6043_v11, %v5442_v25 }
 0x379   : > { %v3177_v38 = vpack.c.bf16 %v3116_v45, %v3115_v18  ;;  %v7452_v45 = vld [vmem:[#allocation105_spill] sm:$0xff] }
 0x37a   : > { %v6222_v29 = vpop.permute.xlu1 %2684  ;;  %v2600_v4 = vpop.permute.xlu0 %2599  ;;  %v1177_v2 = vadd.f32 %v7452_v45, %v6084_v6  ;;  %vm6266_vm7 = vcmp.eq.s32.totalorder %v745_v24, %v7262_v12 }
 0x37b   : > { %v3130_v34 = vmul.f32 %v6222_v29, %v1191_v10  ;;  %3573 = vmatpush3.bf16.msra.mxu1 %v3177_v38  ;;  %v3113_v7 = vmul.f32 %v2600_v4, %v1107_v53  ;;  %v1181_v10 = vadd.f32 %v7453_v30, %v6084_v6  ;;  %v7454_v53 = vld [vmem:[#allocation20_spill] sm:$0xff]  ;;  %v757_v30 = vrot.slane %v6043_v11, %v756_v35 }
 0x37c   : > { %v1411_v35 = vadd.f32 %v7460_v50, %v6084_v6  ;;  %v7468_v50 = vmov 1.0|1.0  }
 0x37d   : > { %v3184_v42 = vpack.c.bf16 %v3130_v34, %v3129_v27 }
 0x37e   : > { %v2605_v22 = vpop.permute.xlu1 %2604  ;;  %v6230_v48 = vpop.permute.xlu0 %2669 }
 0x37f   : > { %v3114_v18 = vmul.f32 %v2605_v22, %v1111_v32  ;;  %3574 = vmatprep.subr.bf16.mxu1 %v3184_v42  ;;  %v3127_v27 = vmul.f32 %v6230_v48, %v1177_v2  ;;  %v1097_v42 = vadd.f32 %v7454_v53, %v6084_v6  ;;  %v7455_v32 = vld [vmem:[#allocation25_spill] sm:$0xff]  ;;  %v7457_v2 = vld [vmem:[#allocation151_spill] sm:$0xff]  ;;  %v2909_v53 = vsel %vm7458_vm6, %v2600_v4, 0.0 }
 0x380   : > { %v1101_v45 = vadd.f32 %v7455_v32, %v6084_v6  ;;  %vm761_vm6 = vcmp.eq.s32.totalorder %v757_v30, %v7262_v12 }
 0x381   : > { %v3176_v38 = vpack.c.bf16 %v3114_v18, %v3113_v7  ;;  %vm3549_vm9 = vmpackc.low %vm761_vm6, %vm761_vm6  ;;  %vm7472_vm6 = vcmp.eq.s32.totalorder %v4212_v59, %v4978_v19  ;;  %v7474_v59 = vld [vmem:[#allocation55_spill] sm:$0xff] }
 0x382   : > { %v6237_v36 = vpop.permute.xlu1 %2674  ;;  %v2590_v15 = vpop.permute.xlu0 %2589 }
 0x383   : > { %v3128_v34 = vmul.f32 %v6237_v36, %v1181_v10  ;;  %3575 = vmatpush3.bf16.msra.mxu1 %v3176_v38  ;;  %v2907_v18 = vsel %vm7456_vm4, %v2590_v15, 0.0  ;;  %v1407_v10 = vadd.f32 %v7457_v2, %v6084_v6  ;;  %v3111_v25 = vmul.f32 %v2590_v15, %v1097_v42 }
 0x384   : > { %v2971_v32 = vsel %vm1865_vm5, %v2907_v18, 0.0  ;;  %vm7463_vm4 = vcmp.eq.s32.totalorder %v7284_v37, %v4978_v19  ;;  %v2974_v15 = vsel %vm1865_vm5, %v2909_v53, 0.0 }
 0x385   : > { %v3183_v7 = vpack.c.bf16 %v3128_v34, %v3127_v27  ;;  %v2910_v4 = vsel %vm7463_vm4, %v2605_v22, 0.0  ;;  %vm3547_vm4 = vmpackc.low %vm6266_vm7, %vm6266_vm7  ;;  %vm7469_vm7 = vcmp.eq.s32.totalorder %v4210_v58, %v4978_v19  ;;  %v2914_v58 = vsel %vm7472_vm6, %v6195_v40, 0.0 }
 0x386   : > { %v2595_v38 = vpop.permute.xlu1 %2594  ;;  %v6253_v28 = vpop.permute.xlu0 %2899  ;;  %v2976_v30 = vsel %vm1865_vm5, %v2910_v4, 0.0  ;;  %v1317_v40 = vadd.f32 %v7474_v59, %v6084_v6  ;;  %vm7481_vm6 = vcmp.eq.s32.totalorder %v4222_v3, %v4978_v19 }
 0x387   : > { %v2908_v27 = vsel %vm7459_vm15, %v2595_v38, 0.0  ;;  %v3112_v34 = vmul.f32 %v2595_v38, %v1101_v45  ;;  %3576 = vmatprep.subr.bf16.mxu1 %v3183_v7  ;;  %vm7464_vm15 = vcmp.eq.s32.totalorder %v7282_v47, %v4978_v19  ;;  %v3173_v18 = vmul.f32 %v6253_v28, %v1407_v10  ;;  %v7466_v38 = vld [vmem:[#allocation71_spill] sm:$0xff] }
 0x388   : > { %v2972_v2 = vsel %vm1865_vm5, %v2908_v27, 0.0  ;;  %v2911_v24 = vsel %vm7464_vm15, %v2610_v43, 0.0  ;;  %v1331_v47 = vadd.f32 %v7466_v38, %v6084_v6  ;;  %vm7467_vm15 = vcmp.eq.s32.totalorder %v4208_v57, %v4978_v19 }
 0x389   : > { %v2973_v55 = vadd.f32 %v2972_v2, %v2971_v32  ;;  %v3175_v5 = vpack.c.bf16 %v3112_v34, %v3111_v25  ;;  %v7465_v25 = vld [vmem:[#allocation66_spill] sm:$0xff]  ;;  %v2912_v43 = vsel %vm7467_vm15, %v6213_v54, 0.0  ;;  %v2978_v11 = vsel %vm1865_vm5, %v2911_v24, 0.0  ;;  %v7470_v54 = vld [vmem:[#allocation141_spill] sm:$0xff] }
 0x38a   : > { %v6275_v42 = vpop.permute.xlu1 %2904  ;;  %v6277_v45 = vpop.permute.xlu0 %2819  ;;  %v1327_v22 = vadd.f32 %v7465_v25, %v6084_v6  ;;  %v1397_v4 = vadd.f32 %v7470_v54, %v6084_v6  ;;  %vm7477_vm15 = vcmp.eq.s32.totalorder %v4218_v62, %v4978_v19 }
 0x38b   : > { %v2975_v7 = vadd.f32 %v2974_v15, %v2973_v55  ;;  %v3174_v37 = vmul.f32 %v6275_v42, %v1411_v35  ;;  %3577 = vmatpush3.bf16.msra.mxu1 %v3175_v5  ;;  %v2913_v35 = vsel %vm7469_vm7, %v6187_v52, 0.0  ;;  %v2980_v55 = vsel %vm1865_vm5, %v2912_v43, 0.0  ;;  %v7471_v5 = vld [vmem:[#allocation146_spill] sm:$0xff]  ;;  %v7475_v43 = vld [vmem:[#allocation61_spill] sm:$0xff] }
 0x38c   : > { %v3157_v2 = vmul.f32 %v6277_v45, %v1327_v22  ;;  %v1401_v15 = vadd.f32 %v7471_v5, %v6084_v6  ;;  %v7479_v5 = vld [vmem:[#allocation135_spill] sm:$0xff]  ;;  %vm7480_vm7 = vcmp.eq.s32.totalorder %v4220_v63, %v4978_v19  ;;  %v7482_v63 = vld [vmem:[#allocation45_spill] sm:$0xff] }
 0x38d   : > { %v2977_v10 = vadd.f32 %v2976_v30, %v2975_v7  ;;  %v3206_v53 = vpack.c.bf16 %v3174_v37, %v3173_v18  ;;  %v2982_v7 = vsel %vm1865_vm5, %v2913_v35, 0.0  ;;  %v2918_v62 = vsel %vm7480_vm7, %v6147_v51, 0.0 }
 0x38e   : > { %v6297_v27 = vpop.permute.xlu1 %2824  ;;  %v6299_v34 = vpop.permute.xlu0 %2889  ;;  %3548 = vmatmul.mubr.msk.bf16.vlgmr.msra.gmra.mxu1 %vm3547_vm4, %v7468_v50  ;;  %vm7476_vm4 = vcmp.eq.s32.totalorder %v4216_v61, %v4978_v19  ;;  %v7478_v61 = vld [vmem:[#allocation130_spill] sm:$0xff]  ;;  %v1307_v51 = vadd.f32 %v7482_v63, %v6084_v6  ;;  %v2992_v59 = vsel %vm1865_vm5, %v2918_v62, 0.0  ;;  %vm7489_vm7 = vcmp.eq.s32.totalorder %v7293_v39, %v4978_v19 }
 0x38f   : > { %v2979_v32 = vadd.f32 %v2978_v11, %v2977_v10  ;;  %v3158_v57 = vmul.f32 %v6297_v27, %v1331_v47  ;;  %3584 = vmatprep.subr.bf16.mxu1 %v3206_v53  ;;  %3550 = vmatprep.mubr.msk.bf16.mxu1 %vm3549_vm9, %v7468_v50  ;;  %vm7473_vm9 = vcmp.eq.s32.totalorder %v4214_v60, %v4978_v19  ;;  %v2984_v47 = vsel %vm1865_vm5, %v2914_v58, 0.0 }
 0x390   : > { %v2915_v25 = vsel %vm7473_vm9, %v6163_v49, 0.0  ;;  %v3171_v30 = vmul.f32 %v6299_v34, %v1397_v4  ;;  %v1321_v10 = vadd.f32 %v7475_v43, %v6084_v6  ;;  %v2916_v60 = vsel %vm7476_vm4, %v6175_v31, 0.0 }
 0x391   : > { %v2981_v52 = vadd.f32 %v2980_v55, %v2979_v32  ;;  %v3198_v24 = vpack.c.bf16 %v3158_v57, %v3157_v2  ;;  %v2986_v11 = vsel %vm1865_vm5, %v2915_v25, 0.0  ;;  %v2917_v2 = vsel %vm7477_vm15, %v6137_v26, 0.0 }
 0x392   : > { %v6319_v18 = vpop.permute.xlu1 %2894  ;;  %v6321_v37 = vpop.permute.xlu0 %2809  ;;  %v1387_v31 = vadd.f32 %v7478_v61, %v6084_v6  ;;  %v2988_v55 = vsel %vm1865_vm5, %v2916_v60, 0.0  ;;  %v2919_v25 = vsel %vm7481_vm6, %v6117_v21, 0.0  ;;  %vm7484_vm9 = vcmp.eq.s32.totalorder %v4224_v0, %v4978_v19  ;;  %v7486_v0 = vld [vmem:[#allocation119_spill] sm:$0xff] }
 0x393   : > { %v2983_v22 = vadd.f32 %v2982_v7, %v2981_v52  ;;  %v3172_v38 = vmul.f32 %v6319_v18, %v1401_v15  ;;  %3585 = vmatpush3.bf16.msra.mxu1 %v3198_v24  ;;  %v3155_v54 = vmul.f32 %v6321_v37, %v1317_v40  ;;  %v1391_v15 = vadd.f32 %v7479_v5, %v6084_v6  ;;  %v7483_v40 = vld [vmem:[#allocation50_spill] sm:$0xff] }
 0x394   : > { %v2990_v52 = vsel %vm1865_vm5, %v2917_v2, 0.0  ;;  %v2920_v3 = vsel %vm7484_vm9, %v6125_v23, 0.0  ;;  %vm7485_vm4 = vcmp.eq.s32.totalorder %v4226_v1, %v4978_v19  ;;  %v1377_v23 = vadd.f32 %v7486_v0, %v6084_v6 }
 0x395   : > { %v2985_v49 = vadd.f32 %v2984_v47, %v2983_v22  ;;  %v3205_v53 = vpack.c.bf16 %v3172_v38, %v3171_v30  ;;  %v1311_v47 = vadd.f32 %v7483_v40, %v6084_v6  ;;  %vm7488_vm15 = vcmp.eq.s32.totalorder %v7209_v41, %v4978_v19  ;;  %v7490_v41 = vld [vmem:[#allocation34_spill] sm:$0xff] }
 0x396   : > { %v6339_v35 = vpop.permute.xlu1 %2814  ;;  %v6341_v32 = vpop.permute.xlu0 %2879  ;;  %v2922_v1 = vsel %vm7488_vm15, %v6105_v13, 0.0  ;;  %v2923_v62 = vsel %vm7489_vm7, %v6230_v48, 0.0  ;;  %v1297_v13 = vadd.f32 %v7490_v41, %v6084_v6  ;;  %vm7492_vm6 = vcmp.eq.s32.totalorder %v7288_v14, %v4978_v19 }
 0x397   : > { %v2987_v57 = vadd.f32 %v2986_v11, %v2985_v49  ;;  %v3156_v4 = vmul.f32 %v6339_v35, %v1321_v10  ;;  %3586 = vmatprep.subr.bf16.mxu1 %v3205_v53  ;;  %v3169_v30 = vmul.f32 %v6341_v32, %v1387_v31  ;;  %v2994_v10 = vsel %vm1865_vm5, %v2919_v25, 0.0 }
 0x398   : > { %v2921_v53 = vsel %vm7485_vm4, %v6098_v20, 0.0  ;;  %v3000_v25 = vsel %vm1865_vm5, %v2922_v1, 0.0  ;;  %v2924_v39 = vsel %vm7492_vm6, %v6237_v36, 0.0  ;;  %v3002_v63 = vsel %vm1865_vm5, %v2923_v62, 0.0  ;;  %v7499_v1 = vld [vmem:[#allocation29_spill] sm:$0xff] }
 0x399   : > { %v2989_v26 = vadd.f32 %v2988_v55, %v2987_v57  ;;  %v3197_v58 = vpack.c.bf16 %v3156_v4, %v3155_v54  ;;  %v2996_v54 = vsel %vm1865_vm5, %v2920_v3, 0.0  ;;  %v7487_v4 = vld [vmem:[#allocation125_spill] sm:$0xff]  ;;  %v2998_v55 = vsel %vm1865_vm5, %v2921_v53, 0.0 }
 0x39a   : > { %v6359_v24 = vpop.permute.xlu1 %2884  ;;  %v6361_v7 = vpop.permute.xlu0 %2799  ;;  %v1381_v61 = vadd.f32 %v7487_v4, %v6084_v6  ;;  %vm7493_vm9 = vcmp.eq.s32.totalorder %v7286_v46, %v4978_v19  ;;  %v3004_v36 = vsel %vm1865_vm5, %v2924_v39, 0.0  ;;  %vm7496_vm4 = vcmp.eq.s32.totalorder %v7280_v16, %v4978_v19  ;;  %v7498_v16 = vld [vmem:[#allocation22_spill] sm:$0xff] }
 0x39b   : > { %v2991_v22 = vadd.f32 %v2990_v52, %v2989_v26  ;;  %v3170_v38 = vmul.f32 %v6359_v24, %v1391_v15  ;;  %3587 = vmatpush3.bf16.msra.mxu1 %v3197_v58  ;;  %v3153_v2 = vmul.f32 %v6361_v7, %v1307_v51  ;;  %v2925_v14 = vsel %vm7493_vm9, %v6215_v33, 0.0 }
 0x39c   : > { %v3006_v33 = vsel %vm1865_vm5, %v2925_v14, 0.0  ;;  %vm7497_vm15 = vcmp.eq.s32.totalorder %v7229_v8, %v4978_v19  ;;  %vm7500_vm7 = vcmp.eq.s32.totalorder %v7228_v44, %v4978_v19  ;;  %v7503_v44 = vld [vmem:[#allocation98_spill] sm:$0xff] }
 0x39d   : > { %v2993_v21 = vadd.f32 %v2992_v59, %v2991_v22  ;;  %v3204_v43 = vpack.c.bf16 %v3170_v38, %v3169_v30  ;;  %v7491_v22 = vld [vmem:[#allocation39_spill] sm:$0xff]  ;;  %v2927_v4 = vsel %vm7497_vm15, %v6197_v56, 0.0  ;;  %v2928_v62 = vsel %vm7500_vm7, %v6205_v17, 0.0 }
 0x39e   : > { %v6379_v60 = vpop.permute.xlu1 %2804  ;;  %v6381_v49 = vpop.permute.xlu0 %2869  ;;  %v1301_v30 = vadd.f32 %v7491_v22, %v6084_v6  ;;  %v3010_v56 = vsel %vm1865_vm5, %v2927_v4, 0.0  ;;  %v1357_v17 = vadd.f32 %v7503_v44, %v6084_v6 }
 0x39f   : > { %v2995_v11 = vadd.f32 %v2994_v10, %v2993_v21  ;;  %v3154_v57 = vmul.f32 %v6379_v60, %v1311_v47  ;;  %3588 = vmatprep.subr.bf16.mxu1 %v3204_v43  ;;  %v3167_v58 = vmul.f32 %v6381_v49, %v1377_v23  ;;  %v7494_v21 = vld [vmem:[#allocation109_spill] sm:$0xff]  ;;  %v7495_v10 = vld [vmem:[#allocation114_spill] sm:$0xff] }
 0x3a0   : > { %v1367_v43 = vadd.f32 %v7494_v21, %v6084_v6  ;;  %v1371_v53 = vadd.f32 %v7495_v10, %v6084_v6  ;;  %v7507_v10 = vld [vmem:[#allocation196_spill] sm:$0xff] }
 0x3a1   : > { %v2997_v20 = vadd.f32 %v2996_v54, %v2995_v11  ;;  %v3196_v31 = vpack.c.bf16 %v3154_v57, %v3153_v2  ;;  %v2926_v57 = vsel %vm7496_vm4, %v6222_v29, 0.0  ;;  %v1287_v29 = vadd.f32 %v7498_v16, %v6084_v6  ;;  %v7511_v16 = vld [vmem:[#allocation21_spill] sm:$0xff] }
 0x3a2   : > { %v6399_v5 = vpop.permute.xlu1 %2874  ;;  %v6401_v15 = vpop.permute.xlu0 %2789 }
 0x3a3   : > { %v2999_v26 = vadd.f32 %v2998_v55, %v2997_v20  ;;  %v3168_v52 = vmul.f32 %v6399_v5, %v1381_v61  ;;  %3589 = vmatpush3.bf16.msra.mxu1 %v3196_v31  ;;  %v3151_v47 = vmul.f32 %v6401_v15, %v1297_v13  ;;  %v1291_v20 = vadd.f32 %v7499_v1, %v6084_v6  ;;  %v7501_v13 = vld [vmem:[#allocation24_spill] sm:$0xff] }
 0x3a4   : > { %v3008_v31 = vsel %vm1865_vm5, %v2926_v57, 0.0  ;;  %vm7502_vm6 = vcmp.eq.s32.totalorder %v7501_v13, %v4978_v19  ;;  %v7509_v57 = vld [vmem:[#allocation187_spill] sm:$0xff]  ;;  %v2932_v1 = vsel %vm701_vm14, %v7511_v16, 0.0 }
 0x3a5   : > { %v3001_v48 = vadd.f32 %v3000_v25, %v2999_v26  ;;  %v3203_v38 = vpack.c.bf16 %v3168_v52, %v3167_v58  ;;  %v2929_v25 = vsel %vm7502_vm6, %v6177_v9, 0.0 }
 0x3a6   : > { %v6419_v51 = vpop.permute.xlu1 %2794  ;;  %v6421_v59 = vpop.permute.xlu0 %2859 }
 0x3a7   : > { %v3003_v40 = vadd.f32 %v3002_v63, %v3001_v48  ;;  %v3152_v3 = vmul.f32 %v6419_v51, %v1301_v30  ;;  %3590 = vmatprep.subr.bf16.mxu1 %v3203_v38  ;;  %v3165_v46 = vmul.f32 %v6421_v59, %v1367_v43  ;;  %v7504_v30 = vld [vmem:[#allocation103_spill] sm:$0xff]  ;;  %v3012_v48 = vsel %vm1865_vm5, %v2928_v62, 0.0 }
 0x3a8   : > { %v1361_v39 = vadd.f32 %v7504_v30, %v6084_v6  ;;  %v7505_v63 = vld [vmem:[#allocation19_spill] sm:$0xff] }
 0x3a9   : > { %v3195_v11 = vpack.c.bf16 %v3152_v3, %v3151_v47  ;;  %v3005_v2 = vadd.f32 %v3004_v36, %v3003_v40  ;;  %v2930_v47 = vsel %vm699_vm10, %v7505_v63, 0.0  ;;  %v3014_v36 = vsel %vm1865_vm5, %v2929_v25, 0.0 }
 0x3aa   : > { %v6438_v0 = vpop.permute.xlu1 %2864  ;;  %v6440_v23 = vpop.permute.xlu0 %2779  ;;  %v3016_v4 = vsel %vm1865_vm5, %v2930_v47, 0.0 }
 0x3ab   : > { %v3166_v54 = vmul.f32 %v6438_v0, %v1371_v53  ;;  %3591 = vmatpush3.bf16.msra.mxu1 %v3195_v11  ;;  %v3007_v61 = vadd.f32 %v3006_v33, %v3005_v2  ;;  %v3149_v52 = vmul.f32 %v6440_v23, %v1287_v29  ;;  %v2931_v11 = vsel %vm700_vm2, %v7507_v10, 0.0  ;;  %v7519_v53 = vld [vmem:[#allocation201_spill] sm:$0xff] }
 0x3ac   : > { %v1277_v33 = vadd.f32 %v7509_v57, %v6084_v6  ;;  %v3018_v62 = vsel %vm1865_vm5, %v2931_v11, 0.0  ;;  %v7523_v29 = vld [vmem:[#allocation193_spill] sm:$0xff] }
 0x3ad   : > { %v3202_v55 = vpack.c.bf16 %v3166_v54, %v3165_v46  ;;  %v3009_v8 = vadd.f32 %v3008_v31, %v3007_v61  ;;  %v7510_v46 = vld [vmem:[#allocation189_spill] sm:$0xff] }
 0x3ae   : > { %v6458_v26 = vpop.permute.xlu1 %2784  ;;  %v6460_v58 = vpop.permute.xlu0 %2849  ;;  %v1281_v54 = vadd.f32 %v7510_v46, %v6084_v6 }
 0x3af   : > { %v3150_v41 = vmul.f32 %v6458_v26, %v1291_v20  ;;  %3592 = vmatprep.subr.bf16.mxu1 %v3202_v55  ;;  %v3011_v22 = vadd.f32 %v3010_v56, %v3009_v8  ;;  %v3163_v21 = vmul.f32 %v6460_v58, %v1357_v17  ;;  %v7516_v17 = vld [vmem:[#allocation93_spill] sm:$0xff] }
 0x3b0   : > { %v1351_v30 = vadd.f32 %v7516_v17, %v6084_v6 }
 0x3b1   : > { %v3194_v38 = vpack.c.bf16 %v3150_v41, %v3149_v52  ;;  %v3013_v9 = vadd.f32 %v3012_v48, %v3011_v22  ;;  %v7513_v52 = vld [vmem:[#allocation202_spill] sm:$0xff]  ;;  %v7515_v22 = vld [vmem:[#allocation87_spill] sm:$0xff] }
 0x3b2   : > { %v6478_v3 = vpop.permute.xlu1 %2854  ;;  %v6480_v14 = vpop.permute.xlu0 %2769  ;;  %v2933_v13 = vsel %vm702_vm1, %v7513_v52, 0.0  ;;  %v1347_v44 = vadd.f32 %v7515_v22, %v6084_v6  ;;  %v7526_v22 = vld [vmem:[#allocation56_spill] sm:$0xff] }
 0x3b3   : > { %v3164_v43 = vmul.f32 %v6478_v3, %v1361_v39  ;;  %3593 = vmatpush3.bf16.msra.mxu1 %v3194_v38  ;;  %v3015_v2 = vadd.f32 %v3014_v36, %v3013_v9  ;;  %v3147_v8 = vmul.f32 %v6480_v14, %v1277_v33  ;;  %v3020_v39 = vsel %vm1865_vm5, %v2932_v1, 0.0  ;;  %v7517_v38 = vld [vmem:[#allocation194_spill] sm:$0xff]  ;;  %v7521_v33 = vld [vmem:[#allocation183_spill] sm:$0xff] }
 0x3b4   : > { %v2934_v40 = vsel %vm703_vm13, %v7517_v38, 0.0  ;;  %v1267_v46 = vadd.f32 %v7521_v33, %v6084_v6  ;;  %vm7527_vm2 = vcmp.eq.s32.totalorder %v7526_v22, %v4978_v19  ;;  %v7529_v38 = vld [vmem:[#allocation82_spill] sm:$0xff]  ;;  %v7536_v1 = vld [vmem:[#allocation179_spill] sm:$0xff] }
 0x3b5   : > { %v3201_v61 = vpack.c.bf16 %v3164_v43, %v3163_v21  ;;  %v3017_v55 = vadd.f32 %v3016_v4, %v3015_v2  ;;  %v3022_v21 = vsel %vm1865_vm5, %v2933_v13, 0.0  ;;  %v2935_v2 = vsel %vm704_vm0, %v7519_v53, 0.0 }
 0x3b6   : > { %v6498_v20 = vpop.permute.xlu1 %2774  ;;  %v6500_v31 = vpop.permute.xlu0 %2839  ;;  %v3026_v52 = vsel %vm1865_vm5, %v2935_v2, 0.0  ;;  %v1341_v63 = vadd.f32 %v7529_v38, %v6084_v6 }
 0x3b7   : > { %v3148_v56 = vmul.f32 %v6498_v20, %v1281_v54  ;;  %3594 = vmatprep.subr.bf16.mxu1 %v3201_v61  ;;  %v3019_v25 = vadd.f32 %v3018_v62, %v3017_v55  ;;  %v3161_v43 = vmul.f32 %v6500_v31, %v1347_v44  ;;  %v7522_v54 = vld [vmem:[#allocation185_spill] sm:$0xff]  ;;  %v3024_v61 = vsel %vm1865_vm5, %v2934_v40, 0.0 }
 0x3b8   : > { %v1271_v4 = vadd.f32 %v7522_v54, %v6084_v6  ;;  %v2936_v55 = vsel %vm705_vm8, %v7523_v29, 0.0 }
 0x3b9   : > { %v3193_v48 = vpack.c.bf16 %v3148_v56, %v3147_v8  ;;  %v3021_v36 = vadd.f32 %v3020_v39, %v3019_v25  ;;  %v7525_v25 = vld [vmem:[#allocation191_spill] sm:$0xff]  ;;  %v7528_v39 = vld [vmem:[#allocation77_spill] sm:$0xff]  ;;  %v3028_v40 = vsel %vm1865_vm5, %v2936_v55, 0.0  ;;  %v1257_v55 = vadd.f32 %v7536_v1, %v6084_v6 }
 0x3ba   : > { %v6518_v47 = vpop.permute.xlu1 %2844  ;;  %v2760_v9 = vpop.permute.xlu0 %2759  ;;  %v2937_v44 = vsel %vm7527_vm2, %v7525_v25, 0.0 }
 0x3bb   : > { %v3162_v10 = vmul.f32 %v6518_v47, %v1351_v30  ;;  %3595 = vmatpush3.bf16.msra.mxu1 %v3193_v48  ;;  %v3023_v57 = vadd.f32 %v3022_v21, %v3021_v36  ;;  %v3145_v41 = vmul.f32 %v2760_v9, %v1267_v46  ;;  %v752_v30 = vsub.s32 2, %v7262_v12  ;;  %v7530_v21 = vld [vmem:[#allocation192_spill] sm:$0xff] }
 0x3bc   : > { %v1337_v48 = vadd.f32 %v7528_v39, %v6084_v6  ;;  %v7538_v39 = vld [vmem:[#allocation68_spill] sm:$0xff] }
 0x3bd   : > { %v3200_v16 = vpack.c.bf16 %v3162_v10, %v3161_v43  ;;  %v3025_v56 = vadd.f32 %v3024_v61, %v3023_v57  ;;  %v7531_v43 = vld [vmem:[#allocation59_spill] sm:$0xff]  ;;  %v3030_v57 = vsel %vm1865_vm5, %v2937_v44, 0.0  ;;  %vm7539_vm0 = vcmp.eq.s32.totalorder %v7538_v39, %v4978_v19 }
 0x3be   : > { %v2765_v62 = vpop.permute.xlu1 %2764  ;;  %v6536_v8 = vpop.permute.xlu0 %2829  ;;  %vm7532_vm8 = vcmp.eq.s32.totalorder %v7531_v43, %v4978_v19 }
 0x3bf   : > { %v3146_v13 = vmul.f32 %v2765_v62, %v1271_v4  ;;  %3596 = vmatprep.subr.bf16.mxu1 %v3200_v16  ;;  %v3027_v17 = vadd.f32 %v3026_v52, %v3025_v56  ;;  %v2938_v10 = vsel %vm7532_vm8, %v7530_v21, 0.0  ;;  %v3159_v33 = vmul.f32 %v6536_v8, %v1337_v48  ;;  %v7533_v4 = vld [vmem:[#allocation63_spill] sm:$0xff]  ;;  %v7535_v16 = vld [vmem:[#allocation13_spill] sm:$0xff] }
 0x3c0   : > { %vm7534_vm13 = vcmp.eq.s32.totalorder %v7533_v4, %v4978_v19  ;;  %v753_v29 = vrot.slane %v7535_v16, %v752_v30  ;;  %v7537_v56 = vld [vmem:[#allocation181_spill] sm:$0xff]  ;;  %v7541_v21 = vld [vmem:[#allocation75_spill] sm:$0xff]  ;;  %v7546_v4 = vld [vmem:[#allocation88_spill] sm:$0xff] }
 0x3c1   : > { %v3192_v36 = vpack.c.bf16 %v3146_v13, %v3145_v41  ;;  %v3029_v11 = vadd.f32 %v3028_v40, %v3027_v17  ;;  %v1261_v52 = vadd.f32 %v7537_v56, %v6084_v6  ;;  %v3032_v41 = vsel %vm1865_vm5, %v2938_v10, 0.0 }
 0x3c2   : > { %v6553_v53 = vpop.permute.xlu1 %2834  ;;  %v2750_v2 = vpop.permute.xlu0 %2749  ;;  %vm760_vm1 = vcmp.eq.s32.totalorder %v753_v29, %v7262_v12  ;;  %vm7542_vm14 = vcmp.eq.s32.totalorder %v7541_v21, %v4978_v19  ;;  %v7544_v12 = vld [vmem:[#allocation84_spill] sm:$0xff]  ;;  %vm7547_vm9 = vcmp.eq.s32.totalorder %v7546_v4, %v4978_v19  ;;  %v7548_v29 = vld [vmem:[#allocation91_spill] sm:$0xff] }
 0x3c3   : > { %v3160_v46 = vmul.f32 %v6553_v53, %v1341_v63  ;;  %3597 = vmatpush3.bf16.msra.mxu1 %v3192_v36  ;;  %v3031_v54 = vadd.f32 %v3030_v57, %v3029_v11  ;;  %v2939_v61 = vsel %vm7534_vm13, %v2750_v2, 0.0  ;;  %v3143_v17 = vmul.f32 %v2750_v2, %v1257_v55  ;;  %vm3551_vm10 = vmpackc.low %vm760_vm1, %vm760_vm1 }
 0x3c4   : > { %v3034_v44 = vsel %vm1865_vm5, %v2939_v61, 0.0  ;;  %v2941_v63 = vsel %vm710_vm12, %v2760_v9, 0.0  ;;  %v2942_v43 = vsel %vm7542_vm14, %v2765_v62, 0.0  ;;  %v2943_v9 = vsel %vm712_vm11, %v6480_v14, 0.0 }
 0x3c5   : > { %v3199_v13 = vpack.c.bf16 %v3160_v46, %v3159_v33  ;;  %v3033_v25 = vadd.f32 %v3032_v41, %v3031_v54  ;;  %v3038_v11 = vsel %vm1865_vm5, %v2941_v63, 0.0  ;;  %v3040_v33 = vsel %vm1865_vm5, %v2942_v43, 0.0 }
 0x3c6   : > { %v2755_v22 = vpop.permute.xlu1 %2754  ;;  %vm7545_vm12 = vcmp.eq.s32.totalorder %v7544_v12, %v4978_v19  ;;  %v3042_v62 = vsel %vm1865_vm5, %v2943_v9, 0.0  ;;  %v2945_v61 = vsel %vm7547_vm9, %v6440_v23, 0.0  ;;  %vm7549_vm11 = vcmp.eq.s32.totalorder %v7548_v29, %v4978_v19  ;;  %v7552_v23 = vld [vmem:[#allocation100_spill] sm:$0xff] }
 0x3c7   : > { %v2940_v48 = vsel %vm7539_vm0, %v2755_v22, 0.0  ;;  %v3144_v38 = vmul.f32 %v2755_v22, %v1261_v52  ;;  %3598 = vmatprep.subr.bf16.mxu1 %v3199_v13  ;;  %v3035_v40 = vadd.f32 %v3034_v44, %v3033_v25  ;;  %v2944_v46 = vsel %vm7545_vm12, %v6498_v20, 0.0 }
 0x3c8   : > { %v3036_v6 = vsel %vm1865_vm5, %v2940_v48, 0.0  ;;  %v3044_v14 = vsel %vm1865_vm5, %v2944_v46, 0.0  ;;  %v2946_v1 = vsel %vm7549_vm11, %v6458_v26, 0.0  ;;  %v3046_v20 = vsel %vm1865_vm5, %v2945_v61, 0.0  ;;  %v7554_v26 = vld [vmem:[#allocation104_spill] sm:$0xff] }
 0x3c9   : > { %v3191_v36 = vpack.c.bf16 %v3144_v38, %v3143_v17  ;;  %v3037_v10 = vadd.f32 %v3036_v6, %v3035_v40  ;;  %v3048_v41 = vsel %vm1865_vm5, %v2946_v1, 0.0  ;;  %vm7553_vm15 = vcmp.eq.s32.totalorder %v7552_v23, %v4978_v19 }
 0x3ca   : > { %v2948_v13 = vsel %vm7553_vm15, %v6419_v51, 0.0  ;;  %vm7555_vm7 = vcmp.eq.s32.totalorder %v7554_v26, %v4978_v19  ;;  %v7558_v51 = vld [vmem:[#allocation111_spill] sm:$0xff] }
 0x3cb   : > { %3599 = vmatpush3.bf16.msra.mxu1 %v3191_v36  ;;  %v3039_v57 = vadd.f32 %v3038_v11, %v3037_v10  ;;  %v2949_v44 = vsel %vm7555_vm7, %v6361_v7, 0.0  ;;  %v3052_v39 = vsel %vm1865_vm5, %v2948_v13, 0.0  ;;  %vm7559_vm2 = vcmp.eq.s32.totalorder %v7558_v51, %v4978_v19  ;;  %v7560_v7 = vld [vmem:[#allocation116_spill] sm:$0xff] }
 0x3cc   : > { %v3054_v30 = vsel %vm1865_vm5, %v2949_v44, 0.0  ;;  %v2951_v63 = vsel %vm7559_vm2, %v6321_v37, 0.0  ;;  %vm7561_vm8 = vcmp.eq.s32.totalorder %v7560_v7, %v4978_v19  ;;  %v7564_v37 = vld [vmem:[#allocation123_spill] sm:$0xff] }
 0x3cd   : > { %v3041_v54 = vadd.f32 %v3040_v33, %v3039_v57  ;;  %v2952_v36 = vsel %vm7561_vm8, %v6339_v35, 0.0  ;;  %v3058_v43 = vsel %vm1865_vm5, %v2951_v63, 0.0  ;;  %vm7565_vm0 = vcmp.eq.s32.totalorder %v7564_v37, %v4978_v19  ;;  %v7566_v35 = vld [vmem:[#allocation127_spill] sm:$0xff] }
 0x3ce   : > { %3552 = vmatmul.mubr.msk.bf16.vlgmr.msra.gmra.mxu1 %vm3551_vm10, %v7468_v50  ;;  %v7550_v50 = vld [vmem:[#allocation95_spill] sm:$0xff]  ;;  %v3060_v2 = vsel %vm1865_vm5, %v2952_v36, 0.0  ;;  %v2954_v9 = vsel %vm7565_vm0, %v6297_v27, 0.0  ;;  %vm7567_vm1 = vcmp.eq.s32.totalorder %v7566_v35, %v4978_v19  ;;  %v7570_v27 = vld [vmem:[#allocation136_spill] sm:$0xff] }
 0x3cf   : > { %v3043_v16 = vadd.f32 %v3042_v62, %v3041_v54  ;;  %vm7551_vm4 = vcmp.eq.s32.totalorder %v7550_v50, %v4978_v19  ;;  %v2955_v12 = vsel %vm7567_vm1, %v6536_v8, 0.0  ;;  %v3064_v54 = vsel %vm1865_vm5, %v2954_v9, 0.0  ;;  %v7572_v8 = vld [vmem:[#allocation139_spill] sm:$0xff] }
 0x3d0   : > { %v2947_v56 = vsel %vm7551_vm4, %v6401_v15, 0.0  ;;  %v7556_v15 = vld [vmem:[#allocation107_spill] sm:$0xff]  ;;  %v3066_v61 = vsel %vm1865_vm5, %v2955_v12, 0.0  ;;  %vm7571_vm10 = vcmp.eq.s32.totalorder %v7570_v27, %v4978_v19  ;;  %vm7573_vm12 = vcmp.eq.s32.totalorder %v7572_v8, %v4978_v19 }
 0x3d1   : > { %v3045_v55 = vadd.f32 %v3044_v14, %v3043_v16  ;;  %v3050_v22 = vsel %vm1865_vm5, %v2947_v56, 0.0  ;;  %vm7557_vm6 = vcmp.eq.s32.totalorder %v7556_v15, %v4978_v19  ;;  %v2957_v16 = vsel %vm7571_vm10, %v6500_v31, 0.0  ;;  %v7576_v31 = vld [vmem:[#allocation148_spill] sm:$0xff] }
 0x3d2   : > { %v2950_v48 = vsel %vm7557_vm6, %v6379_v60, 0.0  ;;  %v7562_v60 = vld [vmem:[#allocation120_spill] sm:$0xff]  ;;  %v2958_v1 = vsel %vm7573_vm12, %v6518_v47, 0.0  ;;  %vm7577_vm11 = vcmp.eq.s32.totalorder %v7576_v31, %v4978_v19  ;;  %vm7599_vm10 = vcmask 32768  }
 0x3d3   : > { %v3047_v52 = vadd.f32 %v3046_v20, %v3045_v55  ;;  %v3056_v6 = vsel %vm1865_vm5, %v2950_v48, 0.0  ;;  %vm7563_vm13 = vcmp.eq.s32.totalorder %v7562_v60, %v4978_v19  ;;  %v3070_v20 = vsel %vm1865_vm5, %v2957_v16, 0.0  ;;  %v7578_v47 = vld [vmem:[#allocation152_spill] sm:$0xff] }
 0x3d4   : > { %v2953_v10 = vsel %vm7563_vm13, %v6277_v45, 0.0  ;;  %v7568_v45 = vld [vmem:[#allocation132_spill] sm:$0xff]  ;;  %vm7579_vm4 = vcmp.eq.s32.totalorder %v7578_v47, %v4978_v19 }
 0x3d5   : > { %v3049_v25 = vadd.f32 %v3048_v41, %v3047_v52  ;;  %v3062_v33 = vsel %vm1865_vm5, %v2953_v10, 0.0  ;;  %vm7569_vm14 = vcmp.eq.s32.totalorder %v7568_v45, %v4978_v19  ;;  %v3072_v52 = vsel %vm1865_vm5, %v2958_v1, 0.0  ;;  %v3299_v31 = vld [vmem:[#allocation2] sm:$0x1f] }
 0x3d6   : > { %v2956_v62 = vsel %vm7569_vm14, %v6553_v53, 0.0  ;;  %v7574_v53 = vld [vmem:[#allocation143_spill] sm:$0xff]  ;;  %v2960_v41 = vsel %vm7577_vm11, %v6478_v3, 0.0 }
 0x3d7   : > { %v3051_v17 = vadd.f32 %v3050_v22, %v3049_v25  ;;  %v3068_v29 = vsel %vm1865_vm5, %v2956_v62, 0.0  ;;  %vm7575_vm9 = vcmp.eq.s32.totalorder %v7574_v53, %v4978_v19  ;;  %v2961_v25 = vsel %vm7579_vm4, %v6421_v59, 0.0  ;;  %v7582_v3 = vld [vmem:[#allocation159_spill] sm:$0xff] }
 0x3d8   : > { %v2959_v50 = vsel %vm7575_vm9, %v6460_v58, 0.0  ;;  %v3076_v26 = vsel %vm1865_vm5, %v2960_v41, 0.0  ;;  %v7580_v58 = vld [vmem:[#allocation155_spill] sm:$0xff]  ;;  %vm7583_vm7 = vcmp.eq.s32.totalorder %v7582_v3, %v4978_v19 }
 0x3d9   : > { %v3053_v38 = vadd.f32 %v3052_v39, %v3051_v17  ;;  %v3074_v13 = vsel %vm1865_vm5, %v2959_v50, 0.0  ;;  %vm7581_vm15 = vcmp.eq.s32.totalorder %v7580_v58, %v4978_v19  ;;  %v3078_v39 = vsel %vm1865_vm5, %v2961_v25, 0.0  ;;  %v7584_v59 = vld [vmem:[#allocation163_spill] sm:$0xff] }
 0x3da   : > { %v2962_v44 = vsel %vm7581_vm15, %v6438_v0, 0.0  ;;  %v2963_v15 = vsel %vm7583_vm7, %v6381_v49, 0.0  ;;  %vm7585_vm6 = vcmp.eq.s32.totalorder %v7584_v59, %v4978_v19  ;;  %v7586_v0 = vld [vmem:[#allocation165_spill] sm:$0xff]  ;;  %v7588_v49 = vld [vmem:[#allocation167_spill] sm:$0xff] }
 0x3db   : > { %v3055_v40 = vadd.f32 %v3054_v30, %v3053_v38  ;;  %v3080_v38 = vsel %vm1865_vm5, %v2962_v44, 0.0  ;;  %v2964_v30 = vsel %vm7585_vm6, %v6399_v5, 0.0  ;;  %v3082_v63 = vsel %vm1865_vm5, %v2963_v15, 0.0  ;;  %v7590_v5 = vld [vmem:[#allocation170_spill] sm:$0xff] }
 0x3dc   : > { %vm7587_vm2 = vcmp.eq.s32.totalorder %v7586_v0, %v4978_v19  ;;  %v3084_v7 = vsel %vm1865_vm5, %v2964_v30, 0.0  ;;  %vm7589_vm8 = vcmp.eq.s32.totalorder %v7588_v49, %v4978_v19  ;;  %vm7591_vm13 = vcmp.eq.s32.totalorder %v7590_v5, %v4978_v19 }
 0x3dd   : > { %v3057_v21 = vadd.f32 %v3056_v6, %v3055_v40  ;;  %v2965_v40 = vsel %vm7587_vm2, %v6341_v32, 0.0  ;;  %v2966_v36 = vsel %vm7589_vm8, %v6359_v24, 0.0  ;;  %v2967_v60 = vsel %vm7591_vm13, %v6299_v34, 0.0  ;;  %v7592_v32 = vld [vmem:[#allocation173_spill] sm:$0xff]  ;;  %v7594_v24 = vld [vmem:[#allocation175_spill] sm:$0xff] }
 0x3de   : > { %vm7593_vm0 = vcmp.eq.s32.totalorder %v7592_v32, %v4978_v19  ;;  %v3090_v9 = vsel %vm1865_vm5, %v2967_v60, 0.0  ;;  %vm7595_vm1 = vcmp.eq.s32.totalorder %v7594_v24, %v4978_v19  ;;  %v7596_v34 = vld [vmem:[#allocation177_spill] sm:$0xff] }
 0x3df   : > { %v3059_v11 = vadd.f32 %v3058_v43, %v3057_v21  ;;  %v3086_v43 = vsel %vm1865_vm5, %v2965_v40, 0.0  ;;  %vm7597_vm14 = vcmp.eq.s32.totalorder %v7596_v34, %v4978_v19 }
 0x3e0   : > { %v2970_v12 = vsel %vm7597_vm14, %v6275_v42, 0.0 }
 0x3e1   : > { %v3061_v57 = vadd.f32 %v3060_v2, %v3059_v11  ;;  %v3088_v11 = vsel %vm1865_vm5, %v2966_v36, 0.0  ;;  %v2968_v2 = vsel %vm7593_vm0, %v6319_v18, 0.0  ;;  %v3096_v45 = vsel %vm1865_vm5, %v2970_v12, 0.0 }
 0x3e2   : > { %v3092_v35 = vsel %vm1865_vm5, %v2968_v2, 0.0 }
 0x3e3   : > { %v3063_v46 = vadd.f32 %v3062_v33, %v3061_v57  ;;  %v2969_v57 = vsel %vm7595_vm1, %v6253_v28, 0.0  ;;  %v3104_v28 = vld [vmem:[#allocation6] sm:$0x1] }
 0x3e5   : > { %v3065_v4 = vadd.f32 %v3064_v54, %v3063_v46  ;;  %v3094_v54 = vsel %vm1865_vm5, %v2969_v57, 0.0 }
 0x3e7   : > { %v3067_v14 = vadd.f32 %v3066_v61, %v3065_v4 }
 0x3e9   : > { %v3069_v55 = vadd.f32 %v3068_v29, %v3067_v14  ;;  %v7598_v29 = vld [vmem:[#allocation195_spill] sm:$0xff] }
 0x3ea   : > { %v3105_v8 = vmul.f32 %v7598_v29, %v3104_v28 }
 0x3eb   : > { %v3071_v56 = vadd.f32 %v3070_v20, %v3069_v55 }
 0x3ed   : > { %v3073_v23 = vadd.f32 %v3072_v52, %v3071_v56 }
 0x3ef   : > { %v3075_v22 = vadd.f32 %v3074_v13, %v3073_v23  ;;  %v3310_v41 = vpop.xlane.xlu0 %3309 }
 0x3f0   : > { %v3311_v25 = vmul.f32 %v3310_v41, %v3299_v31 }
 0x3f1   : > { %v3077_v17 = vadd.f32 %v3076_v26, %v3075_v22 }
 0x3f3   : > { %v3079_v48 = vadd.f32 %v3078_v39, %v3077_v17 }
 0x3f5   : > { %v3081_v51 = vadd.f32 %v3080_v38, %v3079_v48 }
 0x3f7   : > { %v3083_v6 = vadd.f32 %v3082_v63, %v3081_v51 }
 0x3f9   : > { %v3085_v21 = vadd.f32 %v3084_v7, %v3083_v6 }
 0x3fb   : > { %v3087_v10 = vadd.f32 %v3086_v43, %v3085_v21 }
 0x3fd   : > { %v3089_v37 = vadd.f32 %v3088_v11, %v3087_v10 }
 0x3ff   : > { %v3091_v33 = vadd.f32 %v3090_v9, %v3089_v37 }
 0x401   : > { %v3093_v46 = vadd.f32 %v3092_v35, %v3091_v33 }
 0x403   : > { %v3095_v18 = vadd.f32 %v3094_v54, %v3093_v46 }
 0x405   : > { %v3097_v62 = vadd.f32 %v3096_v45, %v3095_v18 }
 0x407   : > { %v3098_v4 = vrot.slane %v3097_v62, 4 }
 0x409   : > { %v3099_v61 = vadd.f32 %v3098_v4, %v3097_v62 }
 0x40b   : > { %v3100_v27 = vrot.slane %v3099_v61, 2 }
 0x40d   : > { %v3101_v16 = vadd.f32 %v3100_v27, %v3099_v61 }
 0x40f   : > { %v3102_v14 = vrot.slane %v3101_v16, 1 }
 0x411   : > { %v3103_v1 = vadd.f32 %v3102_v14, %v3101_v16 }
 0x413   : > { %v3106_v55 = vadd.f32 %v3105_v8, %v3103_v1 }
 0x415   : > { %3108 = vst.msk [vmem:[#allocation6] sm:$0x1] %vm7599_vm10, %v3106_v55 }
 0x44e   : > { %v3578_v42 = vpop.f32.mrf.mxu1 }
 0x450   : > { %v3579_v20 = vpop.f32.mrf.mxu1 }
 0x451   : > { %v3580_v53 = vadd.f32 %v3579_v20, %v3578_v42 }
 0x452   : > { %v3581_v50 = vpop.f32.mrf.mxu1 }
 0x454   : > { %v3582_v56 = vpop.f32.mrf.mxu1 }
 0x48e   : > { %v3600_v52 = vpop.f32.mrf.mxu1 }
 0x490   : > { %v3601_v23 = vpop.f32.mrf.mxu1 }
 0x491   : > { %v3602_v13 = vadd.f32 %v3601_v23, %v3600_v52 }
 0x492   : > { %v3603_v47 = vpop.f32.mrf.mxu1 }
 0x493   : > { %v3294_v22 = vadd.f32 %v3602_v13, %v3580_v53  ;;  %3317 = sbr.rel (%p3553_p6) target bundleno = 1338 (0x53a), region = 48 }
 0x494   : > { %v3604_v26 = vpop.f32.mrf.mxu1 }
 0x495   : > { %v3312_v58 = vadd.f32 %v3311_v25, %v3294_v22 }
 0x497   : > { %3313 = vst [vmem:[#allocation2] sm:$0x1f] %v3312_v58 }
 0x498   : > { %v3318_v44 = vld [vmem:[#allocation6] sm:$0x1]  ;;  %v7600_v3 = vld [vmem:[#allocation198_spill] sm:$0xff]  ;;  %vm7602_vm12 = vcmask 36864  }
 0x499   : > { %vm3319_vm5 = vcmp.gt.f32.partialorder %v3318_v44, 0.0 }
 0x49a   : > { %v3320_v17 = vsel %vm3319_vm5, %v3318_v44, 1.0 }
 0x49b   : > { %3844 = vrcp.f32 %v3320_v17 }
 0x49e   : > { %v3323_v30 = vld [vmem:[#allocation2] sm:$0x1f] }
 0x4a8   : > { %v3845_v39 = vpop.eup %3844 }
 0x4a9   : > { %v3328_v15 = vrot.slane %v3845_v39, %v7600_v3 }
 0x4ab   : > { %v3330_v38 = vsel %vm3110_vm3, %v3328_v15, 0.0 }
 0x4ac   : > { %v3331_v59 = vsel %vm7602_vm12, %v3330_v38, 0.0 }
 0x4ad   : > { %3332 = vadd.xlane.f32.xlu0 %v3331_v59 }
 0x536   : > { %v3333_v51 = vpop.xlane.xlu0 %3332 }
 0x537   : > { %v3334_v63 = vmul.f32 %v3333_v51, %v3323_v30 }
 0x539   : > { %3335 = vst [vmem:[#allocation2] sm:$0x1f] %v3334_v63 }
 0x53a PF: > { %p3634_p7 = scmp.eq.s32.totalorder %s3992_s28, 2  ;;  %s3938_s26 = smov [#allocation4]  }
 0x53b   : > { %s3363_s29 = sshll.u32 %s3938_s26, 4  ;;  %s3939_s9 = smov [#allocation2]   ;;  %s3364_s29 = int_to_ptr.vmem [resolvable:$true] %s3363_s29 }
 0x53c   : > { %s3348_s10 = sshll.u32 %s3939_s9, 4  ;;  %s3846_s11 = scalar_lea.vmem %s3364_s29, 16  ;;  %s3349_s10 = int_to_ptr.vmem [resolvable:$true] %s3348_s10 }
 0x53d   : > { %p3847_p8 = scmp.ne.s32.totalorder %s3364_s29, %s3846_s11  ;;  %s3852_s12 = scalar_lea.vmem %s3364_s29, 32 }
 0x53e   : > { %p3853_p11 = scmp.lt.s32.totalorder %s3364_s29, %s3364_s29  ;;  %p3854_p12 = scmp.lt.s32.totalorder %s3852_s12, %s3846_s11 }
 0x53f   : > { %p3848_p9 = pnand %p3847_p8, %p3634_p7 }
 0x540   : > { %p3855_p13 = por %p3854_p12, %p3853_p11 }
 0x541   : > { %p3849_p10 = pneg %p3848_p9 }
 0x543   : > { %p3856_p0 = pnand %p3855_p13, %p3849_p10 }
 0x545   : > { %3859 = shalt.err (!%p3856_p0)
}
 0x546   : > { %3625 = dma.vmem_to_hbm [thread:$0]  (%p3634_p7), %s3364_s29, 16, %s6770_s7, [#allocation5]  }
 0x547   : > { %s3870_s17 = scalar_lea.vmem %s3349_s10, 128  ;;  %p3877_p4 = scmp.lt.s32.totalorder %s3349_s10, %s3349_s10 }
 0x548   : > { %p3871_p1 = scmp.ne.s32.totalorder %s3349_s10, %s3870_s17  ;;  %p3878_p5 = scmp.lt.s32.totalorder %s3870_s17, %s3870_s17 }
 0x54a   : > { %p3872_p2 = pnand %p3871_p1, %p3634_p7  ;;  %p3879_p6 = por %p3878_p5, %p3877_p4 }
 0x54c   : > { %p3873_p3 = pneg %p3872_p2 }
 0x54e   : > { %p3880_p8 = pnand %p3879_p6, %p3873_p3 }
 0x550   : > { %3883 = shalt.err (!%p3880_p8)
}
 0x551   : > { %3623 = dma.vmem_to_hbm [thread:$0]  (%p3634_p7), %s3349_s10, 128, %s6768_s5, [#allocation3]  }
 0x552   : > { %s3940_s21 = smov [#allocation6]  }
 0x553   : > { %s3374_s23 = sshll.u32 %s3940_s21, 4  ;;  %s3375_s23 = int_to_ptr.vmem [resolvable:$true] %s3374_s23 }
 0x554   : > { %s3894_s24 = scalar_lea.vmem %s3375_s23, 16  ;;  %s3900_s13 = scalar_lea.vmem %s3375_s23, 32 }
 0x555   : > { %p3895_p9 = scmp.ne.s32.totalorder %s3375_s23, %s3894_s24  ;;  %p3901_p12 = scmp.lt.s32.totalorder %s3375_s23, %s3375_s23 }
 0x556   : > { %p3902_p13 = scmp.lt.s32.totalorder %s3900_s13, %s3894_s24 }
 0x557   : > { %p3896_p10 = pnand %p3895_p9, %p3634_p7 }
 0x558   : > { %p3903_p0 = por %p3902_p13, %p3901_p12 }
 0x559   : > { %p3897_p11 = pneg %p3896_p10 }
 0x55b   : > { %p3904_p1 = pnand %p3903_p0, %p3897_p11 }
 0x55d   : > { %3907 = shalt.err (!%p3904_p1)
}
 0x55e   : > { %3627 = dma.vmem_to_hbm [thread:$0]  (%p3634_p7), %s3375_s23, 16, %s6771_s8, [#allocation5]  }
 0x55f   : > { %3923 = dma.done.wait (%p3634_p7), [#allocation3], 128  }
 0x560   : > { %3925 = vsyncadd (%p3634_p7), [#allocation3], 4294967168 }
 0x561   : > { %3927 = dma.done.wait (%p3634_p7), [#allocation5], 32  }
 0x562   : > { %3929 = vsyncadd (%p3634_p7), [#allocation5], 4294967264 }
 0x563 PF: > { %s21_s27 = sadd.s32 1, %s3932_s27  }
 0x564   : > { %p18_p2 = scmp.ge.s32.totalorder %s21_s27, 5  }
 0x566   :  { %20 = sbr.rel (!%p18_p2) target bundleno = 2 (0x2), region = 109 }
 0x56b   :  { %3403 = vsyncpa [#allocation3], 1 }
 0x56c   :  { %3405 = vsyncpa [#allocation3 + $0x1], 1 }
 0x56d   :  { %3406 = vsyncpa [#allocation5], 1 }

</bundles_post_ra>
